<compile_context>
chip_gen: v7x
topology: tpu7x:2x2x1
jax: 0.10.0
libtpu: 0.0.40
codegen_flags: <defaults>
</compile_context>

<pallas_src>
import functools

import jax
import jax.numpy as jnp
import numpy as np
from jax.experimental import pallas as pl
from jax.experimental.pallas import tpu as pltpu

EPS = 1e-8
SPEED_OF_SOUND = 343.0
LANE = 128


def _propeller_noise_kernel(speed_ref, carry_ref, tri_ref, ehgc_ref, poly_ref,
                            out_ref, *, n_harmonics, n_blades, sample_rate,
                            sub_rows):
    R = out_ref.shape[0]
    n_sub = R // sub_rows

    tri = tri_ref[...]                       # (128, 128) bf16, loop-invariant, never re-DMA'd
    p1 = poly_ref[0]
    p2 = poly_ref[1]
    two_pi_over_sr = 2.0 * np.pi / sample_rate
    inv_c = 1.0 / SPEED_OF_SOUND
    h = float(n_harmonics)
    hp1 = float(n_harmonics + 1)

    def sub_chunk(s, carry_unused):
        off = pl.multiple_of(s * sub_rows, sub_rows)
        speed = speed_ref[pl.ds(off, sub_rows), :]       # (SUB, 128) f32
        row_phase = carry_ref[pl.ds(off, sub_rows), :]   # (SUB, 1)   f32 (incl. n_blades*phase)

        # ---- intra-row (128-lane) inclusive cumsum of the blade rate on the MXU ----
        base = speed * n_blades
        hi = base.astype(jnp.bfloat16)
        lo = (base - hi.astype(jnp.float32)).astype(jnp.bfloat16)
        intra = (jnp.dot(hi, tri, preferred_element_type=jnp.float32)
                 + jnp.dot(lo, tri, preferred_element_type=jnp.float32))
        theta = two_pi_over_sr * intra + row_phase       # fundamental instantaneous phase

        s1 = jnp.sin(theta)
        two_c = 2.0 * jnp.cos(theta)

        # ---- EPS term: sum_k sin(k*theta) in closed (Dirichlet) form on the EUP ----
        half = 0.5 * theta
        sh = jnp.sin(half)
        num = jnp.sin(h * half) * jnp.sin(hp1 * half)
        near_zero = jnp.abs(sh) < 1e-5                   # theta ~ 0 (mod 2*pi): true sum -> 0
        inv_sh = pl.reciprocal(jnp.where(near_zero, 1.0, sh), approx=True)
        eps_sum = jnp.where(near_zero, 0.0, num * inv_sh)

        # ---- factored basis gain, Horner form: exp(p1*x + p2*x^2) (1 exp per sample) ----
        x = speed * inv_c
        eb = jnp.exp(x * (p1 + p2 * x))

        # ---- Clenshaw: sum_k exp(hgc_k)*sin(k*theta) = b_1 * sin(theta) ----
        # b_k = c_k + 2cos(theta)*b_{k+1} - b_{k+2}; coefficients enter as SMEM scalar adds.
        if n_harmonics == 1:
            acc_w = ehgc_ref[0] * s1
        else:
            b2 = ehgc_ref[n_harmonics - 1] + jnp.zeros_like(theta)   # b_H
            b1 = two_c * b2 + ehgc_ref[n_harmonics - 2]              # b_{H-1}
            for k in range(n_harmonics - 3, -1, -1):
                b1, b2 = two_c * b1 - b2 + ehgc_ref[k], b1
            acc_w = b1 * s1

        out_ref[pl.ds(off, sub_rows), :] = eb * acc_w + EPS * eps_sum
        return carry_unused

    jax.lax.fori_loop(0, n_sub, sub_chunk, 0)


def propeller_noise_gen(speed_rps, phase_shift, harmonic_gain_corrections,
                        poly_coeffs, *, n_blades=2, sample_rate=44100,
                        rows_per_block=512, sub_rows=32):
    """Pallas implementation of PropellerNoiseGen.forward (use_basis_gain=True)."""
    assert sub_rows % 8 == 0 and rows_per_block % sub_rows == 0
    B, T = speed_rps.shape
    H = int(harmonic_gain_corrections.shape[0])

    # --- time tiling: rows of 128 lanes, R rows per grid block ----------------------
    rows = -(-T // LANE)
    R = min(rows_per_block, -(-rows // sub_rows) * sub_rows)
    nblk = -(-rows // R)
    rows_total = nblk * R
    T_pad = rows_total * LANE
    G = B * nblk                       # single flattened parallel grid axis

    speed = speed_rps.astype(jnp.float32)
    speed_p = jnp.pad(speed, ((0, 0), (0, T_pad - T)))
    speed3 = speed_p.reshape(G, R, LANE)

    # --- per-row phase offsets (exclusive prefix of the blade rate) ------------------
    # Accumulated modulo sample_rate: subtracting m*sample_rate shifts every harmonic
    # phase k*theta by exactly 2*pi*k*m, so this is lossless while keeping the running
    # sum (and its f32 rounding) bounded.  Folded with n_blades*phase -> one add/row.
    row_sums = (speed_p.reshape(B, rows_total, LANE).sum(axis=-1)
                * float(n_blades))                                   # (B, rows_total)
    sr = float(sample_rate)

    def _carry_step(s, x):
        excl = s
        s = s + x
        s = s - jnp.floor(s / sr) * sr
        return s, excl

    _, excl = jax.lax.scan(_carry_step, jnp.zeros((B,), jnp.float32), row_sums.T)
    excl = excl.T                                                    # (B, rows_total)

    phase1 = phase_shift.astype(jnp.float32).reshape(B, 1)
    row_phase = ((2.0 * np.pi / sample_rate) * excl
                 + float(n_blades) * phase1)                         # (B, rows_total)
    carry3 = row_phase.reshape(G, R, 1)

    # Upper-triangular ones: (base @ tri)[r, c] = sum_{c' <= c} base[r, c'].
    idx = jnp.arange(LANE)
    tri = (idx[:, None] <= idx[None, :]).astype(jnp.bfloat16)

    ehgc = jnp.exp(harmonic_gain_corrections.astype(jnp.float32)).reshape(H)
    poly1 = poly_coeffs.astype(jnp.float32).reshape(2)

    kernel = functools.partial(
        _propeller_noise_kernel, n_harmonics=H, n_blades=float(n_blades),
        sample_rate=float(sample_rate), sub_rows=sub_rows)

    out = pl.pallas_call(
        kernel,
        out_shape=jax.ShapeDtypeStruct((G, R, LANE), jnp.float32),
        grid=(G,),
        in_specs=[
            pl.BlockSpec((None, R, LANE), lambda g: (g, 0, 0)),      # speed block
            pl.BlockSpec((None, R, 1), lambda g: (g, 0, 0)),         # per-row phase offsets
            pl.BlockSpec((LANE, LANE), lambda g: (0, 0)),            # triangular ones
            pl.BlockSpec(memory_space=pltpu.MemorySpace.SMEM),       # exp(hgc)   (H,)
            pl.BlockSpec(memory_space=pltpu.MemorySpace.SMEM),       # poly coeffs (2,)
        ],
        out_specs=pl.BlockSpec((None, R, LANE), lambda g: (g, 0, 0)),
        compiler_params=pltpu.CompilerParams(
            dimension_semantics=("parallel",)),
    )(speed3, carry3, tri, ehgc, poly1)

    return out.reshape(B, T_pad)[:, :T]


def propeller_noise_gen_reference_np(speed_rps, phase_shift, hgc, poly_coeffs,
                                     *, n_blades=2, sample_rate=44100):
    """float64 numpy reference mirroring the PyTorch forward exactly."""
    speed = np.asarray(speed_rps, np.float64)
    phase = np.asarray(phase_shift, np.float64)
    hgc = np.asarray(hgc, np.float64)
    poly = np.asarray(poly_coeffs, np.float64)
    H = hgc.shape[0]
    coeffs = np.arange(1, H + 1, dtype=np.float64)                        # [H]
    harmonic_phase_shifts = (phase * float(n_blades))[:, None] * coeffs   # [B, H]
    harmonic_freqs = coeffs[None, :, None] * (speed * float(n_blades))[:, None, :]
    phases = (2.0 * np.pi * np.cumsum(harmonic_freqs, axis=-1) / sample_rate
              + harmonic_phase_shifts[..., None])
    harmonics = np.sin(phases)
    x = speed / SPEED_OF_SOUND
    basis_gains = poly[0] * x + poly[1] * x ** 2                          # [B, T]
    gains = basis_gains[:, None, :] + hgc[None, :, None]                  # [B, H, T]
    return ((np.exp(gains) + EPS) * harmonics).sum(axis=-2)


if __name__ == "__main__":
    B, T = 2, 12000           # 94 rows of 128 samples
    N_HARMONICS = 50
    N_BLADES = 2
    SAMPLE_RATE = 44100

    key = jax.random.PRNGKey(0)
    k_poly, k_hgc, k_speed, k_phase = jax.random.split(key, 4)

    # Parameter init mirroring the module's __init__:
    poly_coeffs = jnp.abs(jax.random.normal(k_poly, (2,), dtype=jnp.float32) * 1e-4)
    hgc = jax.random.normal(k_hgc, (N_HARMONICS,), dtype=jnp.float32)

    # Inputs: rotor speed in revolutions/sec (positive), per-batch phase shift.
    speed_rps = jax.random.uniform(k_speed, (B, T), dtype=jnp.float32,
                                   minval=5.0, maxval=20.0)
    phase_shift = jax.random.uniform(k_phase, (B,), dtype=jnp.float32,
                                     minval=0.0, maxval=2.0 * np.pi)

    # rows_per_block is capped at 64 here (default 512) so the small demo still
    # exercises the flattened multi-block grid (G = B*2 = 4) and multiple 32-row
    # sub-chunks per grid step.
    out = propeller_noise_gen(speed_rps, phase_shift, hgc, poly_coeffs,
                              n_blades=N_BLADES, sample_rate=SAMPLE_RATE,
                              rows_per_block=64, sub_rows=32)
    out = jax.block_until_ready(out)

    ref = propeller_noise_gen_reference_np(speed_rps, phase_shift, hgc, poly_coeffs,
                                           n_blades=N_BLADES, sample_rate=SAMPLE_RATE)
    np.testing.assert_allclose(np.asarray(out), ref, rtol=5e-3, atol=5e-2)

    print("KERNEL_OK")
</pallas_src>

<mosaic_0001>
module attributes {stable_mosaic.version = 11 : i64} {
  func.func @_propeller_noise_kernel(%arg0: i32, %arg1: memref<1x64x128xf32, #tpu.memory_space<vmem>>, %arg2: memref<1x64x1xf32, #tpu.memory_space<vmem>>, %arg3: memref<128x128xbf16, #tpu.memory_space<vmem>>, %arg4: memref<50xf32, #tpu.memory_space<smem>>, %arg5: memref<2xf32, #tpu.memory_space<smem>>, %arg6: memref<1x64x128xf32, #tpu.memory_space<vmem>>) attributes {dimension_semantics = [#tpu.dimension_semantics<parallel>], iteration_bounds = array<i64: 4>, scalar_prefetch = 0 : i64, scratch_operands = 0 : i64, tpu.core_type = #tpu.core_type<tc>, window_params = [{transform_indices = @transform_0, window_bounds = array<i64: 1, 64, 128>}, {transform_indices = @transform_1, window_bounds = array<i64: 1, 64, 1>}, {pipeline_mode = #tpu.pipeline_mode<synchronous>, transform_indices = @transform_2, window_bounds = array<i64: 128, 128>}, {transform_indices = @transform_3, window_bounds = array<i64: 50>}, {transform_indices = @transform_4, window_bounds = array<i64: 2>}, {transform_indices = @transform_5, window_bounds = array<i64: 1, 64, 128>}]} {
    %c0 = arith.constant 0 : index
    %c0_0 = arith.constant 0 : index
    %0 = vector.load %arg3[%c0, %c0_0] : memref<128x128xbf16, #tpu.memory_space<vmem>>, vector<128x128xbf16>
    %c0_1 = arith.constant 0 : index
    %1 = memref.load %arg5[%c0_1] : memref<2xf32, #tpu.memory_space<smem>>
    %c1 = arith.constant 1 : index
    %2 = memref.load %arg5[%c1] : memref<2xf32, #tpu.memory_space<smem>>
    %c0_i32 = arith.constant 0 : i32
    %c2_i32 = arith.constant 2 : i32
    %3 = arith.addi %c0_i32, %c2_i32 : i32
    %c1_i32 = arith.constant 1 : i32
    scf.for %arg7 = %c0_i32 to %3 step %c1_i32  : i32 {
      %c32_i32 = arith.constant 32 : i32
      %4 = arith.muli %arg7, %c32_i32 : i32
      %5 = tpu.assume_multiple %4, 32 : i32
      %c0_3 = arith.constant 0 : index
      %6 = arith.index_cast %5 : i32 to index
      %c0_4 = arith.constant 0 : index
      %7 = vector.load %arg1[%c0_3, %6, %c0_4] : memref<1x64x128xf32, #tpu.memory_space<vmem>>, vector<1x32x128xf32>
      %8 = vector.shape_cast %7 : vector<1x32x128xf32> to vector<32x128xf32>
      %c0_5 = arith.constant 0 : index
      %9 = arith.index_cast %5 : i32 to index
      %c0_6 = arith.constant 0 : index
      %10 = vector.load %arg2[%c0_5, %9, %c0_6] : memref<1x64x1xf32, #tpu.memory_space<vmem>>, vector<1x32x1xf32>
      %11 = vector.shape_cast %10 : vector<1x32x1xf32> to vector<32x1xf32>
      %cst = arith.constant 2.000000e+00 : f32
      %12 = vector.broadcast %cst : f32 to vector<32x128xf32>
      %13 = arith.mulf %8, %12 : vector<32x128xf32>
      %14 = arith.truncf %13 : vector<32x128xf32> to vector<32x128xbf16>
      %15 = arith.extf %14 : vector<32x128xbf16> to vector<32x128xf32>
      %16 = arith.subf %13, %15 : vector<32x128xf32>
      %17 = arith.truncf %16 : vector<32x128xf32> to vector<32x128xbf16>
      %cst_7 = arith.constant dense<0.000000e+00> : vector<32x128xf32>
      %18 = tpu.matmul %14, %0, %cst_7 {dimension_numbers = #tpu.dot_dimension_numbers<[1], [0], [0], [1], [0, 0, 1, 1], [], []>} : vector<32x128xbf16>, vector<128x128xbf16>, vector<32x128xf32> -> vector<32x128xf32>
      %cst_8 = arith.constant dense<0.000000e+00> : vector<32x128xf32>
      %19 = tpu.matmul %17, %0, %cst_8 {dimension_numbers = #tpu.dot_dimension_numbers<[1], [0], [0], [1], [0, 0, 1, 1], [], []>} : vector<32x128xbf16>, vector<128x128xbf16>, vector<32x128xf32> -> vector<32x128xf32>
      %20 = arith.addf %18, %19 : vector<32x128xf32>
      %cst_9 = arith.constant 1.42475852E-4 : f32
      %21 = vector.broadcast %cst_9 : f32 to vector<32x128xf32>
      %22 = arith.mulf %21, %20 : vector<32x128xf32>
      %23 = vector.broadcast %11 : vector<32x1xf32> to vector<32x128xf32>
      %24 = arith.addf %22, %23 : vector<32x128xf32>
      %25 = math.sin %24 : vector<32x128xf32>
      %26 = math.cos %24 : vector<32x128xf32>
      %cst_10 = arith.constant 2.000000e+00 : f32
      %27 = vector.broadcast %cst_10 : f32 to vector<32x128xf32>
      %28 = arith.mulf %27, %26 : vector<32x128xf32>
      %cst_11 = arith.constant 5.000000e-01 : f32
      %29 = vector.broadcast %cst_11 : f32 to vector<32x128xf32>
      %30 = arith.mulf %29, %24 : vector<32x128xf32>
      %31 = math.sin %30 : vector<32x128xf32>
      %cst_12 = arith.constant 5.000000e+01 : f32
      %32 = vector.broadcast %cst_12 : f32 to vector<32x128xf32>
      %33 = arith.mulf %32, %30 : vector<32x128xf32>
      %34 = math.sin %33 : vector<32x128xf32>
      %cst_13 = arith.constant 5.100000e+01 : f32
      %35 = vector.broadcast %cst_13 : f32 to vector<32x128xf32>
      %36 = arith.mulf %35, %30 : vector<32x128xf32>
      %37 = math.sin %36 : vector<32x128xf32>
      %38 = arith.mulf %34, %37 : vector<32x128xf32>
      %39 = math.absf %31 : vector<32x128xf32>
      %cst_14 = arith.constant 9.99999974E-6 : f32
      %40 = vector.broadcast %cst_14 : f32 to vector<32x128xf32>
      %41 = arith.cmpf olt, %39, %40 : vector<32x128xf32>
      %cst_15 = arith.constant 1.000000e+00 : f32
      %42 = vector.broadcast %cst_15 : f32 to vector<32x128xf32>
      %43 = arith.select %41, %42, %31 : vector<32x128xi1>, vector<32x128xf32>
      %44 = tpu.reciprocal %43 {approx = true} : vector<32x128xf32> -> vector<32x128xf32>
      %45 = arith.mulf %38, %44 : vector<32x128xf32>
      %cst_16 = arith.constant 0.000000e+00 : f32
      %46 = vector.broadcast %cst_16 : f32 to vector<32x128xf32>
      %47 = arith.select %41, %46, %45 : vector<32x128xi1>, vector<32x128xf32>
      %cst_17 = arith.constant 0.002915452 : f32
      %48 = vector.broadcast %cst_17 : f32 to vector<32x128xf32>
      %49 = arith.mulf %8, %48 : vector<32x128xf32>
      %50 = vector.broadcast %2 : f32 to vector<32x128xf32>
      %51 = arith.mulf %50, %49 : vector<32x128xf32>
      %52 = vector.broadcast %1 : f32 to vector<32x128xf32>
      %53 = arith.addf %52, %51 : vector<32x128xf32>
      %54 = arith.mulf %49, %53 : vector<32x128xf32>
      %55 = math.exp %54 : vector<32x128xf32>
      %c49 = arith.constant 49 : index
      %56 = memref.load %arg4[%c49] : memref<50xf32, #tpu.memory_space<smem>>
      %cst_18 = arith.constant 0.000000e+00 : f32
      %57 = vector.broadcast %cst_18 : f32 to vector<32x128xf32>
      %58 = vector.broadcast %56 : f32 to vector<32x128xf32>
      %59 = arith.addf %58, %57 : vector<32x128xf32>
      %60 = arith.mulf %28, %59 : vector<32x128xf32>
      %c48 = arith.constant 48 : index
      %61 = memref.load %arg4[%c48] : memref<50xf32, #tpu.memory_space<smem>>
      %62 = vector.broadcast %61 : f32 to vector<32x128xf32>
      %63 = arith.addf %60, %62 : vector<32x128xf32>
      %64 = arith.mulf %28, %63 : vector<32x128xf32>
      %65 = arith.subf %64, %59 : vector<32x128xf32>
      %c47 = arith.constant 47 : index
      %66 = memref.load %arg4[%c47] : memref<50xf32, #tpu.memory_space<smem>>
      %67 = vector.broadcast %66 : f32 to vector<32x128xf32>
      %68 = arith.addf %65, %67 : vector<32x128xf32>
      %69 = arith.mulf %28, %68 : vector<32x128xf32>
      %70 = arith.subf %69, %63 : vector<32x128xf32>
      %c46 = arith.constant 46 : index
      %71 = memref.load %arg4[%c46] : memref<50xf32, #tpu.memory_space<smem>>
      %72 = vector.broadcast %71 : f32 to vector<32x128xf32>
      %73 = arith.addf %70, %72 : vector<32x128xf32>
      %74 = arith.mulf %28, %73 : vector<32x128xf32>
      %75 = arith.subf %74, %68 : vector<32x128xf32>
      %c45 = arith.constant 45 : index
      %76 = memref.load %arg4[%c45] : memref<50xf32, #tpu.memory_space<smem>>
      %77 = vector.broadcast %76 : f32 to vector<32x128xf32>
      %78 = arith.addf %75, %77 : vector<32x128xf32>
      %79 = arith.mulf %28, %78 : vector<32x128xf32>
      %80 = arith.subf %79, %73 : vector<32x128xf32>
      %c44 = arith.constant 44 : index
      %81 = memref.load %arg4[%c44] : memref<50xf32, #tpu.memory_space<smem>>
      %82 = vector.broadcast %81 : f32 to vector<32x128xf32>
      %83 = arith.addf %80, %82 : vector<32x128xf32>
      %84 = arith.mulf %28, %83 : vector<32x128xf32>
      %85 = arith.subf %84, %78 : vector<32x128xf32>
      %c43 = arith.constant 43 : index
      %86 = memref.load %arg4[%c43] : memref<50xf32, #tpu.memory_space<smem>>
      %87 = vector.broadcast %86 : f32 to vector<32x128xf32>
      %88 = arith.addf %85, %87 : vector<32x128xf32>
      %89 = arith.mulf %28, %88 : vector<32x128xf32>
      %90 = arith.subf %89, %83 : vector<32x128xf32>
      %c42 = arith.constant 42 : index
      %91 = memref.load %arg4[%c42] : memref<50xf32, #tpu.memory_space<smem>>
      %92 = vector.broadcast %91 : f32 to vector<32x128xf32>
      %93 = arith.addf %90, %92 : vector<32x128xf32>
      %94 = arith.mulf %28, %93 : vector<32x128xf32>
      %95 = arith.subf %94, %88 : vector<32x128xf32>
      %c41 = arith.constant 41 : index
      %96 = memref.load %arg4[%c41] : memref<50xf32, #tpu.memory_space<smem>>
      %97 = vector.broadcast %96 : f32 to vector<32x128xf32>
      %98 = arith.addf %95, %97 : vector<32x128xf32>
      %99 = arith.mulf %28, %98 : vector<32x128xf32>
      %100 = arith.subf %99, %93 : vector<32x128xf32>
      %c40 = arith.constant 40 : index
      %101 = memref.load %arg4[%c40] : memref<50xf32, #tpu.memory_space<smem>>
      %102 = vector.broadcast %101 : f32 to vector<32x128xf32>
      %103 = arith.addf %100, %102 : vector<32x128xf32>
      %104 = arith.mulf %28, %103 : vector<32x128xf32>
      %105 = arith.subf %104, %98 : vector<32x128xf32>
      %c39 = arith.constant 39 : index
      %106 = memref.load %arg4[%c39] : memref<50xf32, #tpu.memory_space<smem>>
      %107 = vector.broadcast %106 : f32 to vector<32x128xf32>
      %108 = arith.addf %105, %107 : vector<32x128xf32>
      %109 = arith.mulf %28, %108 : vector<32x128xf32>
      %110 = arith.subf %109, %103 : vector<32x128xf32>
      %c38 = arith.constant 38 : index
      %111 = memref.load %arg4[%c38] : memref<50xf32, #tpu.memory_space<smem>>
      %112 = vector.broadcast %111 : f32 to vector<32x128xf32>
      %113 = arith.addf %110, %112 : vector<32x128xf32>
      %114 = arith.mulf %28, %113 : vector<32x128xf32>
      %115 = arith.subf %114, %108 : vector<32x128xf32>
      %c37 = arith.constant 37 : index
      %116 = memref.load %arg4[%c37] : memref<50xf32, #tpu.memory_space<smem>>
      %117 = vector.broadcast %116 : f32 to vector<32x128xf32>
      %118 = arith.addf %115, %117 : vector<32x128xf32>
      %119 = arith.mulf %28, %118 : vector<32x128xf32>
      %120 = arith.subf %119, %113 : vector<32x128xf32>
      %c36 = arith.constant 36 : index
      %121 = memref.load %arg4[%c36] : memref<50xf32, #tpu.memory_space<smem>>
      %122 = vector.broadcast %121 : f32 to vector<32x128xf32>
      %123 = arith.addf %120, %122 : vector<32x128xf32>
      %124 = arith.mulf %28, %123 : vector<32x128xf32>
      %125 = arith.subf %124, %118 : vector<32x128xf32>
      %c35 = arith.constant 35 : index
      %126 = memref.load %arg4[%c35] : memref<50xf32, #tpu.memory_space<smem>>
      %127 = vector.broadcast %126 : f32 to vector<32x128xf32>
      %128 = arith.addf %125, %127 : vector<32x128xf32>
      %129 = arith.mulf %28, %128 : vector<32x128xf32>
      %130 = arith.subf %129, %123 : vector<32x128xf32>
      %c34 = arith.constant 34 : index
      %131 = memref.load %arg4[%c34] : memref<50xf32, #tpu.memory_space<smem>>
      %132 = vector.broadcast %131 : f32 to vector<32x128xf32>
      %133 = arith.addf %130, %132 : vector<32x128xf32>
      %134 = arith.mulf %28, %133 : vector<32x128xf32>
      %135 = arith.subf %134, %128 : vector<32x128xf32>
      %c33 = arith.constant 33 : index
      %136 = memref.load %arg4[%c33] : memref<50xf32, #tpu.memory_space<smem>>
      %137 = vector.broadcast %136 : f32 to vector<32x128xf32>
      %138 = arith.addf %135, %137 : vector<32x128xf32>
      %139 = arith.mulf %28, %138 : vector<32x128xf32>
      %140 = arith.subf %139, %133 : vector<32x128xf32>
      %c32 = arith.constant 32 : index
      %141 = memref.load %arg4[%c32] : memref<50xf32, #tpu.memory_space<smem>>
      %142 = vector.broadcast %141 : f32 to vector<32x128xf32>
      %143 = arith.addf %140, %142 : vector<32x128xf32>
      %144 = arith.mulf %28, %143 : vector<32x128xf32>
      %145 = arith.subf %144, %138 : vector<32x128xf32>
      %c31 = arith.constant 31 : index
      %146 = memref.load %arg4[%c31] : memref<50xf32, #tpu.memory_space<smem>>
      %147 = vector.broadcast %146 : f32 to vector<32x128xf32>
      %148 = arith.addf %145, %147 : vector<32x128xf32>
      %149 = arith.mulf %28, %148 : vector<32x128xf32>
      %150 = arith.subf %149, %143 : vector<32x128xf32>
      %c30 = arith.constant 30 : index
      %151 = memref.load %arg4[%c30] : memref<50xf32, #tpu.memory_space<smem>>
      %152 = vector.broadcast %151 : f32 to vector<32x128xf32>
      %153 = arith.addf %150, %152 : vector<32x128xf32>
      %154 = arith.mulf %28, %153 : vector<32x128xf32>
      %155 = arith.subf %154, %148 : vector<32x128xf32>
      %c29 = arith.constant 29 : index
      %156 = memref.load %arg4[%c29] : memref<50xf32, #tpu.memory_space<smem>>
      %157 = vector.broadcast %156 : f32 to vector<32x128xf32>
      %158 = arith.addf %155, %157 : vector<32x128xf32>
      %159 = arith.mulf %28, %158 : vector<32x128xf32>
      %160 = arith.subf %159, %153 : vector<32x128xf32>
      %c28 = arith.constant 28 : index
      %161 = memref.load %arg4[%c28] : memref<50xf32, #tpu.memory_space<smem>>
      %162 = vector.broadcast %161 : f32 to vector<32x128xf32>
      %163 = arith.addf %160, %162 : vector<32x128xf32>
      %164 = arith.mulf %28, %163 : vector<32x128xf32>
      %165 = arith.subf %164, %158 : vector<32x128xf32>
      %c27 = arith.constant 27 : index
      %166 = memref.load %arg4[%c27] : memref<50xf32, #tpu.memory_space<smem>>
      %167 = vector.broadcast %166 : f32 to vector<32x128xf32>
      %168 = arith.addf %165, %167 : vector<32x128xf32>
      %169 = arith.mulf %28, %168 : vector<32x128xf32>
      %170 = arith.subf %169, %163 : vector<32x128xf32>
      %c26 = arith.constant 26 : index
      %171 = memref.load %arg4[%c26] : memref<50xf32, #tpu.memory_space<smem>>
      %172 = vector.broadcast %171 : f32 to vector<32x128xf32>
      %173 = arith.addf %170, %172 : vector<32x128xf32>
      %174 = arith.mulf %28, %173 : vector<32x128xf32>
      %175 = arith.subf %174, %168 : vector<32x128xf32>
      %c25 = arith.constant 25 : index
      %176 = memref.load %arg4[%c25] : memref<50xf32, #tpu.memory_space<smem>>
      %177 = vector.broadcast %176 : f32 to vector<32x128xf32>
      %178 = arith.addf %175, %177 : vector<32x128xf32>
      %179 = arith.mulf %28, %178 : vector<32x128xf32>
      %180 = arith.subf %179, %173 : vector<32x128xf32>
      %c24 = arith.constant 24 : index
      %181 = memref.load %arg4[%c24] : memref<50xf32, #tpu.memory_space<smem>>
      %182 = vector.broadcast %181 : f32 to vector<32x128xf32>
      %183 = arith.addf %180, %182 : vector<32x128xf32>
      %184 = arith.mulf %28, %183 : vector<32x128xf32>
      %185 = arith.subf %184, %178 : vector<32x128xf32>
      %c23 = arith.constant 23 : index
      %186 = memref.load %arg4[%c23] : memref<50xf32, #tpu.memory_space<smem>>
      %187 = vector.broadcast %186 : f32 to vector<32x128xf32>
      %188 = arith.addf %185, %187 : vector<32x128xf32>
      %189 = arith.mulf %28, %188 : vector<32x128xf32>
      %190 = arith.subf %189, %183 : vector<32x128xf32>
      %c22 = arith.constant 22 : index
      %191 = memref.load %arg4[%c22] : memref<50xf32, #tpu.memory_space<smem>>
      %192 = vector.broadcast %191 : f32 to vector<32x128xf32>
      %193 = arith.addf %190, %192 : vector<32x128xf32>
      %194 = arith.mulf %28, %193 : vector<32x128xf32>
      %195 = arith.subf %194, %188 : vector<32x128xf32>
      %c21 = arith.constant 21 : index
      %196 = memref.load %arg4[%c21] : memref<50xf32, #tpu.memory_space<smem>>
      %197 = vector.broadcast %196 : f32 to vector<32x128xf32>
      %198 = arith.addf %195, %197 : vector<32x128xf32>
      %199 = arith.mulf %28, %198 : vector<32x128xf32>
      %200 = arith.subf %199, %193 : vector<32x128xf32>
      %c20 = arith.constant 20 : index
      %201 = memref.load %arg4[%c20] : memref<50xf32, #tpu.memory_space<smem>>
      %202 = vector.broadcast %201 : f32 to vector<32x128xf32>
      %203 = arith.addf %200, %202 : vector<32x128xf32>
      %204 = arith.mulf %28, %203 : vector<32x128xf32>
      %205 = arith.subf %204, %198 : vector<32x128xf32>
      %c19 = arith.constant 19 : index
      %206 = memref.load %arg4[%c19] : memref<50xf32, #tpu.memory_space<smem>>
      %207 = vector.broadcast %206 : f32 to vector<32x128xf32>
      %208 = arith.addf %205, %207 : vector<32x128xf32>
      %209 = arith.mulf %28, %208 : vector<32x128xf32>
      %210 = arith.subf %209, %203 : vector<32x128xf32>
      %c18 = arith.constant 18 : index
      %211 = memref.load %arg4[%c18] : memref<50xf32, #tpu.memory_space<smem>>
      %212 = vector.broadcast %211 : f32 to vector<32x128xf32>
      %213 = arith.addf %210, %212 : vector<32x128xf32>
      %214 = arith.mulf %28, %213 : vector<32x128xf32>
      %215 = arith.subf %214, %208 : vector<32x128xf32>
      %c17 = arith.constant 17 : index
      %216 = memref.load %arg4[%c17] : memref<50xf32, #tpu.memory_space<smem>>
      %217 = vector.broadcast %216 : f32 to vector<32x128xf32>
      %218 = arith.addf %215, %217 : vector<32x128xf32>
      %219 = arith.mulf %28, %218 : vector<32x128xf32>
      %220 = arith.subf %219, %213 : vector<32x128xf32>
      %c16 = arith.constant 16 : index
      %221 = memref.load %arg4[%c16] : memref<50xf32, #tpu.memory_space<smem>>
      %222 = vector.broadcast %221 : f32 to vector<32x128xf32>
      %223 = arith.addf %220, %222 : vector<32x128xf32>
      %224 = arith.mulf %28, %223 : vector<32x128xf32>
      %225 = arith.subf %224, %218 : vector<32x128xf32>
      %c15 = arith.constant 15 : index
      %226 = memref.load %arg4[%c15] : memref<50xf32, #tpu.memory_space<smem>>
      %227 = vector.broadcast %226 : f32 to vector<32x128xf32>
      %228 = arith.addf %225, %227 : vector<32x128xf32>
      %229 = arith.mulf %28, %228 : vector<32x128xf32>
      %230 = arith.subf %229, %223 : vector<32x128xf32>
      %c14 = arith.constant 14 : index
      %231 = memref.load %arg4[%c14] : memref<50xf32, #tpu.memory_space<smem>>
      %232 = vector.broadcast %231 : f32 to vector<32x128xf32>
      %233 = arith.addf %230, %232 : vector<32x128xf32>
      %234 = arith.mulf %28, %233 : vector<32x128xf32>
      %235 = arith.subf %234, %228 : vector<32x128xf32>
      %c13 = arith.constant 13 : index
      %236 = memref.load %arg4[%c13] : memref<50xf32, #tpu.memory_space<smem>>
      %237 = vector.broadcast %236 : f32 to vector<32x128xf32>
      %238 = arith.addf %235, %237 : vector<32x128xf32>
      %239 = arith.mulf %28, %238 : vector<32x128xf32>
      %240 = arith.subf %239, %233 : vector<32x128xf32>
      %c12 = arith.constant 12 : index
      %241 = memref.load %arg4[%c12] : memref<50xf32, #tpu.memory_space<smem>>
      %242 = vector.broadcast %241 : f32 to vector<32x128xf32>
      %243 = arith.addf %240, %242 : vector<32x128xf32>
      %244 = arith.mulf %28, %243 : vector<32x128xf32>
      %245 = arith.subf %244, %238 : vector<32x128xf32>
      %c11 = arith.constant 11 : index
      %246 = memref.load %arg4[%c11] : memref<50xf32, #tpu.memory_space<smem>>
      %247 = vector.broadcast %246 : f32 to vector<32x128xf32>
      %248 = arith.addf %245, %247 : vector<32x128xf32>
      %249 = arith.mulf %28, %248 : vector<32x128xf32>
      %250 = arith.subf %249, %243 : vector<32x128xf32>
      %c10 = arith.constant 10 : index
      %251 = memref.load %arg4[%c10] : memref<50xf32, #tpu.memory_space<smem>>
      %252 = vector.broadcast %251 : f32 to vector<32x128xf32>
      %253 = arith.addf %250, %252 : vector<32x128xf32>
      %254 = arith.mulf %28, %253 : vector<32x128xf32>
      %255 = arith.subf %254, %248 : vector<32x128xf32>
      %c9 = arith.constant 9 : index
      %256 = memref.load %arg4[%c9] : memref<50xf32, #tpu.memory_space<smem>>
      %257 = vector.broadcast %256 : f32 to vector<32x128xf32>
      %258 = arith.addf %255, %257 : vector<32x128xf32>
      %259 = arith.mulf %28, %258 : vector<32x128xf32>
      %260 = arith.subf %259, %253 : vector<32x128xf32>
      %c8 = arith.constant 8 : index
      %261 = memref.load %arg4[%c8] : memref<50xf32, #tpu.memory_space<smem>>
      %262 = vector.broadcast %261 : f32 to vector<32x128xf32>
      %263 = arith.addf %260, %262 : vector<32x128xf32>
      %264 = arith.mulf %28, %263 : vector<32x128xf32>
      %265 = arith.subf %264, %258 : vector<32x128xf32>
      %c7 = arith.constant 7 : index
      %266 = memref.load %arg4[%c7] : memref<50xf32, #tpu.memory_space<smem>>
      %267 = vector.broadcast %266 : f32 to vector<32x128xf32>
      %268 = arith.addf %265, %267 : vector<32x128xf32>
      %269 = arith.mulf %28, %268 : vector<32x128xf32>
      %270 = arith.subf %269, %263 : vector<32x128xf32>
      %c6 = arith.constant 6 : index
      %271 = memref.load %arg4[%c6] : memref<50xf32, #tpu.memory_space<smem>>
      %272 = vector.broadcast %271 : f32 to vector<32x128xf32>
      %273 = arith.addf %270, %272 : vector<32x128xf32>
      %274 = arith.mulf %28, %273 : vector<32x128xf32>
      %275 = arith.subf %274, %268 : vector<32x128xf32>
      %c5 = arith.constant 5 : index
      %276 = memref.load %arg4[%c5] : memref<50xf32, #tpu.memory_space<smem>>
      %277 = vector.broadcast %276 : f32 to vector<32x128xf32>
      %278 = arith.addf %275, %277 : vector<32x128xf32>
      %279 = arith.mulf %28, %278 : vector<32x128xf32>
      %280 = arith.subf %279, %273 : vector<32x128xf32>
      %c4 = arith.constant 4 : index
      %281 = memref.load %arg4[%c4] : memref<50xf32, #tpu.memory_space<smem>>
      %282 = vector.broadcast %281 : f32 to vector<32x128xf32>
      %283 = arith.addf %280, %282 : vector<32x128xf32>
      %284 = arith.mulf %28, %283 : vector<32x128xf32>
      %285 = arith.subf %284, %278 : vector<32x128xf32>
      %c3 = arith.constant 3 : index
      %286 = memref.load %arg4[%c3] : memref<50xf32, #tpu.memory_space<smem>>
      %287 = vector.broadcast %286 : f32 to vector<32x128xf32>
      %288 = arith.addf %285, %287 : vector<32x128xf32>
      %289 = arith.mulf %28, %288 : vector<32x128xf32>
      %290 = arith.subf %289, %283 : vector<32x128xf32>
      %c2 = arith.constant 2 : index
      %291 = memref.load %arg4[%c2] : memref<50xf32, #tpu.memory_space<smem>>
      %292 = vector.broadcast %291 : f32 to vector<32x128xf32>
      %293 = arith.addf %290, %292 : vector<32x128xf32>
      %294 = arith.mulf %28, %293 : vector<32x128xf32>
      %295 = arith.subf %294, %288 : vector<32x128xf32>
      %c1_19 = arith.constant 1 : index
      %296 = memref.load %arg4[%c1_19] : memref<50xf32, #tpu.memory_space<smem>>
      %297 = vector.broadcast %296 : f32 to vector<32x128xf32>
      %298 = arith.addf %295, %297 : vector<32x128xf32>
      %299 = arith.mulf %28, %298 : vector<32x128xf32>
      %300 = arith.subf %299, %293 : vector<32x128xf32>
      %c0_20 = arith.constant 0 : index
      %301 = memref.load %arg4[%c0_20] : memref<50xf32, #tpu.memory_space<smem>>
      %302 = vector.broadcast %301 : f32 to vector<32x128xf32>
      %303 = arith.addf %300, %302 : vector<32x128xf32>
      %304 = arith.mulf %303, %25 : vector<32x128xf32>
      %305 = arith.mulf %55, %304 : vector<32x128xf32>
      %cst_21 = arith.constant 9.99999993E-9 : f32
      %306 = vector.broadcast %cst_21 : f32 to vector<32x128xf32>
      %307 = arith.mulf %306, %47 : vector<32x128xf32>
      %308 = arith.addf %305, %307 : vector<32x128xf32>
      %c0_22 = arith.constant 0 : index
      %309 = arith.index_cast %5 : i32 to index
      %c0_23 = arith.constant 0 : index
      %310 = vector.load %arg6[%c0_22, %309, %c0_23] : memref<1x64x128xf32, #tpu.memory_space<vmem>>, vector<1x32x128xf32>
      %311 = vector.shape_cast %310 : vector<1x32x128xf32> to vector<32x128xf32>
      %312 = vector.shape_cast %308 : vector<32x128xf32> to vector<1x32x128xf32>
      tpu.vector_store %arg6[%c0_22, %309, %c0_23], %312 {strides = array<i32>} : memref<1x64x128xf32, #tpu.memory_space<vmem>>, vector<1x32x128xf32>,
    }
    %c2_i32_2 = arith.constant 2 : i32
    return
  }
  func.func @transform_0(%arg0: i32) -> (i32, i32, i32) {
    %c0_i32 = arith.constant 0 : i32
    %c0_i32_0 = arith.constant 0 : i32
    %c0_i32_1 = arith.constant 0 : i32
    return %arg0, %c0_i32, %c0_i32_0 : i32, i32, i32
  }
  func.func @transform_1(%arg0: i32) -> (i32, i32, i32) {
    %c0_i32 = arith.constant 0 : i32
    %c0_i32_0 = arith.constant 0 : i32
    %c0_i32_1 = arith.constant 0 : i32
    return %arg0, %c0_i32, %c0_i32_0 : i32, i32, i32
  }
  func.func @transform_2(%arg0: i32) -> (i32, i32) {
    %c0_i32 = arith.constant 0 : i32
    %c0_i32_0 = arith.constant 0 : i32
    %c0_i32_1 = arith.constant 0 : i32
    return %c0_i32, %c0_i32_0 : i32, i32
  }
  func.func @transform_3(%arg0: i32) -> i32 {
    %c0_i32 = arith.constant 0 : i32
    %c0_i32_0 = arith.constant 0 : i32
    return %c0_i32 : i32
  }
  func.func @transform_4(%arg0: i32) -> i32 {
    %c0_i32 = arith.constant 0 : i32
    %c0_i32_0 = arith.constant 0 : i32
    return %c0_i32 : i32
  }
  func.func @transform_5(%arg0: i32) -> (i32, i32, i32) {
    %c0_i32 = arith.constant 0 : i32
    %c0_i32_0 = arith.constant 0 : i32
    %c0_i32_1 = arith.constant 0 : i32
    return %arg0, %c0_i32, %c0_i32_0 : i32, i32, i32
  }
}

</mosaic_0001>

<bundles_post_ra>
// kernel: tpu_custom_call.1
= control target key start
LH: loop header
LB: loop body
LE: loop exit
PB: predicated region body
PF: predicated region fallthrough
CT: control target
= control target key end

     0   :  { %10 = vsyncpa [#allocation3], 0  ;;  %s6876_s0 = inlined_call_operand.vmem [shape: f32[4,64,128], index: 0, kind: input, shape index: {}]   ;;  %s6877_s1 = inlined_call_operand.vmem [shape: f32[4,64,1], index: 1, kind: input, shape index: {}]   ;;  %s6878_s2 = inlined_call_operand.hbm [shape: bf16[128,128], index: 2, kind: input, shape index: {}]   ;;  %s6879_s3 = inlined_call_operand.vmem [shape: f32[50], index: 3, kind: input, shape index: {}]   ;;  %s6880_s4 = inlined_call_operand.vmem [shape: f32[2], index: 4, kind: input, shape index: {}]   ;;  %s6881_s5 = inlined_call_operand.hbm [shape: f32[4,64,128], index: 5, kind: output, shape index: {}]  }
   0x1   :  { %11 = vsyncpa [#allocation5], 0 }
   0x2   :  { %12 = vsyncpa [#allocation8], 0 }
   0x3   :  { %13 = vsyncpa [#allocation4], 0 }
   0x4   :  { %15 = vsyncpa [#allocation4 + $0x1], 0  ;;  %s4145_s18 = smov 0   ;;  %s4147_s19 = smov 0  }
   0x5   :  { %s4149_s20 = smov 0   ;;  %s4151_s21 = smov 0  }
   0x6 LB: > { %s4166_s22 = sadd.s32 4294967295, %s4094_s21   ;;  %s3496_s23 = sadd.s32 4294967294, %s4094_s21   ;;  %s4094_s21 = sphi %s4151_s21, %s7326_s21   ;;  %s4090_s20 = sphi %s4149_s20, %s7325_s20   ;;  %s4086_s19 = sphi %s4147_s19, %s7324_s19   ;;  %s4082_s18 = sphi %s4145_s18, %s7323_s18  }
   0x7   : > { %s4170_s24 = sadd.s32 1, %s4094_s21   ;;  %s143_s25 = sadd.s32 1, %s4090_s20 }
   0x8   : > { %s140_s26 = ssub.s32 %s4094_s21, %s4170_s24  ;;  %p153_p0 = scmp.ne.s32.totalorder %s4090_s20, %s4086_s19 }
   0x9   : > { %p141_p1 = scmp.eq.s32.totalorder %s140_s26, 0  ;;  %p154_p2 = scmp.eq.s32.totalorder %s4166_s22, 3 }
   0xa   : > { %p159_p3 = scmp.ne.s32.totalorder %s4086_s19, %s4082_s18  ;;  %p160_p4 = scmp.eq.s32.totalorder %s3496_s23, 3 }
   0xb   : > { %s4181_s27 = scalar_select %p141_p1, %s4090_s20, %s143_s25  }
   0xc   : > { %p4183_p5 = por %p154_p2, %p153_p0  ;;  %p4187_p6 = por %p160_p4, %p159_p3 }
   0xd   : > { %p3497_p7 = scmp.ge.s32.totalorder %s4094_s21, 1  ;;  %p167_p8 = scmp.lt.s32.totalorder %s4094_s21, 5 }
   0xe   : > { %s7030_s28 = scalar_select %p4183_p5, 1, 0 }
   0xf   : > { %s7031_s29 = scalar_select %p4187_p6, 1, 0 }
  0x10   : > { %p6882_p9 = scmp.eq.s32.totalorder %s4166_s22, 0  ;;  %p4194_p10 = pnand %p3497_p7, %p167_p8 }
  0x11   : > { %s4100_s6 = smov [#allocation2]   ;;  %s193_s10 = sshll.u32 %s6879_s3, 4  ;;  %s4209_s10 = int_to_ptr.vmem [resolvable:$true] %s193_s10 }
  0x12   : > { %s7032_s30 = scalar_select %p4194_p10, 1, 0 }
  0x13   : > { %s179_s7 = sshll.u32 %s4100_s6, 4  ;;  %p3800_p11 = pneg %p4194_p10  ;;  %s180_s7 = int_to_ptr.vmem [resolvable:$true] %s179_s7 }
  0x14   : > { %s204_s14 = sshll.u32 %s6880_s4, 4  ;;  %s3958_s17 = scalar_lea.hbm %s6878_s2, 1024  ;;  %s4214_s14 = int_to_ptr.vmem [resolvable:$true] %s204_s14 }
  0x15   : > { %p4205_p12 = pnand %p6882_p9, %p3800_p11  ;;  %p3959_p13 = scmp.ne.s32.totalorder %s6878_s2, %s3958_s17 }
  0x16   : > { %p3965_p3 = scmp.lt.u32.totalorder %s3958_s17, %s6878_s2 }
  0x17   : > { %p3960_p0 = pneg %p4205_p12 }
  0x19   : > { %p3961_p1 = pnand %p3960_p0, %p3959_p13 }
  0x1b   : > { %p3962_p2 = pneg %p3961_p1 }
  0x1d   : > { %p3967_p4 = pnand %p3965_p3, %p3962_p2 }
  0x1f   : > { %3970 = shalt.err (!%p3967_p4)
}
  0x20   : > { %s3971_s8 = scalar_lea.vmem %s180_s7, 1024  ;;  %p3979_p9 = scmp.lt.s32.totalorder %s180_s7, %s180_s7 }
  0x21   : > { %p3972_p7 = scmp.ne.s32.totalorder %s180_s7, %s3971_s8  ;;  %p3980_p6 = scmp.lt.s32.totalorder %s3971_s8, %s3971_s8 }
  0x23   : > { %p3974_p8 = pnand %p3972_p7, %p3960_p0  ;;  %p3981_p5 = por %p3980_p6, %p3979_p9 }
  0x25   : > { %p3975_p11 = pneg %p3974_p8 }
  0x27   : > { %p3982_p10 = pnand %p3981_p5, %p3975_p11 }
  0x29   : > { %3985 = shalt.err (!%p3982_p10)
}
  0x2a   : > { %s4101_s9 = smov 64   ;;  %s4102_s12 = smov 4  }
  0x2b   : > { %3803 = dma.hbm_to_vmem [thread:$0]  (!%p4205_p12), %s6878_s2, 1024, %s180_s7, [#allocation3], %s4101_s9, %s4101_s9, %s4102_s12  }
  0x2c   : > { %s3986_s16 = scalar_lea.vmem %s4209_s10, 16  ;;  %p3994_p5 = scmp.lt.s32.totalorder %s4209_s10, %s4209_s10 }
  0x2d   : > { %p3987_p13 = scmp.ne.s32.totalorder %s4209_s10, %s3986_s16  ;;  %p3995_p9 = scmp.lt.s32.totalorder %s3986_s16, %s3986_s16 }
  0x2f   : > { %p3989_p1 = pnand %p3987_p13, %p3960_p0  ;;  %p3996_p10 = por %p3995_p9, %p3994_p5 }
  0x31   : > { %p3990_p6 = pneg %p3989_p1 }
  0x33   : > { %p3997_p2 = pnand %p3996_p10, %p3990_p6 }
  0x35   : > { %4000 = shalt.err (!%p3997_p2)
}
  0x36   : > { %s4103_s17 = smov [#allocation6]   ;;  %s4001_s7 = scalar_lea.vmem %s4214_s14, 16 }
  0x37   : > { %3806 = dma.vmem_to_smem (!%p4205_p12), %s4209_s10, 16, %s4103_s17, [#allocation5]  }
  0x38   : > { %p4002_p3 = scmp.ne.s32.totalorder %s4214_s14, %s4001_s7  ;;  %p4009_p8 = scmp.lt.s32.totalorder %s4214_s14, %s4214_s14 }
  0x39   : > { %p4010_p11 = scmp.lt.s32.totalorder %s4001_s7, %s4001_s7 }
  0x3a   : > { %p4004_p4 = pnand %p4002_p3, %p3960_p0 }
  0x3b   : > { %p4011_p13 = por %p4010_p11, %p4009_p8 }
  0x3c   : > { %p4005_p7 = pneg %p4004_p4 }
  0x3e   : > { %p4012_p1 = pnand %p4011_p13, %p4005_p7 }
  0x40   : > { %4015 = shalt.err (!%p4012_p1)
}
  0x41   : > { %s4104_s23 = smov [#allocation7]   ;;  %p7034_p6 = scmp.ne.s32.totalorder %s7032_s30, 0 }
  0x42   : > { %3809 = dma.vmem_to_smem (!%p4205_p12), %s4214_s14, 16, %s4104_s23, [#allocation8]  }
  0x43   : > { %233 = sbr.rel (%p7034_p6) target bundleno = 1151 (0x47f), region = 40 }
  0x4a   : > { %p7035_p5 = scmp.eq.s32.totalorder %s4166_s22, 0 }
  0x4c   : > { %4065 = dma.done.wait (%p7035_p5), [#allocation3], 1024   ;;  %p7036_p0 = pmov %p7035_p5 }
  0x4e   : > { %4067 = vsyncadd (%p7036_p0), [#allocation3], 4294966272  ;;  %p7037_p9 = pmov %p7036_p0 }
  0x4f   : > { %p7038_p10 = pmov %p7036_p0 }
  0x50   : > { %4069 = dma.done.wait (%p7037_p9), [#allocation5], 16  }
  0x51   : > { %4071 = vsyncadd (%p7038_p10), [#allocation5], 4294967280  ;;  %p7039_p2 = pmov %p7036_p0 }
  0x52   : > { %p7040_p12 = pmov %p7036_p0 }
  0x53   : > { %4073 = dma.done.wait (%p7039_p2), [#allocation8], 16  }
  0x54   : > { %4075 = vsyncadd (%p7040_p12), [#allocation8], 4294967280 }
  0x55   : > { %247 = sfence }
  0x56   : > { %s272_s30 = sand.u32 1, %s4086_s19   ;;  %p275_p3 = scmp.lt.s32.totalorder %s4166_s22, 3  ;;  %v4274_v0 = vld [vmem:[#allocation2] sm:$0xf]  ;;  %v4276_v1 = vld [vmem:[#allocation2 + $0x4] sm:$0xf] }
  0x57   : > { %7041 = vst [vmem:[#allocation14_spill] sm:$0xff] %v4274_v0  ;;  %7042 = vst [vmem:[#allocation15_spill] sm:$0xff] %v4276_v1  ;;  %s4280_s10 = sshll.u32 %s272_s30, 6  ;;  %v4282_v2 = vld [vmem:[#allocation2 + $0x8] sm:$0xf]  ;;  %s4321_s13 = sld [smem:[#allocation7]] }
  0x58   : > { %7043 = vst [vmem:[#allocation16_spill] sm:$0xff] %v4282_v2  ;;  %v4284_v3 = vld [vmem:[#allocation2 + $0xc] sm:$0xf]  ;;  %v4286_v4 = vld [vmem:[#allocation2 + $0x10] sm:$0xf]  ;;  %s276_s11 = scalar_select %p275_p3, %s4166_s22, 3 }
  0x59   : > { %7044 = vst [vmem:[#allocation17_spill] sm:$0xff] %v4284_v3  ;;  %7045 = vst [vmem:[#allocation18_spill] sm:$0xff] %v4286_v4  ;;  %v4288_v5 = vld [vmem:[#allocation2 + $0x14] sm:$0xf]  ;;  %v4291_v6 = vld [vmem:[#allocation2 + $0x18] sm:$0xf] }
  0x5a   : > { %7046 = vst [vmem:[#allocation19_spill] sm:$0xff] %v4288_v5  ;;  %7047 = vst [vmem:[#allocation20_spill] sm:$0xff] %v4291_v6  ;;  %v4293_v7 = vld [vmem:[#allocation2 + $0x1c] sm:$0xf]  ;;  %v4295_v8 = vld [vmem:[#allocation2 + $0x20] sm:$0xf] }
  0x5b   : > { %7048 = vst [vmem:[#allocation21_spill] sm:$0xff] %v4293_v7  ;;  %7049 = vst [vmem:[#allocation22_spill] sm:$0xff] %v4295_v8  ;;  %v4297_v9 = vld [vmem:[#allocation2 + $0x24] sm:$0xf]  ;;  %v4299_v10 = vld [vmem:[#allocation2 + $0x28] sm:$0xf] }
  0x5c   : > { %7050 = vst [vmem:[#allocation23_spill] sm:$0xff] %v4297_v9  ;;  %7051 = vst [vmem:[#allocation24_spill] sm:$0xff] %v4299_v10  ;;  %s3655_s14 = sshll.u32 %s276_s11, 6  ;;  %v4301_v11 = vld [vmem:[#allocation2 + $0x2c] sm:$0xf]  ;;  %s4323_s15 = sld [smem:[#allocation7 + $0x1]] }
  0x5d   : > { %7052 = vst [vmem:[#allocation25_spill] sm:$0xff] %v4301_v11  ;;  %v4303_v12 = vld [vmem:[#allocation2 + $0x30] sm:$0xf]  ;;  %s4308_s6 = scalar_lea.vmem %s6876_s0, %s3655_s14  ;;  %s4313_s12 = scalar_lea.vmem %s6877_s1, %s3655_s14  ;;  %v4315_v13 = vld [vmem:[#allocation2 + $0x34] sm:$0xf] }
  0x5e   : > { %7053 = vst [vmem:[#allocation26_spill] sm:$0xff] %v4303_v12  ;;  %7054 = vst [vmem:[#allocation27_spill] sm:$0xff] %v4315_v13  ;;  %v4317_v14 = vld [vmem:[#allocation2 + $0x38] sm:$0xf]  ;;  %v4319_v15 = vld [vmem:[#allocation2 + $0x3c] sm:$0xf] }
  0x5f   : > { %7055 = vst [vmem:[#allocation28_spill] sm:$0xff] %v4317_v14  ;;  %7056 = vst [vmem:[#allocation29_spill] sm:$0xff] %v4319_v15  ;;  %s274_s16 = scalar_lea.vmem [#allocation9], %s4280_s10  ;;  %s4326_s17 = smov 0  }
  0x60 LB: >> { %v7057_v1 = vld [vmem:[#allocation15_spill] sm:$0xff]  ;;  %v7058_v0 = vld [vmem:[#allocation14_spill] sm:$0xff]  ;;  %v7059_v3 = vld [vmem:[#allocation17_spill] sm:$0xff]  ;;  %s4336_s7 = sshll.u32 %s4098_s17, 5  ;;  %v4105_v26 = vmov 0   ;;  %v4354_v27 = vstv %s4321_s13  ;;  %s3601_s14 = sld [smem:[#allocation6 + $0x31]]  ;;  %s4098_s17 = sphi %s4326_s17, %s309_s17  }
  0x61   : >> { %v3513_v16 = vcombine.low %v7058_v0, %v7057_v1  ;;  %v7060_v2 = vld [vmem:[#allocation16_spill] sm:$0xff]  ;;  %s4340_s23 = scalar_lea.vmem %s4308_s6, %s4336_s7  ;;  %v7061_v5 = vld [vmem:[#allocation19_spill] sm:$0xff]  ;;  %v7062_v4 = vld [vmem:[#allocation18_spill] sm:$0xff]  ;;  %s4351_s11 = scalar_lea.vmem %s4313_s12, %s4336_s7  ;;  %3876 = vset.pattern.permute.xlu1 %v4105_v26  ;;  %3875 = vset.pattern.permute.xlu0 %v4105_v26 }
  0x62   : >> { %v3514_v17 = vcombine.low %v7060_v2, %v7059_v3  ;;  %v3515_v18 = vcombine.low %v7062_v4, %v7061_v5  ;;  %v312_v19 = vld [vmem:[%s4340_s23] sm:$0xff]  ;;  %v313_v20 = vld [vmem:[%s4340_s23 + $0x8] sm:$0xff]  ;;  %v4347_v21 = vstv %s4323_s15  ;;  %v319_v28 = vld [vmem:[%s4351_s11 + $0x10] sm:$0xff]  ;;  %s3602_s25 = sld [smem:[#allocation6 + $0x30]]  ;;  %s3603_s26 = sld [smem:[#allocation6 + $0x2f]] }
  0x63   : >> { %3678 = vmatprep.subr.bf16.mxu1 %v3513_v16  ;;  %3698 = vmatprep.subr.bf16.mxu0 %v3513_v16  ;;  %v321_v22 = vmul.f32 2.0, %v312_v19  ;;  %v322_v23 = vmul.f32 2.0, %v313_v20  ;;  %v2631_v24 = vmul.f32 0.002915452, %v312_v19  ;;  %v2632_v25 = vmul.f32 0.002915452, %v313_v20 }
  0x64   : >> { %3679 = vmatpush3.bf16.msra.mxu1 %v3513_v16  ;;  %3699 = vmatpush3.bf16.msra.mxu0 %v3513_v16  ;;  %v315_v32 = vld [vmem:[%s4340_s23 + $0x18] sm:$0xff]  ;;  %v317_v33 = vld [vmem:[%s4351_s11] sm:$0xff]  ;;  %v7064_v6 = vld [vmem:[#allocation20_spill] sm:$0xff]  ;;  %s3604_s8 = sld [smem:[#allocation6 + $0x2e]]  ;;  %s3605_s9 = sld [smem:[#allocation6 + $0x2d]] }
  0x65   : >> { %3680 = vmatprep.subr.bf16.mxu1 %v3514_v17  ;;  %3700 = vmatprep.subr.bf16.mxu0 %v3514_v17  ;;  %v325_v29 = vpack.c.bf16 %v322_v23, %v321_v22  ;;  %v2636_v30 = vmul.f32 %v4347_v21, %v2631_v24  ;;  %v2637_v31 = vmul.f32 %v4347_v21, %v2632_v25  ;;  %v7063_v7 = vld [vmem:[#allocation21_spill] sm:$0xff]  ;;  %v2634_v35 = vmul.f32 0.002915452, %v315_v32  ;;  %v314_v45 = vld [vmem:[%s4340_s23 + $0x10] sm:$0xff]  ;;  %v318_v46 = vld [vmem:[%s4351_s11 + $0x8] sm:$0xff]  ;;  %s309_s17 = sadd.s32 1, %s4098_s17  }
  0x66   : >> { %v3516_v34 = vcombine.low %v7064_v6, %v7063_v7  ;;  %499 = vperm.xlu1 %3876, %v319_v28   ;;  %489 = vperm.xlu0 %3875, %v317_v33   ;;  %v320_v41 = vld [vmem:[%s4351_s11 + $0x18] sm:$0xff]  ;;  %v7066_v9 = vld [vmem:[#allocation23_spill] sm:$0xff]  ;;  %v7067_v8 = vld [vmem:[#allocation22_spill] sm:$0xff]  ;;  %v323_v51 = vmul.f32 2.0, %v314_v45  ;;  %v324_v52 = vmul.f32 2.0, %v315_v32  ;;  %s3606_s11 = sld [smem:[#allocation6 + $0x2c]] }
  0x67   : >> { %v327_v36 = vunpack.c.l.bf16 %v325_v29  ;;  %v328_v37 = vunpack.c.h.bf16 %v325_v29  ;;  %v2641_v38 = vadd.f32 %v4354_v27, %v2636_v30  ;;  %v2642_v39 = vadd.f32 %v4354_v27, %v2637_v31  ;;  %3714 = vmatprep.mubr.bf16.mxu0 %v325_v29  ;;  %v7070_v11 = vld [vmem:[#allocation25_spill] sm:$0xff]  ;;  %v7071_v10 = vld [vmem:[#allocation24_spill] sm:$0xff]  ;;  %v7072_v13 = vld [vmem:[#allocation27_spill] sm:$0xff]  ;;  %p306_p4 = scmp.ge.s32.totalorder %s309_s17, 2  }
  0x68   : >> { %3681 = vmatpush3.bf16.msra.mxu1 %v3514_v17  ;;  %3701 = vmatpush3.bf16.msra.mxu0 %v3514_v17  ;;  %v2639_v40 = vmul.f32 %v4347_v21, %v2634_v35  ;;  %v3517_v47 = vcombine.low %v7067_v8, %v7066_v9  ;;  %v3518_v54 = vcombine.low %v7071_v10, %v7070_v11  ;;  %v7073_v12 = vld [vmem:[#allocation26_spill] sm:$0xff]  ;;  %v7074_v15 = vld [vmem:[#allocation29_spill] sm:$0xff]  ;;  %v7075_v14 = vld [vmem:[#allocation28_spill] sm:$0xff]  ;;  %v6886_v45 = vmov 2102212464   ;;  %s6835_s17 = scalar_lea.sflag (%p306_p4), [#allocation4], %s272_s30 }
  0x69   : >> { %3682 = vmatprep.subr.bf16.mxu1 %v3515_v18  ;;  %3702 = vmatprep.subr.bf16.mxu0 %v3515_v18  ;;  %v331_v42 = vsub.f32 %v321_v22, %v327_v36  ;;  %v332_v43 = vsub.f32 %v322_v23, %v328_v37  ;;  %v4367_v44 = vmul.f32 %v2641_v38, %v2631_v24  ;;  %v6890_v36 = vmov 683565275   ;;  %p7321_p8 = scmp.ne.s32.totalorder (%p306_p4), %s7030_s28, 0 }
  0x6a   : >> { %v4373_v48 = vmul.f32 %v2642_v39, %v2632_v25  ;;  %v2644_v49 = vadd.f32 %v4354_v27, %v2639_v40  ;;  %504 = vperm.xlu1 %3876, %v320_v41   ;;  %494 = vperm.xlu0 %3875, %v318_v46   ;;  %v326_v55 = vpack.c.bf16 %v324_v52, %v323_v51  ;;  %v6894_v38 = vmov 2475754826  }
  0x6b   : >> { %7065 = vst [vmem:[#allocation30_spill] sm:$0xff] %v4367_v44  ;;  %v335_v50 = vpack.c.bf16 %v332_v43, %v331_v42  ;;  %v3519_v56 = vcombine.low %v7073_v12, %v7072_v13  ;;  %v3520_v59 = vcombine.low %v7075_v14, %v7074_v15  ;;  %v6896_v41 = vmov 2131351028  }
  0x6c   : >> { %3683 = vmatpush3.bf16.msra.mxu1 %v3515_v18  ;;  %3703 = vmatpush3.bf16.msra.mxu0 %v3515_v18  ;;  %7068 = vst [vmem:[#allocation31_spill] sm:$0xff] %v4373_v48  ;;  %v4376_v53 = vmul.f32 %v2644_v49, %v2634_v35  ;;  %v329_v57 = vunpack.c.l.bf16 %v326_v55  ;;  %v330_v58 = vunpack.c.h.bf16 %v326_v55  ;;  %v6892_v49 = vmov 920167782  }
  0x6d   : >> { %3684 = vmatprep.subr.bf16.mxu1 %v3516_v34  ;;  %3704 = vmatprep.subr.bf16.mxu0 %v3516_v34  ;;  %v7088_v3 = vmov 920167782  }
  0x6e   : >> { %7069 = vst [vmem:[#allocation32_spill] sm:$0xff] %v4376_v53  ;;  %3694 = vmatprep.mubr.bf16.mxu1 %v335_v50  ;;  %v333_v60 = vsub.f32 %v323_v51, %v329_v57  ;;  %v334_v61 = vsub.f32 %v324_v52, %v330_v58  ;;  %v6888_v52 = vmov 1326507024  }
  0x70   : >> { %3685 = vmatpush3.bf16.msra.mxu1 %v3516_v34  ;;  %3705 = vmatpush3.bf16.msra.mxu0 %v3516_v34  ;;  %v336_v62 = vpack.c.bf16 %v334_v61, %v333_v60 }
  0x71   : >> { %3686 = vmatprep.subr.bf16.mxu1 %v3517_v47  ;;  %3706 = vmatprep.subr.bf16.mxu0 %v3517_v47 }
  0x74   : >> { %3687 = vmatpush3.bf16.msra.mxu1 %v3517_v47  ;;  %3707 = vmatpush3.bf16.msra.mxu0 %v3517_v47 }
  0x75   : >> { %3688 = vmatprep.subr.bf16.mxu1 %v3518_v54  ;;  %3708 = vmatprep.subr.bf16.mxu0 %v3518_v54 }
  0x78   : >> { %3689 = vmatpush3.bf16.msra.mxu1 %v3518_v54  ;;  %3709 = vmatpush3.bf16.msra.mxu0 %v3518_v54 }
  0x79   : >> { %3690 = vmatprep.subr.bf16.mxu1 %v3519_v56  ;;  %3710 = vmatprep.subr.bf16.mxu0 %v3519_v56 }
  0x7c   : >> { %3691 = vmatpush3.bf16.msra.mxu1 %v3519_v56  ;;  %3711 = vmatpush3.bf16.msra.mxu0 %v3519_v56 }
  0x7d   : >> { %3692 = vmatprep.subr.bf16.mxu1 %v3520_v59  ;;  %3712 = vmatprep.subr.bf16.mxu0 %v3520_v59 }
  0x80   : >> { %3693 = vmatpush3.bf16.msra.mxu1 %v3520_v59  ;;  %3713 = vmatpush3.bf16.msra.mxu0 %v3520_v59 }
  0x83   : >> { %3695 = vmatmul.mubr.bf16.vlgmr.msra.gmra.mrb[0].mxu1 %v336_v62  ;;  %3715 = vmatmul.mubr.bf16.vlgmr.msra.gmra.mrb[0].mxu0 %v326_v55 }
  0xe5   : >> { %v500_v23 = vpop.permute.xlu1 %499 }
 0x156   : >> { %v3696_v63 = vpop.f32.mrb[0].mxu1  ;;  %v3716_v16 = vpop.f32.mrb[0].mxu0 }
 0x157   : >> { %v477_v17 = vadd.f32 %v3716_v16, %v3696_v63  ;;  %v419_v18 = vpop.f32.mrb[1].mxu1  ;;  %v468_v19 = vpop.f32.mrb[1].mxu0 }
 0x158   : >> { %v4384_v20 = vadd.f32 %v468_v19, %v419_v18 }
 0x159   : >> { %v485_v22 = vmul.f32 0.00014247585, %v477_v17 }
 0x15b   : >> { %v4386_v24 = vadd.f32 %v500_v23, %v485_v22 }
 0x15d   : >> { %v722_v25 = vand.u32 2139095040, %v4386_v24  ;;  %v719_v30 = vand.u32 2147483647, %v4386_v24  ;;  %vm721_vm7 = vcmp.lt.s32.totalorder %v4386_v24, 0  ;;  %vm811_vm15 = vweird.f32 %v4386_v24 }
 0x15f   : >> { %v723_v26 = vshrl.u32 %v722_v25, 23  ;;  %v726_v33 = vand.u32 8388607, %v719_v30  ;;  %vm720_vm8 = vcmp.le.f32.partialorder %v719_v30, 0.7853982 }
 0x161   : >> { %v3529_v28 = vadd.s32 4294967169, %v723_v26  ;;  %v727_v55 = vor.u32 8388608, %v726_v33 }
 0x163   : >> { %v729_v29 = vadd.s32 1, %v3529_v28  ;;  %v767_v23 = vshll.u32 %v727_v55, 8 }
 0x165   : >> { %vm730_vm0 = vcmp.gt.s32.totalorder %v729_v29, 0 }
 0x166   : >> { %v731_v31 = vsel %vm730_vm0, %v729_v29, 0 }
 0x167   : >> { %v733_v32 = vand.u32 31, %v731_v31  ;;  %v732_v35 = vshrl.u32 %v731_v31, 5 }
 0x169   : >> { %v734_v34 = vsub.s32 32, %v733_v32  ;;  %v736_v37 = vshll.u32 %v6890_v36, %v733_v32  ;;  %v739_v39 = vshll.u32 %v6894_v38, %v733_v32  ;;  %v742_v43 = vshll.u32 %v6896_v41, %v733_v32 }
 0x16a   : >> { %v745_v47 = vshll.u32 %v6886_v45, %v733_v32  ;;  %v748_v51 = vshll.u32 %v6892_v49, %v733_v32  ;;  %vm751_vm1 = vcmp.lt.s32.totalorder %v732_v35, 1  ;;  %vm754_vm2 = vcmp.lt.s32.totalorder %v732_v35, 4 }
 0x16b   : >> { %v737_v40 = vshrl.u32 %v6894_v38, %v734_v34  ;;  %v740_v42 = vshrl.u32 %v6896_v41, %v734_v34  ;;  %v743_v46 = vshrl.u32 %v6886_v45, %v734_v34  ;;  %v746_v50 = vshrl.u32 %v6892_v49, %v734_v34 }
 0x16c   : >> { %v749_v54 = vshrl.u32 %v6888_v52, %v734_v34  ;;  %v735_v16 = vshrl.u32 %v6890_v36, %v734_v34  ;;  %vm753_vm3 = vcmp.lt.s32.totalorder %v732_v35, 3  ;;  %vm752_vm4 = vcmp.lt.s32.totalorder %v732_v35, 2 }
 0x16d   : >> { %v738_v56 = vor.u32 %v737_v40, %v736_v37  ;;  %v741_v57 = vor.u32 %v740_v42, %v739_v39  ;;  %v744_v58 = vor.u32 %v743_v46, %v742_v43  ;;  %v747_v59 = vor.u32 %v746_v50, %v745_v47 }
 0x16e   : >> { %v750_v60 = vor.u32 %v749_v54, %v748_v51 }
 0x16f   : >> { %v756_v61 = vsel %vm754_vm2, %v744_v58, 2102212464  ;;  %v759_v62 = vsel %vm751_vm1, %v738_v56, %v741_v57  ;;  %v763_v63 = vsel %vm751_vm1, %v741_v57, %v744_v58  ;;  %v760_v17 = vsel %vm754_vm2, %v747_v59, 920167782 }
 0x170   : >> { %v764_v18 = vsel %vm754_vm2, %v750_v60, 1326507024  ;;  %v761_v19 = vsel %vm753_vm3, %v744_v58, %v760_v17  ;;  %v755_v25 = vsel %vm751_vm1, %v735_v16, %v738_v56  ;;  %v757_v26 = vsel %vm753_vm3, %v741_v57, %v756_v61 }
 0x171   : >> { %v765_v22 = vsel %vm753_vm3, %v747_v59, %v764_v18  ;;  %v762_v28 = vsel %vm752_vm4, %v759_v62, %v761_v19  ;;  %v758_v39 = vsel %vm752_vm4, %v755_v25, %v757_v26  ;;  %v4415_v25 = vpop.f32.mrb[2].mxu0 }
 0x172   : >> { %v766_v29 = vsel %vm752_vm4, %v763_v63, %v765_v22  ;;  %v4406_v33 = vmul.u32.u64.low %v767_v23, %v762_v28  ;;  %v4407_v37 = vmul.u32.u64.high %v767_v23, %v762_v28, %v4406_v33  ;;  %v774_v40 = vmul.u32 %v767_v23, %v758_v39 }
 0x173   : >> { %v4403_v31 = vmul.u32.u64.low %v767_v23, %v766_v29  ;;  %v4404_v32 = vmul.u32.u64.high %v767_v23, %v766_v29, %v4403_v31  ;;  %v4413_v23 = vpop.f32.mrb[2].mxu1 }
 0x174   : >> { %v777_v34 = vadd.s32 1, %v4407_v37 }
 0x175   : >> { %vm776_vm5 = vc.u32 %v4404_v32, %v4406_v33  ;;  %v775_v58 = vadd.s32 %v4406_v33, %v4404_v32 }
 0x176   : >> { %v778_v35 = vsel %vm776_vm5, %v777_v34, %v4407_v37 }
 0x177   : >> { %v779_v42 = vadd.s32 %v778_v35, %v774_v40  ;;  %v4422_v35 = vmul.f32 0.5, %v4386_v24 }
 0x179   : >> { %v780_v43 = vadd.s32 536870912, %v779_v42  ;;  %v1558_v30 = vand.u32 2139095040, %v4422_v35 }
 0x17b   : >> { %v781_v46 = vshrl.u32 %v780_v43, 30 }
 0x17d   : >> { %v782_v47 = vshll.u32 %v781_v46, 30  ;;  %v805_v28 = vsub.s32 4, %v781_v46 }
 0x17f   : >> { %v783_v50 = vsub.s32 %v779_v42, %v782_v47  ;;  %v806_v32 = vsel %vm721_vm7, %v805_v28, %v781_v46 }
 0x180   : >> { %v808_v37 = vsel %vm720_vm8, 0, %v806_v32 }
 0x181   : >> { %v785_v51 = vsub.s32 0, %v783_v50  ;;  %v812_v39 = vadd.s32 3, %v808_v37  ;;  %v1226_v40 = vand.u32 3, %v808_v37  ;;  %v4446_v37 = vstv %s3604_s8  ;;  %s4546_s8 = sld [smem:[#allocation6 + $0x28]] }
 0x182   : >> { %7080 = vst [vmem:[#allocation37_spill] sm:$0xff] %v4446_v37 }
 0x183   : >> { %v3530_v54 = vmin.u32 %v785_v51, %v783_v50  ;;  %v813_v34 = vand.u32 3, %v812_v39  ;;  %vm1231_vm10 = vcmp.eq.s32.totalorder %v1226_v40, 2  ;;  %vm1228_vm12 = vcmp.eq.s32.totalorder %v1226_v40, 0 }
 0x184   : >> { %vm1227_vm14 = vcmp.lt.s32.totalorder %v1226_v40, 2 }
 0x185   : >> { %v787_v55 = vclz %v3530_v54  ;;  %vm818_vm9 = vcmp.eq.s32.totalorder %v813_v34, 2  ;;  %vm815_vm11 = vcmp.eq.s32.totalorder %v813_v34, 0  ;;  %vm814_vm13 = vcmp.lt.s32.totalorder %v813_v34, 2 }
 0x187   : >> { %v3531_v56 = vadd.s32 4294967294, %v787_v55 }
 0x189   : >> { %vm3532_vm6 = vcmp.lt.s32.totalorder %v3531_v56, 0 }
 0x18a   : >> { %v790_v57 = vsel %vm3532_vm6, 0, %v3531_v56 }
 0x18b   : >> { %v791_v59 = vsub.s32 32, %v790_v57  ;;  %v795_v60 = vsub.s32 4294967266, %v790_v57  ;;  %v792_v61 = vshll.u32 %v783_v50, %v790_v57 }
 0x18d   : >> { %v793_v62 = vshrl.u32 %v775_v58, %v791_v59  ;;  %v796_v63 = vadd.s32 127, %v795_v60  ;;  %v4428_v60 = vstv %s3601_s14  ;;  %s4465_s14 = sld [smem:[#allocation6 + $0x2b]] }
 0x18e   : >> { %7077 = vst [vmem:[#allocation34_spill] sm:$0xff] %v4428_v60 }
 0x18f   : >> { %v794_v16 = vor.u32 %v793_v62, %v792_v61  ;;  %v797_v17 = vshll.u32 %v796_v63, 23  ;;  %v1559_v62 = vshrl.u32 %v1558_v30, 23  ;;  %v4432_v63 = vstv %s3602_s25  ;;  %s4479_s25 = sld [smem:[#allocation6 + $0x2a]] }
 0x190   : >> { %7078 = vst [vmem:[#allocation35_spill] sm:$0xff] %v4432_v63  ;;  %v4454_v30 = vstv %s3605_s9  ;;  %s3611_s9 = sld [smem:[#allocation6 + $0x27]] }
 0x191   : >> { %v798_v18 = vor.u32 4788187, %v797_v17  ;;  %v801_v22 = vcvt.s32.f32 %v794_v16  ;;  %7081 = vst [vmem:[#allocation38_spill] sm:$0xff] %v4454_v30 }
 0x193   : >> { %v799_v19 = vand.u32 2147483647, %v798_v18  ;;  %v3561_v18 = vadd.s32 4294967169, %v1559_v62 }
 0x195   : >> { %v802_v26 = vmul.f32 %v801_v22, %v799_v19  ;;  %v4439_v22 = vstv %s3603_s26  ;;  %s4526_s26 = sld [smem:[#allocation6 + $0x29]] }
 0x196   : >> { %7079 = vst [vmem:[#allocation36_spill] sm:$0xff] %v4439_v22 }
 0x197   : >> { %v803_v29 = vxor.u32 2147483648, %v802_v26 }
 0x199   : >> { %v804_v31 = vsel %vm721_vm7, %v803_v29, %v802_v26  ;;  %v490_v26 = vpop.permute.xlu0 %489  ;;  %v1565_v29 = vadd.s32 1, %v3561_v18  ;;  %v4473_v18 = vstv %s3606_s11  ;;  %s3612_s11 = sld [smem:[#allocation6 + $0x26]] }
 0x19a   : >> { %v807_v33 = vsel %vm720_vm8, %v4386_v24, %v804_v31  ;;  %v483_v24 = vmul.f32 0.00014247585, %v4384_v20  ;;  %7082 = vst [vmem:[#allocation39_spill] sm:$0xff] %v4473_v18 }
 0x19b   : >> { %3877 = vcosq.f32 %v807_v33  ;;  %vm1566_vm0 = vcmp.gt.s32.totalorder %v1565_v29, 0 }
 0x19c   : >> { %3879 = vsinq.f32 %v807_v33  ;;  %v4442_v31 = vadd.f32 %v490_v26, %v483_v24  ;;  %v1567_v34 = vsel %vm1566_vm0, %v1565_v29, 0 }
 0x19e   : >> { %v514_v20 = vand.u32 2139095040, %v4442_v31 }
 0x1a5   : >> { %v3878_v42 = vpop.eup %3877 }
 0x1a6   : >> { %v3880_v43 = vpop.eup %3879  ;;  %v819_v47 = vxor.u32 2147483648, %v3878_v42 }
 0x1a7   : >> { %v816_v50 = vxor.u32 2147483648, %v3880_v43 }
 0x1a8   : >> { %v820_v46 = vsel %vm818_vm9, %v819_v47, %v3880_v43  ;;  %v1233_v51 = vsel %vm1231_vm10, %v819_v47, %v3880_v43  ;;  %v4451_v43 = vmul.f32 50.0, %v4422_v35 }
 0x1a9   : >> { %v817_v54 = vsel %vm815_vm11, %v3878_v42, %v816_v50  ;;  %v1230_v55 = vsel %vm1228_vm12, %v3878_v42, %v816_v50  ;;  %v515_v42 = vshrl.u32 %v514_v20, 23  ;;  %v1569_v50 = vand.u32 31, %v1567_v34 }
 0x1aa   : >> { %v821_v56 = vsel %vm814_vm13, %v817_v54, %v820_v46  ;;  %v1234_v57 = vsel %vm1227_vm14, %v1230_v55, %v1233_v51  ;;  %v4458_v54 = vadd.f32 %v4415_v25, %v4413_v23  ;;  %v6885_v55 = vand.u32 2147483647, %v4422_v35 }
 0x1ab   : >> { %v4426_v58 = vsel %vm811_vm15, nan, %v821_v56  ;;  %v1235_v59 = vsel %vm811_vm15, nan, %v1234_v57  ;;  %v3521_v51 = vadd.s32 4294967169, %v515_v42  ;;  %v1978_v56 = vand.u32 2139095040, %v4451_v43 }
 0x1ac   : >> { %7076 = vst [vmem:[#allocation33_spill] sm:$0xff] %v4426_v58  ;;  %v4430_v61 = vmul.f32 2.0, %v1235_v59  ;;  %v4463_v59 = vsub.s32 32, %v1569_v50  ;;  %v4471_v23 = vand.u32 8388607, %v6885_v55  ;;  %v1581_v42 = vshll.u32 %v6886_v45, %v1569_v50 }
 0x1ad   : >> { %v521_v62 = vadd.s32 1, %v3521_v51  ;;  %v1979_v25 = vshrl.u32 %v1978_v56, 23  ;;  %v1575_v51 = vshll.u32 %v6894_v38, %v1569_v50  ;;  %v1578_v56 = vshll.u32 %v6896_v41, %v1569_v50 }
 0x1ae   : >> { %v2662_v16 = vmul.f32 %v4428_v60, %v4430_v61  ;;  %v1582_v26 = vshrl.u32 %v6892_v49, %v4463_v59  ;;  %v1576_v20 = vshrl.u32 %v6896_v41, %v4463_v59 }
 0x1af   : >> { %vm522_vm1 = vcmp.gt.s32.totalorder %v521_v62, 0 }
 0x1b0   : >> { %v2668_v17 = vadd.f32 %v4432_v63, %v2662_v16  ;;  %v523_v24 = vsel %vm522_vm1, %v521_v62, 0  ;;  %v4495_v62 = vadd.s32 4294967169, %v1979_v25  ;;  %v4499_v55 = vor.u32 %v1582_v26, %v1581_v42 }
 0x1b1   : >> { %v525_v29 = vand.u32 31, %v523_v24 }
 0x1b2   : >> { %v2672_v19 = vmul.f32 %v2668_v17, %v4430_v61 }
 0x1b3   : >> { %v540_v6 = vshll.u32 %v7088_v3, %v525_v29 }
 0x1b4   : >> { %v2676_v28 = vsub.f32 %v2672_v19, %v4428_v60  ;;  %v1573_v19 = vshrl.u32 %v6894_v38, %v4463_v59 }
 0x1b6   : >> { %v2682_v32 = vadd.f32 %v4439_v22, %v2676_v28 }
 0x1b8   : >> { %v2686_v33 = vmul.f32 %v2682_v32, %v4430_v61 }
 0x1ba   : >> { %v2690_v39 = vsub.f32 %v2686_v33, %v2668_v17  ;;  %v1572_v33 = vshll.u32 %v6890_v36, %v1569_v50  ;;  %v4503_v36 = vor.u32 %v1576_v20, %v1575_v51  ;;  %v7085_v20 = vmov 683565275  }
 0x1bb   : >> { %v528_v42 = vshll.u32 %v7085_v20, %v525_v29 }
 0x1bc   : >> { %v2696_v40 = vadd.f32 %v4446_v37, %v2690_v39  ;;  %v1579_v39 = vshrl.u32 %v6886_v45, %v4463_v59  ;;  %v1584_v45 = vshll.u32 %v6892_v49, %v1569_v50  ;;  %v7084_v50 = vand.u32 2147483647, %v4442_v31 }
 0x1bd   : >> { %v7087_v49 = vmov 2102212464  }
 0x1be   : >> { %v2700_v47 = vmul.f32 %v2696_v40, %v4430_v61  ;;  %v4510_v17 = vor.u32 %v1579_v39, %v1578_v56  ;;  %v4523_v56 = vstv %s4479_s25  ;;  %v537_v2 = vshll.u32 %v7087_v49, %v525_v29  ;;  %s4639_s25 = sld [smem:[#allocation6 + $0x24]] }
 0x1bf   : >> { %7086 = vst [vmem:[#allocation41_spill] sm:$0xff] %v4523_v56 }
 0x1c0   : >> { %v2704_v46 = vsub.f32 %v2700_v47, %v2682_v32  ;;  %v4481_v32 = vshrl.u32 %v1567_v34, 5  ;;  %v1585_v47 = vshrl.u32 %v6888_v52, %v4463_v59 }
 0x1c2   : >> { %v2710_v57 = vadd.f32 %v4454_v30, %v2704_v46  ;;  %v526_v46 = vsub.s32 32, %v525_v29  ;;  %vm1587_vm2 = vcmp.lt.s32.totalorder %v4481_v32, 1  ;;  %v1586_v25 = vor.u32 %v1585_v47, %v1584_v45 }
 0x1c3   : >> { %vm1589_vm3 = vcmp.lt.s32.totalorder %v4481_v32, 3  ;;  %vm1590_vm4 = vcmp.lt.s32.totalorder %v4481_v32, 4  ;;  %v531_v45 = vshll.u32 %v6894_v38, %v525_v29  ;;  %v534_v47 = vshll.u32 %v6896_v41, %v525_v29 }
 0x1c4   : >> { %v2714_v16 = vmul.f32 %v2710_v57, %v4430_v61  ;;  %v529_v34 = vshrl.u32 %v6894_v38, %v526_v46  ;;  %v532_v26 = vshrl.u32 %v6896_v41, %v526_v46  ;;  %v1596_v51 = vsel %vm1590_vm4, %v4499_v55, 920167782 }
 0x1c5   : >> { %v538_v4 = vshrl.u32 %v7088_v3, %v526_v46  ;;  %v7089_v38 = vmov 1326507024   ;;  %vm1588_vm9 = vcmp.lt.s32.totalorder %v4481_v32, 2 }
 0x1c6   : >> { %v2718_v28 = vsub.f32 %v2714_v16, %v2696_v40  ;;  %v4497_v16 = vor.u32 %v1573_v19, %v1572_v33  ;;  %v518_v33 = vand.u32 8388607, %v7084_v50  ;;  %v535_v50 = vshrl.u32 %v7087_v49, %v526_v46 }
 0x1c7   : >> { %v533_v1 = vor.u32 %v532_v26, %v531_v45  ;;  %v541_v7 = vshrl.u32 %v7089_v38, %v526_v46  ;;  %v1600_v45 = vsel %vm1590_vm4, %v1586_v25, 1326507024  ;;  %v4554_v25 = vstv %s4526_s26  ;;  %s4668_s26 = sld [smem:[#allocation6 + $0x23]] }
 0x1c8   : >> { %v2724_v40 = vadd.f32 %v4473_v18, %v2718_v28  ;;  %v4507_v28 = vstv %s4465_s14  ;;  %v536_v5 = vor.u32 %v535_v50, %v534_v47  ;;  %7090 = vst [vmem:[#allocation42_spill] sm:$0xff] %v4554_v25  ;;  %s3613_s14 = sld [smem:[#allocation6 + $0x25]] }
 0x1c9   : >> { %7083 = vst [vmem:[#allocation40_spill] sm:$0xff] %v4507_v28 }
 0x1ca   : >> { %v2728_v52 = vmul.f32 %v2724_v40, %v4430_v61 }
 0x1cc   : >> { %v2732_v19 = vsub.f32 %v2728_v52, %v2710_v57  ;;  %v524_v52 = vshrl.u32 %v523_v24, 5  ;;  %v530_v57 = vor.u32 %v529_v34, %v528_v42  ;;  %v1595_v24 = vsel %vm1587_vm2, %v4497_v16, %v4503_v36 }
 0x1cd   : >> { %v1597_v34 = vsel %vm1589_vm3, %v4510_v17, %v1596_v51  ;;  %v539_v42 = vor.u32 %v538_v4, %v537_v2 }
 0x1ce   : >> { %v2738_v39 = vadd.f32 %v4507_v28, %v2732_v19  ;;  %v519_v19 = vor.u32 8388608, %v518_v33  ;;  %v542_v33 = vor.u32 %v541_v7, %v540_v6  ;;  %vm543_vm5 = vcmp.lt.s32.totalorder %v524_v52, 1 }
 0x1cf   : >> { %vm546_vm6 = vcmp.lt.s32.totalorder %v524_v52, 4  ;;  %vm545_vm7 = vcmp.lt.s32.totalorder %v524_v52, 3  ;;  %v551_v47 = vsel %vm543_vm5, %v530_v57, %v533_v1  ;;  %vm544_vm8 = vcmp.lt.s32.totalorder %v524_v52, 2 }
 0x1d0   : >> { %v2742_v0 = vmul.f32 %v2738_v39, %v4430_v61  ;;  %v552_v50 = vsel %vm546_vm6, %v539_v42, 920167782  ;;  %v548_v41 = vsel %vm546_vm6, %v536_v5, 2102212464  ;;  %v559_v2 = vshll.u32 %v519_v19, 8 }
 0x1d1   : >> { %v527_v6 = vshrl.u32 %v7085_v20, %v526_v46  ;;  %v556_v51 = vsel %vm546_vm6, %v542_v33, 1326507024  ;;  %v549_v19 = vsel %vm545_vm7, %v533_v1, %v548_v41  ;;  %v1601_v46 = vsel %vm1589_vm3, %v4499_v55, %v1600_v45 }
 0x1d2   : >> { %v2746_v26 = vsub.f32 %v2742_v0, %v2724_v40  ;;  %v553_v0 = vsel %vm545_vm7, %v536_v5, %v552_v50  ;;  %v555_v40 = vsel %vm543_vm5, %v533_v1, %v536_v5  ;;  %v557_v50 = vsel %vm545_vm7, %v539_v42, %v556_v51 }
 0x1d3   : >> { %v554_v7 = vsel %vm544_vm8, %v551_v47, %v553_v0  ;;  %v547_v10 = vsel %vm543_vm5, %v527_v6, %v530_v57  ;;  %v1599_v5 = vsel %vm1587_vm2, %v4503_v36, %v4510_v17  ;;  %v1598_v57 = vsel %vm1588_vm9, %v1595_v24, %v1597_v34 }
 0x1d4   : >> { %v2752_v29 = vadd.f32 %v4523_v56, %v2746_v26  ;;  %v4556_v26 = vmul.u32.u64.low %v559_v2, %v554_v7  ;;  %v4557_v8 = vmul.u32.u64.high %v559_v2, %v554_v7, %v4556_v26  ;;  %v7091_v33 = vor.u32 8388608, %v4471_v23 }
 0x1d5   : >> { %v1985_v0 = vadd.s32 1, %v4495_v62  ;;  %v1602_v45 = vsel %vm1588_vm9, %v1599_v5, %v1601_v46  ;;  %v4591_v6 = vstv %s4546_s8  ;;  %v1571_v5 = vshrl.u32 %v7085_v20, %v4463_v59  ;;  %s3616_s8 = sld [smem:[#allocation6 + $0x22]] }
 0x1d6   : >> { %v2756_v4 = vmul.f32 %v2752_v29, %v4430_v61  ;;  %v1603_v47 = vshll.u32 %v7091_v33, 8  ;;  %v569_v55 = vadd.s32 1, %v4557_v8  ;;  %7092 = vst [vmem:[#allocation43_spill] sm:$0xff] %v4591_v6  ;;  %v4607_v46 = vmul.f32 51.0, %v4422_v35 }
 0x1d7   : >> { %vm1986_vm11 = vcmp.gt.s32.totalorder %v1985_v0, 0  ;;  %vm603_vm7 = vweird.f32 %v4442_v31 }
 0x1d8   : >> { %v2760_v9 = vsub.f32 %v2756_v4, %v2738_v39  ;;  %v558_v39 = vsel %vm544_vm8, %v555_v40, %v557_v50  ;;  %v550_v4 = vsel %vm544_vm8, %v547_v10, %v549_v19  ;;  %v1592_v19 = vsel %vm1590_vm4, %v4510_v17, 2102212464  ;;  %7093 = vst [vmem:[#allocation44_spill] sm:$0xff] %v4607_v46 }
 0x1d9   : >> { %v4575_v41 = vmul.u32.u64.low %v559_v2, %v558_v39  ;;  %v4576_v42 = vmul.u32.u64.high %v559_v2, %v558_v39, %v4575_v41  ;;  %v566_v7 = vmul.u32 %v559_v2, %v550_v4  ;;  %v1987_v50 = vsel %vm1986_vm11, %v1985_v0, 0 }
 0x1da   : >> { %v2766_v1 = vadd.f32 %v4554_v25, %v2760_v9  ;;  %v4586_v34 = vmul.u32.u64.low %v1603_v47, %v1598_v57  ;;  %v4587_v9 = vmul.u32.u64.high %v1603_v47, %v1598_v57, %v4586_v34  ;;  %v4609_v39 = vstv %s3611_s9  ;;  %s4713_s9 = sld [smem:[#allocation6 + $0x21]] }
 0x1db   : >> { %vm568_vm10 = vc.u32 %v4576_v42, %v4556_v26  ;;  %v4595_v62 = vmul.u32.u64.low %v1603_v47, %v1602_v45  ;;  %v4596_v10 = vmul.u32.u64.high %v1603_v47, %v1602_v45, %v4595_v62  ;;  %7094 = vst [vmem:[#allocation45_spill] sm:$0xff] %v4609_v39  ;;  %v1591_v41 = vsel %vm1587_vm2, %v1571_v5, %v4497_v16 }
 0x1dc   : >> { %v2770_v24 = vmul.f32 %v2766_v1, %v4430_v61  ;;  %v570_v52 = vsel %vm568_vm10, %v569_v55, %v4557_v8  ;;  %v1593_v17 = vsel %vm1589_vm3, %v4503_v36, %v1592_v19  ;;  %v1989_v33 = vand.u32 31, %v1987_v50 }
 0x1dd   : >> { %v571_v51 = vadd.s32 %v570_v52, %v566_v7  ;;  %v1613_v0 = vadd.s32 1, %v4587_v9  ;;  %vm1612_vm12 = vc.u32 %v4596_v10, %v4586_v34  ;;  %v1594_v16 = vsel %vm1588_vm9, %v1591_v41, %v1593_v17 }
 0x1de   : >> { %v2774_v23 = vsub.f32 %v2770_v24, %v2752_v29  ;;  %v4628_v36 = vsub.s32 32, %v1989_v33  ;;  %v4630_v24 = vstv %s3612_s11  ;;  %v6898_v7 = vand.u32 2147483647, %v4451_v43  ;;  %s4754_s11 = sld [smem:[#allocation6 + $0x20]] }
 0x1df   : >> { %v572_v2 = vadd.s32 536870912, %v571_v51  ;;  %7095 = vst [vmem:[#allocation46_spill] sm:$0xff] %v4630_v24  ;;  %v1610_v19 = vmul.u32 %v1603_v47, %v1594_v16  ;;  %v4651_v16 = vstv %s3613_s14  ;;  %vm513_vm3 = vcmp.lt.s32.totalorder %v4442_v31, 0  ;;  %s4784_s14 = sld [smem:[#allocation6 + $0x1f]] }
 0x1e0   : >> { %v2780_v40 = vadd.f32 %v4591_v6, %v2774_v23  ;;  %v1614_v23 = vsel %vm1612_vm12, %v1613_v0, %v4587_v9  ;;  %v4643_v41 = vand.u32 8388607, %v6898_v7  ;;  %v7097_v9 = vmov 2131351028   ;;  %7098 = vst [vmem:[#allocation47_spill] sm:$0xff] %v4651_v16 }
 0x1e1   : >> { %v4611_v57 = vshrl.u32 %v572_v2, 30  ;;  %v4635_v32 = vadd.s32 %v1614_v23, %v1610_v19  ;;  %v1992_v0 = vshll.u32 %v7085_v20, %v1989_v33  ;;  %v2005_v11 = vshrl.u32 %v7089_v38, %v4628_v36 }
 0x1e2   : >> { %v2784_v29 = vmul.f32 %v2780_v40, %v4430_v61 }
 0x1e3   : >> { %v574_v4 = vshll.u32 %v4611_v57, 30  ;;  %v1616_v19 = vadd.s32 536870912, %v4635_v32 }
 0x1e4   : >> { %v2788_v8 = vsub.f32 %v2784_v29, %v2766_v1  ;;  %v2398_v1 = vand.u32 2139095040, %v4607_v46 }
 0x1e5   : >> { %v575_v45 = vsub.s32 %v571_v51, %v574_v4  ;;  %v2002_v4 = vshrl.u32 %v7088_v3, %v4628_v36  ;;  %v4674_v14 = vshrl.u32 %v1616_v19, 30 }
 0x1e6   : >> { %v2794_v59 = vadd.f32 %v4609_v39, %v2788_v8  ;;  %v2399_v29 = vshrl.u32 %v2398_v1, 23  ;;  %v7096_v8 = vmov 2475754826  }
 0x1e7   : >> { %v577_v52 = vsub.s32 0, %v575_v45  ;;  %v1993_v51 = vshrl.u32 %v7096_v8, %v4628_v36  ;;  %v1995_v23 = vshll.u32 %v7096_v8, %v1989_v33 }
 0x1e8   : >> { %v2798_v55 = vmul.f32 %v2794_v59, %v4430_v61  ;;  %v3593_v1 = vadd.s32 4294967169, %v2399_v29 }
 0x1e9   : >> { %v3522_v5 = vmin.u32 %v577_v52, %v575_v45  ;;  %v4657_v7 = vor.u32 %v1993_v51, %v1992_v0  ;;  %v1998_v0 = vshll.u32 %v7097_v9, %v1989_v33 }
 0x1ea   : >> { %v2802_v62 = vsub.f32 %v2798_v55, %v2780_v40  ;;  %v1996_v40 = vshrl.u32 %v7097_v9, %v4628_v36  ;;  %v4653_v55 = vshrl.u32 %v1987_v50, 5  ;;  %v1999_v50 = vshrl.u32 %v7087_v49, %v4628_v36 }
 0x1eb   : >> { %v579_v17 = vclz %v3522_v5  ;;  %v2001_v5 = vshll.u32 %v7087_v49, %v1989_v33 }
 0x1ec   : >> { %v2808_v2 = vadd.f32 %v4630_v24, %v2802_v62  ;;  %v4662_v12 = vor.u32 %v1996_v40, %v1995_v23  ;;  %v567_v40 = vadd.s32 %v4556_v26, %v4576_v42  ;;  %vm2010_vm14 = vcmp.lt.s32.totalorder %v4653_v55, 4 }
 0x1ed   : >> { %v3523_v52 = vadd.s32 4294967294, %v579_v17  ;;  %v2405_v17 = vadd.s32 1, %v3593_v1  ;;  %v1983_v26 = vor.u32 8388608, %v4643_v41  ;;  %vm2007_vm0 = vcmp.lt.s32.totalorder %v4653_v55, 1 }
 0x1ee   : >> { %v2812_v47 = vmul.f32 %v2808_v2, %v4430_v61  ;;  %vm2009_vm1 = vcmp.lt.s32.totalorder %v4653_v55, 3  ;;  %vm2008_vm2 = vcmp.lt.s32.totalorder %v4653_v55, 2 }
 0x1ef   : >> { %vm3524_vm13 = vcmp.lt.s32.totalorder %v3523_v52, 0  ;;  %vm2406_vm15 = vcmp.gt.s32.totalorder %v2405_v17, 0 }
 0x1f0   : >> { %v2816_v62 = vsub.f32 %v2812_v47, %v2794_v59  ;;  %v2003_v59 = vor.u32 %v2002_v4, %v2001_v5  ;;  %v2004_v47 = vshll.u32 %v7088_v3, %v1989_v33  ;;  %v582_v51 = vsel %vm3524_vm13, 0, %v3523_v52 }
 0x1f1   : >> { %v583_v23 = vsub.s32 32, %v582_v51  ;;  %v587_v4 = vsub.s32 4294967266, %v582_v51  ;;  %v2000_v5 = vor.u32 %v1999_v50, %v1998_v0  ;;  %v584_v52 = vshll.u32 %v575_v45, %v582_v51 }
 0x1f2   : >> { %v2822_v29 = vadd.f32 %v4651_v16, %v2816_v62  ;;  %v2006_v15 = vor.u32 %v2005_v11, %v2004_v47  ;;  %v4677_v62 = vstv %s4639_s25  ;;  %v2016_v33 = vsel %vm2010_vm14, %v2003_v59, 920167782  ;;  %s3620_s25 = sld [smem:[#allocation6 + $0x1e]] }
 0x1f3   : >> { %7099 = vst [vmem:[#allocation48_spill] sm:$0xff] %v4677_v62  ;;  %v585_v48 = vshrl.u32 %v567_v40, %v583_v23  ;;  %v588_v53 = vadd.s32 127, %v587_v4  ;;  %v2015_v45 = vsel %vm2007_vm0, %v4657_v7, %v4662_v12  ;;  %v2017_v41 = vsel %vm2009_vm1, %v2000_v5, %v2016_v33 }
 0x1f4   : >> { %v2826_v13 = vmul.f32 %v2822_v29, %v4430_v61  ;;  %v2020_v42 = vsel %vm2010_vm14, %v2006_v15, 1326507024  ;;  %v2407_v19 = vsel %vm2406_vm15, %v2405_v17, 0  ;;  %v1618_v47 = vshll.u32 %v4674_v14, 30 }
 0x1f5   : >> { %v4697_v51 = vstv %s4668_s26  ;;  %v2019_v15 = vsel %vm2007_vm0, %v4662_v12, %v2000_v5  ;;  %v2018_v17 = vsel %vm2008_vm2, %v2015_v45, %v2017_v41  ;;  %v2409_v40 = vand.u32 31, %v2407_v19  ;;  %s3621_s26 = sld [smem:[#allocation6 + $0x1d]] }
 0x1f6   : >> { %v2830_v1 = vsub.f32 %v2826_v13, %v2808_v2  ;;  %v586_v13 = vor.u32 %v585_v48, %v584_v52  ;;  %v589_v2 = vshll.u32 %v588_v53, 23  ;;  %7100 = vst [vmem:[#allocation49_spill] sm:$0xff] %v4697_v51  ;;  %v2021_v48 = vsel %vm2009_vm1, %v2003_v59, %v2020_v42 }
 0x1f7   : >> { %v2022_v52 = vsel %vm2008_vm2, %v2019_v15, %v2021_v48  ;;  %v4717_v59 = vsub.s32 %v4635_v32, %v1618_v47  ;;  %v4725_v45 = vsub.s32 32, %v2409_v40  ;;  %v4727_v41 = vstv %s3616_s8  ;;  %s3622_s8 = sld [smem:[#allocation6 + $0x1c]] }
 0x1f8   : >> { %v2836_v11 = vadd.f32 %v4677_v62, %v2830_v1  ;;  %v590_v0 = vor.u32 4788187, %v589_v2  ;;  %v593_v4 = vcvt.s32.f32 %v586_v13  ;;  %v4707_v1 = vshll.u32 %v1983_v26, 8  ;;  %7101 = vst [vmem:[#allocation50_spill] sm:$0xff] %v4727_v41 }
 0x1f9   : >> { %v6899_v2 = vand.u32 2147483647, %v4607_v46  ;;  %v1991_v48 = vshrl.u32 %v7085_v20, %v4628_v36 }
 0x1fa   : >> { %v2840_v50 = vmul.f32 %v2836_v11, %v4430_v61  ;;  %v591_v23 = vand.u32 2147483647, %v590_v0  ;;  %v4720_v42 = vmul.u32.u64.low %v4707_v1, %v2018_v17  ;;  %v4721_v13 = vmul.u32.u64.high %v4707_v1, %v2018_v17, %v4720_v42 }
 0x1fb   : >> { %v2012_v0 = vsel %vm2010_vm14, %v2000_v5, 2102212464  ;;  %v4733_v32 = vmul.u32.u64.low %v4707_v1, %v2022_v52  ;;  %v4734_v47 = vmul.u32.u64.high %v4707_v1, %v2022_v52, %v4733_v32  ;;  %v2402_v5 = vand.u32 8388607, %v6899_v2 }
 0x1fc   : >> { %v2844_v53 = vsub.f32 %v2840_v50, %v2822_v29  ;;  %v594_v44 = vmul.f32 %v593_v4, %v591_v23  ;;  %v597_v29 = vsub.s32 4, %v4611_v57  ;;  %v1621_v4 = vsub.s32 0, %v4717_v59 }
 0x1fd   : >> { %v2011_v36 = vsel %vm2007_vm0, %v1991_v48, %v4657_v7  ;;  %v2413_v7 = vshrl.u32 %v7096_v8, %v4725_v45  ;;  %v2416_v32 = vshrl.u32 %v7097_v9, %v4725_v45  ;;  %v2424_v48 = vshll.u32 %v7088_v3, %v2409_v40 }
 0x1fe   : >> { %v2850_v33 = vadd.f32 %v4697_v51, %v2844_v53  ;;  %v595_v50 = vxor.u32 2147483648, %v594_v44  ;;  %v7102_v53 = vand.u32 2147483647, %v4442_v31  ;;  %v598_v23 = vsel %vm513_vm3, %v597_v29, %v4611_v57 }
 0x1ff   : >> { %v2422_v57 = vshrl.u32 %v7088_v3, %v4725_v45  ;;  %v2415_v2 = vshll.u32 %v7096_v8, %v2409_v40  ;;  %vm2032_vm5 = vc.u32 %v4734_v47, %v4720_v42  ;;  %v2403_v55 = vor.u32 8388608, %v2402_v5 }
 0x200   : >> { %v2854_v26 = vmul.f32 %v2850_v33, %v4430_v61  ;;  %vm512_vm4 = vcmp.le.f32.partialorder %v7102_v53, 0.7853982  ;;  %v596_v17 = vsel %vm513_vm3, %v595_v50, %v594_v44  ;;  %v2013_v44 = vsel %vm2009_vm1, %v4662_v12, %v2012_v0 }
 0x201   : >> { %v599_v52 = vsel %vm512_vm4, %v4442_v31, %v596_v17  ;;  %v4761_v50 = vshrl.u32 %v2407_v19, 5  ;;  %v2421_v12 = vshll.u32 %v7087_v49, %v2409_v40  ;;  %v4767_v0 = vstv %s4713_s9  ;;  %s3623_s9 = sld [smem:[#allocation6 + $0x1b]] }
 0x202   : >> { %v2858_v15 = vsub.f32 %v2854_v26, %v2836_v11  ;;  %3881 = vcosq.f32 %v599_v52  ;;  %v2425_v11 = vshrl.u32 %v7089_v38, %v4725_v45  ;;  %v4759_v26 = vsel %vm512_vm4, 0, %v598_v23  ;;  %7103 = vst [vmem:[#allocation51_spill] sm:$0xff] %v4767_v0 }
 0x203   : >> { %3883 = vsinq.f32 %v599_v52  ;;  %v2014_v19 = vsel %vm2008_vm2, %v2011_v36, %v2013_v44  ;;  %v2412_v17 = vshll.u32 %v7085_v20, %v2409_v40  ;;  %v2423_v23 = vor.u32 %v2422_v57, %v2421_v12 }
 0x204   : >> { %v2864_v58 = vadd.f32 %v4727_v41, %v2858_v15  ;;  %v2419_v15 = vshrl.u32 %v7087_v49, %v4725_v45  ;;  %v604_v52 = vadd.s32 3, %v4759_v26  ;;  %v2418_v41 = vshll.u32 %v7097_v9, %v2409_v40 }
 0x205   : >> { %v2426_v51 = vor.u32 %v2425_v11, %v2424_v48  ;;  %v2414_v36 = vor.u32 %v2413_v7, %v2412_v17  ;;  %v2417_v44 = vor.u32 %v2416_v32, %v2415_v2  ;;  %vm2430_vm6 = vcmp.lt.s32.totalorder %v4761_v50, 4 }
 0x206   : >> { %v2868_v29 = vmul.f32 %v2864_v58, %v4430_v61  ;;  %v2420_v57 = vor.u32 %v2419_v15, %v2418_v41  ;;  %v2436_v40 = vsel %vm2430_vm6, %v2423_v23, 920167782  ;;  %v4791_v11 = vstv %s4754_s11  ;;  %s3624_s11 = sld [smem:[#allocation6 + $0x1a]] }
 0x207   : >> { %7104 = vst [vmem:[#allocation52_spill] sm:$0xff] %v4791_v11  ;;  %v605_v12 = vand.u32 3, %v604_v52  ;;  %v3562_v48 = vmin.u32 %v1621_v4, %v4717_v59  ;;  %v2030_v5 = vmul.u32 %v4707_v1, %v2014_v19  ;;  %v2440_v2 = vsel %vm2430_vm6, %v2426_v51, 1326507024 }
 0x208   : >> { %v2872_v53 = vsub.f32 %v2868_v29, %v2850_v33  ;;  %v2033_v33 = vadd.s32 1, %v4721_v13  ;;  %vm2427_vm8 = vcmp.lt.s32.totalorder %v4761_v50, 1  ;;  %vm2429_vm9 = vcmp.lt.s32.totalorder %v4761_v50, 3 }
 0x209   : >> { %v4804_v15 = vshll.u32 %v2403_v55, 8  ;;  %v2435_v1 = vsel %vm2427_vm8, %v2414_v36, %v2417_v44  ;;  %v2441_v19 = vsel %vm2429_vm9, %v2423_v23, %v2440_v2  ;;  %vm610_vm10 = vcmp.eq.s32.totalorder %v605_v12, 2 }
 0x20a   : >> { %v2878_v62 = vadd.f32 %v4767_v0, %v2872_v53  ;;  %v2034_v32 = vsel %vm2032_vm5, %v2033_v33, %v4721_v13  ;;  %v2439_v13 = vsel %vm2427_vm8, %v2417_v44, %v2420_v57  ;;  %vm2428_vm11 = vcmp.lt.s32.totalorder %v4761_v50, 2 }
 0x20b   : >> { %vm607_vm12 = vcmp.eq.s32.totalorder %v605_v12, 0  ;;  %vm606_vm13 = vcmp.lt.s32.totalorder %v605_v12, 2  ;;  %v2442_v23 = vsel %vm2428_vm11, %v2439_v13, %v2441_v19  ;;  %v4839_v13 = vstv %s3620_s25  ;;  %s3626_s25 = sld [smem:[#allocation6 + $0x18]] }
 0x20c   : >> { %v2882_v29 = vmul.f32 %v2878_v62, %v4430_v61  ;;  %v3882_v7 = vpop.eup %3881  ;;  %7107 = vst [vmem:[#allocation55_spill] sm:$0xff] %v4839_v13  ;;  %v2432_v19 = vsel %vm2430_vm6, %v2420_v57, 2102212464  ;;  %vm1557_vm4 = vcmp.lt.s32.totalorder %v4422_v35, 0 }
 0x20d   : >> { %v3884_v4 = vpop.eup %3883  ;;  %v611_v53 = vxor.u32 2147483648, %v3882_v7 }
 0x20e   : >> { %v2886_v41 = vsub.f32 %v2882_v29, %v2864_v58  ;;  %v2437_v58 = vsel %vm2429_vm9, %v2420_v57, %v2436_v40  ;;  %v608_v17 = vxor.u32 2147483648, %v3884_v4  ;;  %v4820_v29 = vstv %s4784_s14  ;;  %s3625_s14 = sld [smem:[#allocation6 + $0x19]] }
 0x20f   : >> { %v612_v33 = vsel %vm610_vm10, %v611_v53, %v3884_v4  ;;  %v2438_v55 = vsel %vm2428_vm11, %v2435_v1, %v2437_v58  ;;  %7105 = vst [vmem:[#allocation53_spill] sm:$0xff] %v4820_v29  ;;  %v4835_v12 = vmul.u32.u64.low %v4804_v15, %v2442_v23  ;;  %v4836_v58 = vmul.u32.u64.high %v4804_v15, %v2442_v23, %v4835_v12 }
 0x210   : >> { %v2892_v51 = vadd.f32 %v4791_v11, %v2886_v41  ;;  %v609_v40 = vsel %vm607_vm12, %v3882_v7, %v608_v17  ;;  %v2035_v41 = vadd.s32 %v2034_v32, %v2030_v5  ;;  %v1623_v5 = vclz %v3562_v48 }
 0x211   : >> { %v613_v11 = vsel %vm606_vm13, %v609_v40, %v612_v33  ;;  %v4829_v16 = vmul.u32.u64.low %v4804_v15, %v2438_v55  ;;  %v4830_v46 = vmul.u32.u64.high %v4804_v15, %v2438_v55, %v4829_v16  ;;  %v2411_v33 = vshrl.u32 %v7085_v20, %v4725_v45 }
 0x212   : >> { %v2896_v52 = vmul.f32 %v2892_v51, %v4430_v61  ;;  %v4826_v0 = vsel %vm603_vm7, nan, %v613_v11  ;;  %v2036_v32 = vadd.s32 536870912, %v2035_v41  ;;  %v1020_v11 = vand.u32 3, %v4759_v26 }
 0x213   : >> { %7106 = vst [vmem:[#allocation54_spill] sm:$0xff] %v4826_v0  ;;  %v3563_v55 = vadd.s32 4294967294, %v1623_v5  ;;  %v2431_v48 = vsel %vm2427_vm8, %v2411_v33, %v2414_v36  ;;  %v2453_v26 = vadd.s32 1, %v4830_v46  ;;  %vm2452_vm0 = vc.u32 %v4836_v58, %v4829_v16  ;;  %v505_v0 = vpop.permute.xlu1 %504 }
 0x214   : >> { %v2900_v2 = vsub.f32 %v2896_v52, %v2878_v62  ;;  %v4846_v40 = vshrl.u32 %v2036_v32, 30  ;;  %vm1022_vm14 = vcmp.eq.s32.totalorder %v1020_v11, 0  ;;  %vm1025_vm15 = vcmp.eq.s32.totalorder %v1020_v11, 2 }
 0x215   : >> { %v1027_v45 = vsel %vm1025_vm15, %v611_v53, %v3884_v4  ;;  %v4857_v12 = vstv %s3621_s26  ;;  %vm1021_vm1 = vcmp.lt.s32.totalorder %v1020_v11, 2  ;;  %vm3564_vm2 = vcmp.lt.s32.totalorder %v3563_v55, 0  ;;  %v4866_v4 = vpop.f32.mrb[3].mxu0  ;;  %s3627_s26 = sld [smem:[#allocation6 + $0x17]] }
 0x216   : >> { %v2906_v1 = vadd.f32 %v4820_v29, %v2900_v2  ;;  %v2433_v2 = vsel %vm2429_vm9, %v2417_v44, %v2432_v19  ;;  %7108 = vst [vmem:[#allocation56_spill] sm:$0xff] %v4857_v12  ;;  %v2038_v44 = vshll.u32 %v4846_v40, 30  ;;  %v2454_v19 = vsel %vm2452_vm0, %v2453_v26, %v4830_v46 }
 0x217   : >> { %v2434_v36 = vsel %vm2428_vm11, %v2431_v48, %v2433_v2  ;;  %v4874_v33 = vstv %s3622_s8  ;;  %s4951_s8 = sld [smem:[#allocation6 + $0x15]] }
 0x218   : >> { %v2910_v62 = vmul.f32 %v2906_v1, %v4430_v61  ;;  %v2450_v53 = vmul.u32 %v4804_v15, %v2434_v36  ;;  %v4872_v11 = vsub.s32 %v2035_v41, %v2038_v44  ;;  %7109 = vst [vmem:[#allocation57_spill] sm:$0xff] %v4874_v33 }
 0x21a   : >> { %v2914_v52 = vsub.f32 %v2910_v62, %v2892_v51  ;;  %v1024_v51 = vsel %vm1022_vm14, %v3882_v7, %v608_v17  ;;  %v4862_v62 = vpop.f32.mrb[3].mxu1  ;;  %v2041_v15 = vsub.s32 0, %v4872_v11 }
 0x21b   : >> { %v1028_v32 = vsel %vm1021_vm1, %v1024_v51, %v1027_v45  ;;  %v4881_v45 = vstv %s3623_s9  ;;  %s3630_s9 = sld [smem:[#allocation6 + $0x14]] }
 0x21c   : >> { %v2920_v23 = vadd.f32 %v4839_v13, %v2914_v52  ;;  %v1029_v17 = vsel %vm603_vm7, nan, %v1028_v32  ;;  %v2455_v52 = vadd.s32 %v2454_v19, %v2450_v53  ;;  %7110 = vst [vmem:[#allocation58_spill] sm:$0xff] %v4881_v45  ;;  %v1611_v53 = vadd.s32 %v4586_v34, %v4596_v10 }
 0x21d   : >> { %v4876_v46 = vmul.f32 2.0, %v1029_v17  ;;  %vm1977_vm7 = vcmp.lt.s32.totalorder %v4451_v43, 0 }
 0x21e   : >> { %v2924_v57 = vmul.f32 %v2920_v23, %v4430_v61 }
 0x21f   : >> { %v2660_v41 = vmul.f32 %v4428_v60, %v4876_v46 }
 0x220   : >> { %v2928_v5 = vsub.f32 %v2924_v57, %v2906_v1  ;;  %v1626_v1 = vsel %vm3564_vm2, 0, %v3563_v55  ;;  %v2456_v57 = vadd.s32 536870912, %v2455_v52 }
 0x221   : >> { %v1631_v2 = vsub.s32 4294967266, %v1626_v1  ;;  %v1627_v44 = vsub.s32 32, %v1626_v1  ;;  %v2666_v19 = vadd.f32 %v4432_v63, %v2660_v41  ;;  %v1628_v41 = vshll.u32 %v4717_v59, %v1626_v1 }
 0x222   : >> { %v2934_v7 = vadd.f32 %v4857_v12, %v2928_v5  ;;  %v4886_v5 = vshrl.u32 %v2456_v57, 30 }
 0x223   : >> { %v1632_v55 = vadd.s32 127, %v1631_v2  ;;  %v1629_v57 = vshrl.u32 %v1611_v53, %v1627_v44 }
 0x224   : >> { %v2938_v50 = vmul.f32 %v2934_v7, %v4430_v61 }
 0x226   : >> { %v2942_v48 = vsub.f32 %v2938_v50, %v2920_v23  ;;  %v3578_v23 = vmin.u32 %v2041_v15, %v4872_v11  ;;  %v1633_v50 = vshll.u32 %v1632_v55, 23  ;;  %v4895_v15 = vstv %s3624_s11  ;;  %s5013_s11 = sld [smem:[#allocation6 + $0x13]] }
 0x227   : >> { %7111 = vst [vmem:[#allocation59_spill] sm:$0xff] %v4895_v15 }
 0x228   : >> { %v2948_v26 = vadd.f32 %v4874_v33, %v2942_v48  ;;  %v486_v48 = vmul.f32 0.00014247585, %v4458_v54  ;;  %v2043_v2 = vclz %v3578_v23  ;;  %v1634_v63 = vor.u32 4788187, %v1633_v50 }
 0x229   : >> { %v1630_v23 = vor.u32 %v1629_v57, %v1628_v41 }
 0x22a   : >> { %v2952_v51 = vmul.f32 %v2948_v26, %v4430_v61  ;;  %v4900_v10 = vadd.f32 %v505_v0, %v486_v48  ;;  %v3579_v55 = vadd.s32 4294967294, %v2043_v2  ;;  %v1641_v0 = vsub.s32 4, %v4674_v14 }
 0x22b   : >> { %v1637_v48 = vcvt.s32.f32 %v1630_v23 }
 0x22c   : >> { %v2956_v36 = vsub.f32 %v2952_v51, %v2934_v7  ;;  %v2458_v7 = vshll.u32 %v4886_v5, 30  ;;  %v826_v1 = vand.u32 2139095040, %v4900_v10  ;;  %vm3580_vm3 = vcmp.lt.s32.totalorder %v3579_v55, 0 }
 0x22d   : >> { %v1642_v41 = vsel %vm1557_vm4, %v1641_v0, %v4674_v14 }
 0x22e   : >> { %v2962_v32 = vadd.f32 %v4881_v45, %v2956_v36  ;;  %v2670_v36 = vmul.f32 %v2666_v19, %v4876_v46  ;;  %v4902_v45 = vsub.s32 %v2455_v52, %v2458_v7  ;;  %v827_v7 = vshrl.u32 %v826_v1, 23 }
 0x230   : >> { %v2966_v17 = vmul.f32 %v2962_v32, %v4430_v61  ;;  %v2674_v54 = vsub.f32 %v2670_v36, %v4428_v60  ;;  %v2461_v52 = vsub.s32 0, %v4902_v45  ;;  %v3533_v36 = vadd.s32 4294967169, %v827_v7 }
 0x231   : >> { %v4941_v60 = vstv %s3627_s26  ;;  %s5088_s26 = sld [smem:[#allocation6 + $0x10]] }
 0x232   : >> { %v2970_v51 = vsub.f32 %v2966_v17, %v2948_v26  ;;  %v4906_v26 = vstv %s3625_s14  ;;  %v2680_v53 = vadd.f32 %v4439_v22, %v2674_v54  ;;  %v1635_v17 = vand.u32 2147483647, %v1634_v63  ;;  %7118 = vst [vmem:[#allocation63_spill] sm:$0xff] %v4941_v60  ;;  %s5032_s14 = sld [smem:[#allocation6 + $0x12]] }
 0x233   : >> { %7112 = vst [vmem:[#allocation60_spill] sm:$0xff] %v4906_v26  ;;  %v3594_v54 = vmin.u32 %v2461_v52, %v4902_v45 }
 0x234   : >> { %v2976_v34 = vadd.f32 %v4895_v15, %v2970_v51  ;;  %v2684_v50 = vmul.f32 %v2680_v53, %v4876_v46  ;;  %v1638_v63 = vmul.f32 %v1637_v48, %v1635_v17 }
 0x235   : >> { %v2463_v7 = vclz %v3594_v54  ;;  %v4946_v54 = vmul.f32 0.5, %v4442_v31 }
 0x236   : >> { %v2980_v44 = vmul.f32 %v2976_v34, %v4430_v61  ;;  %v2688_v57 = vsub.f32 %v2684_v50, %v2666_v19  ;;  %v833_v19 = vadd.s32 1, %v3533_v36  ;;  %v1639_v0 = vxor.u32 2147483648, %v1638_v63 }
 0x237   : >> { %7119 = vst [vmem:[#allocation64_spill] sm:$0xff] %v4946_v54 }
 0x238   : >> { %v2984_v59 = vsub.f32 %v2980_v44, %v2962_v32  ;;  %v2046_v32 = vsel %vm3580_vm3, 0, %v3579_v55  ;;  %v4920_v44 = vstv %s3626_s25  ;;  %v2694_v23 = vadd.f32 %v4446_v37, %v2688_v57  ;;  %s5067_s25 = sld [smem:[#allocation6 + $0x11]] }
 0x239   : >> { %7113 = vst [vmem:[#allocation61_spill] sm:$0xff] %v4920_v44  ;;  %v7115_v55 = vand.u32 2147483647, %v4422_v35  ;;  %v2051_v50 = vsub.s32 4294967266, %v2046_v32  ;;  %vm834_vm6 = vcmp.gt.s32.totalorder %v833_v19, 0 }
 0x23a   : >> { %v2990_v2 = vadd.f32 %v4906_v26, %v2984_v59  ;;  %v3957_v59 = vld [vmem:[%s4340_s23 + $0x10] sm:$0xff]  ;;  %v2698_v14 = vmul.f32 %v2694_v23, %v4876_v46  ;;  %s4936_s23 = sld [smem:[#allocation6 + $0x16]]  ;;  %v835_v36 = vsel %vm834_vm6, %v833_v19, 0 }
 0x23b   : >> { %v4924_v1 = vmul.f32 0.002915452, %v3957_v59  ;;  %vm4928_vm5 = vcmp.le.f32.partialorder %v7115_v55, 0.7853982  ;;  %v2047_v55 = vsub.s32 32, %v2046_v32  ;;  %v2052_v37 = vadd.s32 127, %v2051_v50 }
 0x23c   : >> { %v2994_v51 = vmul.f32 %v2990_v2, %v4430_v61  ;;  %v1644_v52 = vsel %vm4928_vm5, 0, %v1642_v41  ;;  %v1640_v41 = vsel %vm1557_vm4, %v1639_v0, %v1638_v63  ;;  %v837_v19 = vand.u32 31, %v835_v36 }
 0x23d   : >> { %7114 = vst [vmem:[#allocation62_spill] sm:$0xff] %v4924_v1  ;;  %v2638_v57 = vmul.f32 %v4347_v21, %v4924_v1  ;;  %v1648_v59 = vadd.s32 3, %v1644_v52  ;;  %v2031_v21 = vadd.s32 %v4720_v42, %v4734_v47  ;;  %v1643_v63 = vsel %vm4928_vm5, %v4422_v35, %v1640_v41 }
 0x23e   : >> { %v2998_v22 = vsub.f32 %v2994_v51, %v2976_v34  ;;  %v2702_v34 = vsub.f32 %v2698_v14, %v2680_v53  ;;  %v3595_v14 = vadd.s32 4294967294, %v2463_v7  ;;  %v2053_v42 = vshll.u32 %v2052_v37, 23 }
 0x23f   : >> { %v4954_v50 = vadd.f32 %v4354_v27, %v2638_v57  ;;  %v2049_v0 = vshrl.u32 %v2031_v21, %v2047_v55  ;;  %v2061_v47 = vsub.s32 4, %v4846_v40  ;;  %v4963_v52 = vand.u32 3, %v1648_v59 }
 0x240   : >> { %v3004_v48 = vadd.f32 %v4920_v44, %v2998_v22  ;;  %v2708_v53 = vadd.f32 %v4454_v30, %v2702_v34  ;;  %v1350_v27 = vand.u32 2139095040, %v4946_v54  ;;  %v2048_v57 = vshll.u32 %v4872_v11, %v2046_v32 }
 0x241   : >> { %7120 = vst [vmem:[#allocation65_spill] sm:$0xff] %v4954_v50  ;;  %vm3596_vm8 = vcmp.lt.s32.totalorder %v3595_v14, 0  ;;  %3885 = vcosq.f32 %v1643_v63  ;;  %v6934_v55 = vand.u32 2147483647, %v4900_v10  ;;  %v4975_v41 = vor.u32 4788187, %v2053_v42 }
 0x242   : >> { %v3008_v51 = vmul.f32 %v3004_v48, %v4430_v61  ;;  %v2712_v31 = vmul.f32 %v2708_v53, %v4876_v46  ;;  %3887 = vsinq.f32 %v1643_v63  ;;  %v4973_v59 = vor.u32 %v2049_v0, %v2048_v57 }
 0x243   : >> { %v4980_v11 = vsel %vm1977_vm7, %v2061_v47, %v4846_v40  ;;  %v4982_v32 = vsel %vm3596_vm8, 0, %v3595_v14  ;;  %v830_v14 = vand.u32 8388607, %v6934_v55  ;;  %v843_v57 = vshll.u32 %v7096_v8, %v837_v19 }
 0x244   : >> { %v3012_v22 = vsub.f32 %v3008_v51, %v2990_v2  ;;  %v2716_v34 = vsub.f32 %v2712_v31, %v2694_v23  ;;  %v4969_v51 = vstv %s4936_s23  ;;  %v4987_v31 = vstv %s4951_s8  ;;  %s5130_s23 = sld [smem:[#allocation6 + $0xf]]  ;;  %s5160_s8 = sld [smem:[#allocation6 + $0xe]] }
 0x245   : >> { %7121 = vst [vmem:[#allocation66_spill] sm:$0xff] %v4969_v51  ;;  %7122 = vst [vmem:[#allocation67_spill] sm:$0xff] %v4987_v31  ;;  %v852_v50 = vshll.u32 %v7088_v3, %v837_v19  ;;  %v7123_v1 = vand.u32 2147483647, %v4451_v43  ;;  %vm1651_vm14 = vcmp.eq.s32.totalorder %v4963_v52, 0  ;;  %vm1650_vm0 = vcmp.lt.s32.totalorder %v4963_v52, 2 }
 0x246   : >> { %v3018_v2 = vadd.f32 %v4941_v60, %v3012_v22  ;;  %v838_v22 = vsub.s32 32, %v837_v19  ;;  %v2722_v37 = vadd.f32 %v4473_v18, %v2716_v34  ;;  %v836_v34 = vshrl.u32 %v835_v36, 5 }
 0x247   : >> { %v846_v60 = vshll.u32 %v7097_v9, %v837_v19  ;;  %vm5007_vm9 = vcmp.le.f32.partialorder %v7123_v1, 0.7853982  ;;  %vm1654_vm2 = vcmp.eq.s32.totalorder %v4963_v52, 2 }
 0x248   : >> { %v3022_v7 = vmul.f32 %v3018_v2, %v4430_v61  ;;  %v2726_v21 = vmul.f32 %v2722_v37, %v4876_v46  ;;  %v841_v63 = vshrl.u32 %v7096_v8, %v838_v22  ;;  %v844_v0 = vshrl.u32 %v7097_v9, %v838_v22 }
 0x249   : >> { %v850_v42 = vshrl.u32 %v7088_v3, %v838_v22  ;;  %v847_v47 = vshrl.u32 %v7087_v49, %v838_v22  ;;  %v853_v55 = vshrl.u32 %v7089_v38, %v838_v22  ;;  %vm855_vm10 = vcmp.lt.s32.totalorder %v836_v34, 1 }
 0x24a   : >> { %v3026_v17 = vsub.f32 %v3022_v7, %v3004_v48  ;;  %v1351_v48 = vshrl.u32 %v1350_v27, 23  ;;  %v2730_v40 = vsub.f32 %v2726_v21, %v2708_v53  ;;  %v840_v27 = vshll.u32 %v7085_v20, %v837_v19 }
 0x24b   : >> { %v845_v53 = vor.u32 %v844_v0, %v843_v57  ;;  %v848_v15 = vor.u32 %v847_v47, %v846_v60  ;;  %v839_v0 = vshrl.u32 %v7085_v20, %v838_v22  ;;  %vm858_vm11 = vcmp.lt.s32.totalorder %v836_v34, 4 }
 0x24c   : >> { %v3032_v23 = vadd.f32 %v4969_v51, %v3026_v17  ;;  %v849_v17 = vshll.u32 %v7087_v49, %v837_v19  ;;  %v3553_v30 = vadd.s32 4294967169, %v1351_v48  ;;  %v2736_v51 = vadd.f32 %v4507_v28, %v2730_v40 }
 0x24d   : >> { %v842_v44 = vor.u32 %v841_v63, %v840_v27  ;;  %v5011_v48 = vstv %s3630_s9  ;;  %v831_v63 = vor.u32 8388608, %v830_v14  ;;  %v854_v19 = vor.u32 %v853_v55, %v852_v50  ;;  %s5188_s9 = sld [smem:[#allocation6 + $0xd]] }
 0x24e   : >> { %v3036_v7 = vmul.f32 %v3032_v23, %v4430_v61  ;;  %v851_v21 = vor.u32 %v850_v42, %v849_v17  ;;  %v2740_v36 = vmul.f32 %v2736_v51, %v4876_v46  ;;  %7126 = vst [vmem:[#allocation68_spill] sm:$0xff] %v5011_v48  ;;  %vm856_vm12 = vcmp.lt.s32.totalorder %v836_v34, 2 }
 0x24f   : >> { %vm857_vm13 = vcmp.lt.s32.totalorder %v836_v34, 3  ;;  %v863_v1 = vsel %vm855_vm10, %v842_v44, %v845_v53  ;;  %v860_v22 = vsel %vm858_vm11, %v848_v15, 2102212464  ;;  %v1357_v57 = vadd.s32 1, %v3553_v30 }
 0x250   : >> { %v3040_v18 = vsub.f32 %v3036_v7, %v3018_v2  ;;  %v2744_v42 = vsub.f32 %v2740_v36, %v2722_v37  ;;  %v864_v40 = vsel %vm858_vm11, %v851_v21, 920167782  ;;  %v867_v50 = vsel %vm855_vm10, %v845_v53, %v848_v15 }
 0x251   : >> { %v865_v27 = vsel %vm857_vm13, %v848_v15, %v864_v40  ;;  %v871_v55 = vshll.u32 %v831_v63, 8  ;;  %v859_v28 = vsel %vm855_vm10, %v839_v0, %v842_v44  ;;  %v2471_v15 = vsub.s32 4294967266, %v4982_v32 }
 0x252   : >> { %v3046_v26 = vadd.f32 %v4987_v31, %v3040_v18  ;;  %v5016_v18 = vpop.eup %3885  ;;  %v2750_v14 = vadd.f32 %v4523_v56, %v2744_v42  ;;  %v866_v37 = vsel %vm856_vm12, %v863_v1, %v865_v27  ;;  %v2055_v44 = vand.u32 2147483647, %v4975_v41 }
 0x253   : >> { %v5019_v7 = vpop.eup %3887  ;;  %v5036_v42 = vmul.u32.u64.low %v871_v55, %v866_v37  ;;  %v5037_v1 = vmul.u32.u64.high %v871_v55, %v866_v37, %v5036_v42  ;;  %v5046_v0 = vstv %s5013_s11  ;;  %v1655_v37 = vxor.u32 2147483648, %v5016_v18  ;;  %s5230_s11 = sld [smem:[#allocation6 + $0xc]] }
 0x254   : >> { %v3050_v60 = vmul.f32 %v3046_v26, %v4430_v61  ;;  %v2754_v36 = vmul.f32 %v2750_v14, %v4876_v46  ;;  %7127 = vst [vmem:[#allocation69_spill] sm:$0xff] %v5046_v0  ;;  %vm1358_vm15 = vcmp.gt.s32.totalorder %v1357_v57, 0  ;;  %vm1647_vm10 = vweird.f32 %v4422_v35 }
 0x255   : >> { %v881_v41 = vadd.s32 1, %v5037_v1 }
 0x256   : >> { %v3054_v47 = vsub.f32 %v3050_v60, %v3032_v23  ;;  %v868_v23 = vsel %vm858_vm11, %v854_v19, 1326507024  ;;  %v861_v60 = vsel %vm857_vm13, %v845_v53, %v860_v22  ;;  %v2758_v40 = vsub.f32 %v2754_v36, %v2736_v51 }
 0x257   : >> { %v869_v30 = vsel %vm857_vm13, %v851_v21, %v868_v23  ;;  %v2064_v21 = vsel %vm5007_vm9, 0, %v4980_v11  ;;  %v862_v51 = vsel %vm856_vm12, %v859_v28, %v861_v60  ;;  %v2472_v36 = vadd.s32 127, %v2471_v15 }
 0x258   : >> { %v3060_v17 = vadd.f32 %v5011_v48, %v3054_v47  ;;  %v870_v47 = vsel %vm856_vm12, %v867_v50, %v869_v30  ;;  %v2764_v27 = vadd.f32 %v4554_v25, %v2758_v40  ;;  %v2057_v50 = vcvt.s32.f32 %v4973_v59 }
 0x259   : >> { %v5048_v53 = vmul.u32.u64.low %v871_v55, %v870_v47  ;;  %v5049_v19 = vmul.u32.u64.high %v871_v55, %v870_v47, %v5048_v53  ;;  %v1652_v28 = vxor.u32 2147483648, %v5019_v7  ;;  %v878_v59 = vmul.u32 %v871_v55, %v862_v51 }
 0x25a   : >> { %v3064_v63 = vmul.f32 %v3060_v17, %v4430_v61  ;;  %v2768_v30 = vmul.f32 %v2764_v27, %v4876_v46  ;;  %v2058_v11 = vmul.f32 %v2057_v50, %v2055_v44  ;;  %v1359_v60 = vsel %vm1358_vm15, %v1357_v57, 0 }
 0x25b   : >> { %vm880_vm1 = vc.u32 %v5049_v19, %v5036_v42  ;;  %v6942_v40 = vand.u32 2147483647, %v4946_v54  ;;  %v2473_v44 = vshll.u32 %v2472_v36, 23  ;;  %v2451_v57 = vadd.s32 %v4829_v16, %v4836_v58 }
 0x25c   : >> { %v3068_v22 = vsub.f32 %v3064_v63, %v3046_v26  ;;  %v5063_v26 = vadd.f32 %v4866_v4, %v4862_v62  ;;  %v2772_v15 = vsub.f32 %v2768_v30, %v2750_v14  ;;  %v882_v63 = vsel %vm880_vm1, %v881_v41, %v5037_v1 }
 0x25d   : >> { %v2467_v62 = vsub.s32 32, %v4982_v32  ;;  %v5075_v4 = vstv %s5032_s14  ;;  %v883_v47 = vadd.s32 %v882_v63, %v878_v59  ;;  %v1361_v14 = vand.u32 31, %v1359_v60  ;;  %s5261_s14 = sld [smem:[#allocation6 + $0xb]] }
 0x25e   : >> { %v3074_v23 = vadd.f32 %v5046_v0, %v3068_v22  ;;  %7128 = vst [vmem:[#allocation70_spill] sm:$0xff] %v5075_v4  ;;  %v2778_v53 = vadd.f32 %v4591_v6, %v2772_v15  ;;  %v2068_v22 = vadd.s32 3, %v2064_v21  ;;  %v1653_v51 = vsel %vm1651_vm14, %v5016_v18, %v1652_v28 }
 0x25f   : >> { %v884_v1 = vadd.s32 536870912, %v883_v47  ;;  %v1656_v50 = vsel %vm1654_vm2, %v1655_v37, %v5019_v7  ;;  %v2469_v30 = vshrl.u32 %v2451_v57, %v2467_v62  ;;  %v5092_v16 = vand.u32 8388607, %v6942_v40 }
 0x260   : >> { %v3078_v34 = vmul.f32 %v3074_v23, %v4430_v61  ;;  %v2782_v36 = vmul.f32 %v2778_v53, %v4876_v46  ;;  %v5096_v21 = vor.u32 4788187, %v2473_v44  ;;  %v5100_v7 = vmul.f32 50.0, %v4946_v54 }
 0x261   : >> { %v5094_v58 = vshrl.u32 %v884_v1, 30  ;;  %v2468_v28 = vshll.u32 %v4902_v45, %v4982_v32  ;;  %v5105_v59 = vstv %s5067_s25  ;;  %v5112_v63 = vsel %vm1650_vm0, %v1653_v51, %v1656_v50  ;;  %s5300_s25 = sld [smem:[#allocation6 + $0xa]] }
 0x262   : >> { %v3082_v55 = vsub.f32 %v3078_v34, %v3060_v17  ;;  %v2059_v17 = vxor.u32 2147483648, %v2058_v11  ;;  %7129 = vst [vmem:[#allocation71_spill] sm:$0xff] %v5100_v7  ;;  %v2786_v37 = vsub.f32 %v2782_v36, %v2764_v27  ;;  %7130 = vst [vmem:[#allocation72_spill] sm:$0xff] %v5105_v59  ;;  %v5107_v34 = vsub.s32 32, %v1361_v14 }
 0x263   : >> { %v886_v15 = vshll.u32 %v5094_v58, 30  ;;  %v5114_v62 = vand.u32 3, %v2068_v22  ;;  %v5121_v45 = vor.u32 %v2469_v30, %v2468_v28  ;;  %v5132_v51 = vshrl.u32 %v1359_v60, 5 }
 0x264   : >> { %v3088_v41 = vadd.f32 %v5075_v4, %v3082_v55  ;;  %v2792_v55 = vadd.f32 %v4609_v39, %v2786_v37  ;;  %v5119_v27 = vsel %vm1977_vm7, %v2059_v17, %v2058_v11  ;;  %v1374_v11 = vshrl.u32 %v7088_v3, %v5107_v34 }
 0x265   : >> { %v5124_v57 = vsub.s32 %v883_v47, %v886_v15  ;;  %v1770_v50 = vand.u32 2139095040, %v5100_v7  ;;  %v1365_v17 = vshrl.u32 %v7096_v8, %v5107_v34  ;;  %v1373_v30 = vshll.u32 %v7087_v49, %v1361_v14 }
 0x266   : >> { %v3092_v18 = vmul.f32 %v3088_v41, %v4430_v61  ;;  %v5143_v37 = vstv %s5088_s26  ;;  %v1368_v60 = vshrl.u32 %v7097_v9, %v5107_v34  ;;  %v1377_v28 = vshrl.u32 %v7089_v38, %v5107_v34  ;;  %s5324_s26 = sld [smem:[#allocation6 + $0x9]] }
 0x267   : >> { %v889_v47 = vsub.s32 0, %v5124_v57  ;;  %7131 = vst [vmem:[#allocation73_spill] sm:$0xff] %v5143_v37  ;;  %v1364_v40 = vshll.u32 %v7085_v20, %v1361_v14  ;;  %v1371_v52 = vshrl.u32 %v7087_v49, %v5107_v34  ;;  %v1376_v32 = vshll.u32 %v7088_v3, %v1361_v14 }
 0x268   : >> { %v3096_v44 = vsub.f32 %v3092_v18, %v3074_v23  ;;  %v2796_v23 = vmul.f32 %v2792_v55, %v4876_v46  ;;  %vm1382_vm4 = vcmp.lt.s32.totalorder %v5132_v51, 4  ;;  %vm1379_vm5 = vcmp.lt.s32.totalorder %v5132_v51, 1 }
 0x269   : >> { %v3534_v15 = vmin.u32 %v889_v47, %v5124_v57  ;;  %v1771_v47 = vshrl.u32 %v1770_v50, 23  ;;  %v5162_v25 = vor.u32 %v1365_v17, %v1364_v40  ;;  %vm1381_vm7 = vcmp.lt.s32.totalorder %v5132_v51, 3  ;;  %v7134_v17 = vld [vmem:[#allocation47_spill] sm:$0xff] }
 0x26a   : >> { %v3102_v1 = vadd.f32 %v5105_v59, %v3096_v44  ;;  %v2800_v18 = vsub.f32 %v2796_v23, %v2778_v53  ;;  %v1367_v53 = vshll.u32 %v7096_v8, %v1361_v14  ;;  %v1375_v23 = vor.u32 %v1374_v11, %v1373_v30 }
 0x26b   : >> { %v891_v39 = vclz %v3534_v15  ;;  %v1370_v59 = vshll.u32 %v7097_v9, %v1361_v14  ;;  %v1378_v11 = vor.u32 %v1377_v28, %v1376_v32  ;;  %v5169_v14 = vstv %s5130_s23  ;;  %s5351_s23 = sld [smem:[#allocation6 + $0x8]] }
 0x26c   : >> { %v3106_v36 = vmul.f32 %v3102_v1, %v4430_v61  ;;  %v2806_v22 = vadd.f32 %v4630_v24, %v2800_v18  ;;  %v5164_v18 = vor.u32 %v1368_v60, %v1367_v53  ;;  %v1388_v50 = vsel %vm1382_vm4, %v1375_v23, 920167782 }
 0x26d   : >> { %v3535_v30 = vadd.s32 4294967294, %v891_v39  ;;  %v1372_v15 = vor.u32 %v1371_v52, %v1370_v59  ;;  %v1392_v59 = vsel %vm1382_vm4, %v1378_v11, 1326507024  ;;  %vm1380_vm8 = vcmp.lt.s32.totalorder %v5132_v51, 2 }
 0x26e   : >> { %v3110_v44 = vsub.f32 %v3106_v36, %v3088_v41  ;;  %v2810_v41 = vmul.f32 %v2806_v22, %v4876_v46  ;;  %v7132_v36 = vld [vmem:[#allocation44_spill] sm:$0xff]  ;;  %vm825_vm12 = vcmp.lt.s32.totalorder %v4900_v10, 0  ;;  %v2063_v51 = vsel %vm5007_vm9, %v4451_v43, %v5119_v27 }
 0x26f   : >> { %vm2397_vm3 = vcmp.lt.s32.totalorder %v7132_v36, 0  ;;  %7133 = vst [vmem:[#allocation44_spill] sm:$0xff] %v5169_v14  ;;  %vm3536_vm6 = vcmp.lt.s32.totalorder %v3535_v30, 0 }
 0x270   : >> { %v3116_v6 = vadd.f32 %v5143_v37, %v3110_v44  ;;  %v2814_v44 = vsub.f32 %v2810_v41, %v2792_v55  ;;  %v894_v39 = vsel %vm3536_vm6, 0, %v3535_v30  ;;  %v879_v55 = vadd.s32 %v5036_v42, %v5049_v19 }
 0x271   : >> { %v895_v52 = vsub.s32 32, %v894_v39  ;;  %v899_v60 = vsub.s32 4294967266, %v894_v39  ;;  %v896_v42 = vshll.u32 %v5124_v57, %v894_v39  ;;  %v1391_v30 = vsel %vm1379_vm5, %v5164_v18, %v1372_v15 }
 0x272   : >> { %v3120_v24 = vmul.f32 %v3116_v6, %v4430_v61  ;;  %v2820_v32 = vadd.f32 %v7134_v17, %v2814_v44  ;;  %v1393_v44 = vsel %vm1381_vm7, %v1375_v23, %v1392_v59  ;;  %v7136_v57 = vsub.s32 4, %v4886_v5 }
 0x273   : >> { %v897_v19 = vshrl.u32 %v879_v55, %v895_v52  ;;  %v900_v41 = vadd.s32 127, %v899_v60  ;;  %v7137_v52 = vor.u32 8388608, %v5092_v16  ;;  %v2477_v59 = vcvt.s32.f32 %v5121_v45 }
 0x274   : >> { %v3124_v40 = vsub.f32 %v3120_v24, %v3102_v1  ;;  %v1387_v24 = vsel %vm1379_vm5, %v5162_v25, %v5164_v18  ;;  %v1389_v1 = vsel %vm1381_vm7, %v1372_v15, %v1388_v50  ;;  %v2824_v53 = vmul.f32 %v2820_v32, %v4876_v46 }
 0x275   : >> { %v1390_v17 = vsel %vm1380_vm8, %v1387_v24, %v1389_v1  ;;  %v901_v37 = vshll.u32 %v900_v41, 23  ;;  %v5208_v39 = vsel %vm2397_vm3, %v7136_v57, %v4886_v5  ;;  %v5212_v60 = vshll.u32 %v7137_v52, 8 }
 0x276   : >> { %v3130_v28 = vadd.f32 %v5169_v14, %v3124_v40  ;;  %v2828_v50 = vsub.f32 %v2824_v53, %v2806_v22  ;;  %v5199_v40 = vstv %s5160_s8  ;;  %v898_v14 = vor.u32 %v897_v19, %v896_v42  ;;  %v7138_v22 = vld [vmem:[#allocation48_spill] sm:$0xff]  ;;  %s5395_s8 = sld [smem:[#allocation6 + $0x7]] }
 0x277   : >> { %7135 = vst [vmem:[#allocation74_spill] sm:$0xff] %v5199_v40  ;;  %v1394_v24 = vsel %vm1380_vm8, %v1391_v30, %v1393_v44  ;;  %v5219_v1 = vmul.f32 51.0, %v4946_v54  ;;  %v902_v53 = vor.u32 4788187, %v901_v37  ;;  %v7140_v19 = vand.u32 2147483647, %v5096_v21 }
 0x278   : >> { %v3134_v11 = vmul.f32 %v3130_v28, %v4430_v61  ;;  %v2834_v23 = vadd.f32 %v7138_v22, %v2828_v50  ;;  %v3569_v45 = vadd.s32 4294967169, %v1771_v47  ;;  %v905_v30 = vcvt.s32.f32 %v898_v14 }
 0x279   : >> { %7139 = vst [vmem:[#allocation75_spill] sm:$0xff] %v5219_v1  ;;  %v2478_v41 = vmul.f32 %v2477_v59, %v7140_v19  ;;  %v5234_v37 = vmul.u32.u64.low %v5212_v60, %v1394_v24  ;;  %v5235_v50 = vmul.u32.u64.high %v5212_v60, %v1394_v24, %v5234_v37  ;;  %v909_v21 = vsub.s32 4, %v5094_v58 }
 0x27a   : >> { %v3138_v55 = vsub.f32 %v3134_v11, %v3116_v6  ;;  %v5223_v6 = vmul.u32.u64.low %v5212_v60, %v1390_v17  ;;  %v5224_v42 = vmul.u32.u64.high %v5212_v60, %v1390_v17, %v5223_v6  ;;  %v2838_v16 = vmul.f32 %v2834_v23, %v4876_v46 }
 0x27b   : >> { %v903_v11 = vand.u32 2147483647, %v902_v53  ;;  %v5238_v17 = vstv %s5188_s9  ;;  %v7142_v47 = vand.u32 2147483647, %v7132_v36  ;;  %v2190_v24 = vand.u32 2139095040, %v5219_v1  ;;  %v7145_v53 = vld [vmem:[#allocation49_spill] sm:$0xff] }
 0x27c   : >> { %v3144_v5 = vadd.f32 %v5199_v40, %v3138_v55  ;;  %v2842_v57 = vsub.f32 %v2838_v16, %v2820_v32  ;;  %7141 = vst [vmem:[#allocation76_spill] sm:$0xff] %v5238_v17  ;;  %v1363_v55 = vshrl.u32 %v7085_v20, %v5107_v34  ;;  %v1384_v32 = vsel %vm1382_vm4, %v1372_v15, 2102212464  ;;  %s5436_s9 = sld [smem:[#allocation6 + $0x6]] }
 0x27d   : >> { %v906_v52 = vmul.f32 %v905_v30, %v903_v11  ;;  %vm5246_vm11 = vcmp.le.f32.partialorder %v7142_v47, 0.7853982  ;;  %v2479_v34 = vxor.u32 2147483648, %v2478_v41  ;;  %v1777_v11 = vadd.s32 1, %v3569_v45 }
 0x27e   : >> { %v3148_v44 = vmul.f32 %v3144_v5, %v4430_v61  ;;  %v2848_v16 = vadd.f32 %v7145_v53, %v2842_v57  ;;  %v1383_v47 = vsel %vm1379_vm5, %v1363_v55, %v5162_v25  ;;  %v1385_v15 = vsel %vm1381_vm7, %v5164_v18, %v1384_v32  ;;  %v7148_v18 = vld [vmem:[#allocation50_spill] sm:$0xff] }
 0x27f   : >> { %v907_v30 = vxor.u32 2147483648, %v906_v52  ;;  %v910_v57 = vsel %vm825_vm12, %v909_v21, %v5094_v58  ;;  %v2191_v19 = vshrl.u32 %v2190_v24, 23  ;;  %v5272_v53 = vstv %s5230_s11  ;;  %s5471_s11 = sld [smem:[#allocation6 + $0x5]] }
 0x280   : >> { %v3152_v59 = vsub.f32 %v3148_v44, %v3130_v28  ;;  %v2852_v28 = vmul.f32 %v2848_v16, %v4876_v46  ;;  %v7146_v44 = vand.u32 2147483647, %v4900_v10  ;;  %7147 = vst [vmem:[#allocation77_spill] sm:$0xff] %v5272_v53  ;;  %v1405_v22 = vadd.s32 1, %v5224_v42 }
 0x281   : >> { %v908_v45 = vsel %vm825_vm12, %v907_v30, %v906_v52  ;;  %vm1778_vm14 = vcmp.gt.s32.totalorder %v1777_v11, 0  ;;  %v2480_v58 = vsel %vm2397_vm3, %v2479_v34, %v2478_v41  ;;  %vm1404_vm15 = vc.u32 %v5235_v50, %v5223_v6 }
 0x282   : >> { %v3158_v37 = vadd.f32 %v5238_v17, %v3152_v59  ;;  %vm824_vm13 = vcmp.le.f32.partialorder %v7146_v44, 0.7853982  ;;  %v2856_v25 = vsub.f32 %v2852_v28, %v2834_v23  ;;  %v1386_v23 = vsel %vm1380_vm8, %v1383_v47, %v1385_v15 }
 0x283   : >> { %v911_v55 = vsel %vm824_vm13, %v4900_v10, %v908_v45  ;;  %v5276_v40 = vsel %vm824_vm13, 0, %v910_v57  ;;  %v7149_v52 = vand.u32 2147483647, %v5100_v7  ;;  %v1779_v24 = vsel %vm1778_vm14, %v1777_v11, 0  ;;  %v7151_v45 = vld [vmem:[#allocation51_spill] sm:$0xff] }
 0x284   : >> { %v3162_v59 = vmul.f32 %v3158_v37, %v4430_v61  ;;  %3889 = vcosq.f32 %v911_v55  ;;  %v2862_v32 = vadd.f32 %v7148_v18, %v2856_v25  ;;  %v3585_v30 = vadd.s32 4294967169, %v2191_v19 }
 0x285   : >> { %3891 = vsinq.f32 %v911_v55  ;;  %v1774_v21 = vand.u32 8388607, %v7149_v52  ;;  %v5291_v41 = vsel %vm1647_vm10, nan, %v5112_v63  ;;  %v2484_v34 = vsel %vm5246_vm11, 0, %v5208_v39 }
 0x286   : >> { %v3166_v17 = vsub.f32 %v3162_v59, %v3144_v5  ;;  %v2866_v28 = vmul.f32 %v2862_v32, %v4876_v46  ;;  %v2483_v19 = vsel %vm5246_vm11, %v7132_v36, %v2480_v58  ;;  %v1406_v63 = vsel %vm1404_vm15, %v1405_v22, %v5224_v42 }
 0x287   : >> { %v5309_v47 = vstv %s5261_s14  ;;  %v1402_v2 = vmul.u32 %v5212_v60, %v1386_v23  ;;  %v1775_v27 = vor.u32 8388608, %v1774_v21  ;;  %v5312_v15 = vand.u32 31, %v1779_v24  ;;  %s5513_s14 = sld [smem:[#allocation6 + $0x4]] }
 0x288   : >> { %v3172_v5 = vadd.f32 %v5272_v53, %v3166_v17  ;;  %v916_v17 = vadd.s32 3, %v5276_v40  ;;  %v2870_v11 = vsub.f32 %v2866_v28, %v2848_v16  ;;  %7150 = vst [vmem:[#allocation78_spill] sm:$0xff] %v5309_v47  ;;  %3893 = vcosq.f32 %v2063_v51 }
 0x289   : >> { %v2197_v44 = vadd.s32 1, %v3585_v30  ;;  %3895 = vsinq.f32 %v2063_v51  ;;  %v5316_v59 = vadd.s32 %v1406_v63, %v1402_v2  ;;  %v5318_v22 = vadd.s32 3, %v2484_v34 }
 0x28a   : >> { %v3176_v35 = vmul.f32 %v3172_v5, %v4430_v61  ;;  %v2876_v57 = vadd.f32 %v7151_v45, %v2870_v11  ;;  %v917_v25 = vand.u32 3, %v916_v17  ;;  %3897 = vcosq.f32 %v2483_v19  ;;  %v7153_v17 = vld [vmem:[#allocation52_spill] sm:$0xff] }
 0x28b   : >> { %3899 = vsinq.f32 %v2483_v19  ;;  %v1782_v55 = vsub.s32 32, %v5312_v15  ;;  %v5329_v58 = vshll.u32 %v1775_v27, 8  ;;  %vm2198_vm9 = vcmp.gt.s32.totalorder %v2197_v44, 0 }
 0x28c   : >> { %v3180_v39 = vsub.f32 %v3176_v35, %v3158_v37  ;;  %v2880_v42 = vmul.f32 %v2876_v57, %v4876_v46  ;;  %v5326_v37 = vshrl.u32 %v1779_v24, 5  ;;  %v5336_v28 = vstv %s5300_s25  ;;  %s5566_s25 = sld [smem:[#allocation6 + $0x3]] }
 0x28d   : >> { %7152 = vst [vmem:[#allocation79_spill] sm:$0xff] %v5336_v28  ;;  %v1408_v51 = vadd.s32 536870912, %v5316_v59  ;;  %vm922_vm0 = vcmp.eq.s32.totalorder %v917_v25, 2  ;;  %vm919_vm1 = vcmp.eq.s32.totalorder %v917_v25, 0  ;;  %v1794_v63 = vshrl.u32 %v7088_v3, %v1782_v55 }
 0x28e   : >> { %v3186_v60 = vadd.f32 %v5309_v47, %v3180_v39  ;;  %v5322_v16 = vpop.eup %3889  ;;  %v2884_v21 = vsub.f32 %v2880_v42, %v2862_v32  ;;  %v2199_v32 = vsel %vm2198_vm9, %v2197_v44, 0  ;;  %vm918_vm2 = vcmp.lt.s32.totalorder %v917_v25, 2 }
 0x28f   : >> { %v5331_v23 = vpop.eup %3891  ;;  %v6961_v30 = vxor.u32 2147483648, %v5322_v16  ;;  %vm915_vm3 = vweird.f32 %v4900_v10  ;;  %v5353_v39 = vshrl.u32 %v1408_v51, 30  ;;  %v1785_v42 = vshrl.u32 %v7096_v8, %v1782_v55 }
 0x290   : >> { %v3190_v52 = vmul.f32 %v3186_v60, %v4430_v61  ;;  %v6962_v34 = vxor.u32 2147483648, %v5331_v23  ;;  %v2890_v19 = vadd.f32 %v7153_v17, %v2884_v21  ;;  %v1793_v44 = vshll.u32 %v7087_v49, %v5312_v15 }
 0x291   : >> { %v924_v35 = vsel %vm922_vm0, %v6961_v30, %v5331_v23  ;;  %7154 = vst [vmem:[#allocation80_spill] sm:$0xff] %v5353_v39  ;;  %v5369_v51 = vstv %s5324_s26  ;;  %v1784_v30 = vshll.u32 %v7085_v20, %v5312_v15  ;;  %v1787_v45 = vshll.u32 %v7096_v8, %v5312_v15  ;;  %s5608_s26 = sld [smem:[#allocation6 + $0x2]] }
 0x292   : >> { %v3194_v24 = vsub.f32 %v3190_v52, %v3172_v5  ;;  %v921_v11 = vsel %vm919_vm1, %v5322_v16, %v6962_v34  ;;  %v2894_v5 = vmul.f32 %v2890_v19, %v4876_v46  ;;  %v5362_v52 = vpop.eup %3893  ;;  %7156 = vst [vmem:[#allocation82_spill] sm:$0xff] %v5369_v51  ;;  %v1791_v34 = vshrl.u32 %v7087_v49, %v1782_v55 }
 0x293   : >> { %v925_v27 = vsel %vm918_vm2, %v921_v11, %v924_v35  ;;  %v2201_v35 = vand.u32 31, %v2199_v32  ;;  %v5366_v14 = vpop.eup %3895  ;;  %v1410_v18 = vshll.u32 %v5353_v39, 30  ;;  %v5383_v47 = vor.u32 %v1785_v42, %v1784_v30 }
 0x294   : >> { %v3200_v2 = vadd.f32 %v5336_v28, %v3194_v24  ;;  %v5360_v25 = vsel %vm915_vm3, nan, %v925_v27  ;;  %v1788_v24 = vshrl.u32 %v7097_v9, %v1782_v55  ;;  %v2898_v11 = vsub.f32 %v2894_v5, %v2876_v57 }
 0x295   : >> { %7155 = vst [vmem:[#allocation81_spill] sm:$0xff] %v5360_v25  ;;  %v1797_v27 = vshrl.u32 %v7089_v38, %v1782_v55  ;;  %v5375_v25 = vpop.eup %3897  ;;  %v1795_v28 = vor.u32 %v1794_v63, %v1793_v44  ;;  %v1790_v53 = vshll.u32 %v7097_v9, %v5312_v15  ;;  %v1796_v7 = vshll.u32 %v7088_v3, %v5312_v15 }
 0x296   : >> { %v3204_v21 = vmul.f32 %v3200_v2, %v4430_v61  ;;  %v2904_v57 = vadd.f32 %v4820_v29, %v2898_v11  ;;  %v5380_v5 = vpop.eup %3899  ;;  %v5392_v63 = vsub.s32 32, %v2201_v35  ;;  %vm1802_vm4 = vcmp.lt.s32.totalorder %v5326_v37, 4 }
 0x297   : >> { %v5397_v11 = vor.u32 %v1791_v34, %v1790_v53  ;;  %v1798_v30 = vor.u32 %v1797_v27, %v1796_v7  ;;  %v6975_v42 = vand.u32 2147483647, %v5219_v1  ;;  %v5403_v15 = vshrl.u32 %v7085_v20, %v1782_v55 }
 0x298   : >> { %v3208_v17 = vsub.f32 %v3204_v21, %v3186_v60  ;;  %v5390_v21 = vor.u32 %v1788_v24, %v1787_v45  ;;  %v2908_v44 = vmul.f32 %v2904_v57, %v4876_v46  ;;  %v1808_v45 = vsel %vm1802_vm4, %v1795_v28, 920167782 }
 0x299   : >> { %v5408_v24 = vstv %s5351_s23  ;;  %vm1799_vm5 = vcmp.lt.s32.totalorder %v5326_v37, 1  ;;  %vm1801_vm6 = vcmp.lt.s32.totalorder %v5326_v37, 3  ;;  %v2214_v55 = vshrl.u32 %v7088_v3, %v5392_v63  ;;  %s5642_s23 = sld [smem:[#allocation6 + $0x1]] }
 0x29a   : >> { %v3214_v60 = vadd.f32 %v5369_v51, %v3208_v17  ;;  %v2912_v17 = vsub.f32 %v2908_v44, %v2890_v19  ;;  %7157 = vst [vmem:[#allocation83_spill] sm:$0xff] %v5408_v24  ;;  %v5411_v51 = vsub.s32 %v5316_v59, %v1410_v18  ;;  %v1807_v53 = vsel %vm1799_vm5, %v5383_v47, %v5390_v21 }
 0x29b   : >> { %v1809_v18 = vsel %vm1801_vm6, %v5397_v11, %v1808_v45  ;;  %v1812_v59 = vsel %vm1802_vm4, %v1798_v30, 1326507024  ;;  %v2217_v19 = vshrl.u32 %v7089_v38, %v5392_v63  ;;  %v5432_v27 = vshrl.u32 %v2199_v32, 5 }
 0x29c   : >> { %v3218_v29 = vmul.f32 %v3214_v60, %v4430_v61  ;;  %v2918_v34 = vadd.f32 %v4839_v13, %v2912_v17  ;;  %v2213_v44 = vshll.u32 %v7087_v49, %v2201_v35  ;;  %v2205_v30 = vshrl.u32 %v7096_v8, %v5392_v63 }
 0x29d   : >> { %v2208_v45 = vshrl.u32 %v7097_v9, %v5392_v63  ;;  %v2216_v13 = vshll.u32 %v7088_v3, %v2201_v35  ;;  %v5448_v54 = vstv %s5395_s8  ;;  %v2207_v39 = vshll.u32 %v7096_v8, %v2201_v35  ;;  %s3336_s8 = sld [smem:[#allocation6]] }
 0x29e   : >> { %v3222_v7 = vsub.f32 %v3218_v29, %v3200_v2  ;;  %v2194_v29 = vand.u32 8388607, %v6975_v42  ;;  %v2922_v17 = vmul.f32 %v2918_v34, %v4876_v46  ;;  %v2211_v42 = vshrl.u32 %v7087_v49, %v5392_v63  ;;  %7158 = vst [vmem:[#allocation84_spill] sm:$0xff] %v5448_v54 }
 0x29f   : >> { %v2210_v4 = vshll.u32 %v7097_v9, %v2201_v35  ;;  %v2218_v56 = vor.u32 %v2217_v19, %v2216_v13  ;;  %v1811_v38 = vsel %vm1799_vm5, %v5390_v21, %v5397_v11  ;;  %v1813_v3 = vsel %vm1801_vm6, %v1795_v28, %v1812_v59 }
 0x2a0   : >> { %v3228_v2 = vadd.f32 %v5408_v24, %v3222_v7  ;;  %v2204_v7 = vshll.u32 %v7085_v20, %v2201_v35  ;;  %v2215_v24 = vor.u32 %v2214_v55, %v2213_v44  ;;  %v2926_v1 = vsub.f32 %v2922_v17, %v2904_v57 }
 0x2a1   : >> { %v5461_v57 = vor.u32 %v2208_v45, %v2207_v39  ;;  %v5463_v44 = vor.u32 %v2211_v42, %v2210_v4  ;;  %vm2222_vm7 = vcmp.lt.s32.totalorder %v5432_v27, 4  ;;  %vm1800_vm8 = vcmp.lt.s32.totalorder %v5326_v37, 2 }
 0x2a2   : >> { %v3232_v32 = vmul.f32 %v3228_v2, %v4430_v61  ;;  %v2932_v49 = vadd.f32 %v4857_v12, %v2926_v1  ;;  %v5459_v55 = vor.u32 %v2205_v30, %v2204_v7  ;;  %v2228_v35 = vsel %vm2222_vm7, %v2215_v24, 920167782 }
 0x2a3   : >> { %v1810_v1 = vsel %vm1800_vm8, %v1807_v53, %v1809_v18  ;;  %v1814_v4 = vsel %vm1800_vm8, %v1811_v38, %v1813_v3  ;;  %v2195_v39 = vor.u32 8388608, %v2194_v29  ;;  %vm2219_vm10 = vcmp.lt.s32.totalorder %v5432_v27, 1 }
 0x2a4   : >> { %v3236_v0 = vsub.f32 %v3232_v32, %v3214_v60  ;;  %v2936_v28 = vmul.f32 %v2932_v49, %v4876_v46  ;;  %v2232_v60 = vsel %vm2222_vm7, %v2218_v56, 1326507024  ;;  %vm2221_vm11 = vcmp.lt.s32.totalorder %v5432_v27, 3 }
 0x2a5   : >> { %v5483_v59 = vstv %s5436_s9  ;;  %v2227_v53 = vsel %vm2219_vm10, %v5459_v55, %v5461_v57  ;;  %v2229_v3 = vsel %vm2221_vm11, %v5463_v44, %v2228_v35  ;;  %v2231_v38 = vsel %vm2219_vm10, %v5461_v57, %v5463_v44  ;;  %s5711_s9 = scalar_lea.vmem %s274_s16, %s4336_s7 [#allocation9]  ;;  %s3657_s7 = sshll.u32 (%p306_p4), %s4166_s22, 10 }
 0x2a6   : >> { %v3242_v13 = vadd.f32 %v5448_v54, %v3236_v0  ;;  %v2940_v42 = vsub.f32 %v2936_v28, %v2918_v34  ;;  %7159 = vst [vmem:[#allocation85_spill] sm:$0xff] %v5483_v59  ;;  %v2233_v34 = vsel %vm2221_vm11, %v2215_v24, %v2232_v60  ;;  %v1329_v29 = vand.u32 3, %v5276_v40  ;;  %s4112_s22 = smov (%p306_p4), [#allocation9]  }
 0x2a7   : >> { %v5501_v19 = vmul.u32.u64.low %v5329_v58, %v1814_v4  ;;  %v5502_v17 = vmul.u32.u64.high %v5329_v58, %v1814_v4, %v5501_v19  ;;  %v5505_v30 = vmul.u32.u64.low %v5329_v58, %v1810_v1  ;;  %v5506_v45 = vmul.u32.u64.high %v5329_v58, %v1810_v1, %v5505_v30  ;;  %s4020_s12 = sshll.u32 (%p306_p4), %s4112_s22, 4  ;;  %s4021_s12 = int_to_ptr.vmem [resolvable:$false] %s4020_s12 }
 0x2a8   : >> { %v3246_v0 = vmul.f32 %v3242_v13, %v4430_v61  ;;  %v2946_v18 = vadd.f32 %v4874_v33, %v2940_v42  ;;  %vm2220_vm12 = vcmp.lt.s32.totalorder %v5432_v27, 2  ;;  %v1804_v40 = vsel %vm1802_vm4, %v5397_v11, 2102212464  ;;  %s4022_s13 = scalar_lea.vmem (%p306_p4), %s4021_s12, 2048 }
 0x2a9   : >> { %v2230_v7 = vsel %vm2220_vm12, %v2227_v53, %v2229_v3  ;;  %v2234_v35 = vsel %vm2220_vm12, %v2231_v38, %v2233_v34  ;;  %v5522_v28 = vshll.u32 %v2195_v39, 8  ;;  %vm1331_vm13 = vcmp.eq.s32.totalorder %v1329_v29, 0 }
 0x2aa   : >> { %v3250_v56 = vsub.f32 %v3246_v0, %v3228_v2  ;;  %v1413_v2 = vsub.s32 0, %v5411_v51  ;;  %v2950_v24 = vmul.f32 %v2946_v18, %v4876_v46  ;;  %vm1334_vm14 = vcmp.eq.s32.totalorder %v1329_v29, 2 }
 0x2ab   : >> { %v5526_v60 = vstv %s5471_s11  ;;  %v1803_v11 = vsel %vm1799_vm5, %v5403_v15, %v5383_v47  ;;  %v7161_v0 = vxor.u32 2147483648, %v5331_v23  ;;  %v7162_v39 = vxor.u32 2147483648, %v5322_v16 }
 0x2ac   : >> { %v3256_v32 = vadd.f32 %v5483_v59, %v3250_v56  ;;  %v2954_v4 = vsub.f32 %v2950_v24, %v2932_v49  ;;  %7160 = vst [vmem:[#allocation86_spill] sm:$0xff] %v5526_v60  ;;  %v5539_v49 = vmul.u32.u64.low %v5522_v28, %v2230_v7  ;;  %v5540_v38 = vmul.u32.u64.high %v5522_v28, %v2230_v7, %v5539_v49  ;;  %v7163_v56 = vld [vmem:[#allocation58_spill] sm:$0xff] }
 0x2ad   : >> { %v1333_v42 = vsel %vm1331_vm13, %v5322_v16, %v7161_v0  ;;  %v1336_v53 = vsel %vm1334_vm14, %v7162_v39, %v5331_v23  ;;  %v1805_v47 = vsel %vm1801_vm6, %v5390_v21, %v1804_v40  ;;  %vm1330_vm15 = vcmp.lt.s32.totalorder %v1329_v29, 2  ;;  %v7164_v7 = vld [vmem:[#allocation62_spill] sm:$0xff] }
 0x2ae   : >> { %v3260_v1 = vmul.f32 %v3256_v32, %v4430_v61  ;;  %v2960_v34 = vadd.f32 %v7163_v56, %v2954_v4  ;;  %v5548_v15 = vmul.u32.u64.low %v5522_v28, %v2234_v35  ;;  %v5549_v19 = vmul.u32.u64.high %v5522_v28, %v2234_v35, %v5548_v15 }
 0x2af   : >> { %v5552_v16 = vand.u32 3, %v5318_v22  ;;  %v1337_v24 = vsel %vm1330_vm15, %v1333_v42, %v1336_v53  ;;  %v7166_v21 = vand.u32 2147483647, %v5291_v41  ;;  %v3554_v22 = vmin.u32 %v1413_v2, %v5411_v51 }
 0x2b0   : >> { %v3264_v3 = vsub.f32 %v3260_v1, %v3242_v13  ;;  %v2964_v13 = vmul.f32 %v2960_v34, %v4876_v46  ;;  %v7165_v1 = vld [vmem:[#allocation65_spill] sm:$0xff]  ;;  %v1825_v29 = vadd.s32 1, %v5506_v45  ;;  %vm2071_vm0 = vcmp.eq.s32.totalorder %v5114_v62, 0 }
 0x2b1   : >> { %v5558_v4 = vmul.f32 %v7165_v1, %v7164_v7  ;;  %vm5562_vm9 = vcmp.lt.f32.partialorder %v7166_v21, 1e-05  ;;  %vm2074_vm1 = vcmp.eq.s32.totalorder %v5114_v62, 2  ;;  %v1806_v0 = vsel %vm1800_vm8, %v1803_v11, %v1805_v47 }
 0x2b2   : >> { %v3270_v23 = vadd.f32 %v5526_v60, %v3264_v3  ;;  %vm1824_vm2 = vc.u32 %v5502_v17, %v5505_v30  ;;  %v2968_v42 = vsub.f32 %v2964_v13, %v2946_v18  ;;  %v5578_v39 = vstv %s5513_s14  ;;  %v7170_v18 = vld [vmem:[#allocation59_spill] sm:$0xff] }
 0x2b3   : >> { %7169 = vst [vmem:[#allocation62_spill] sm:$0xff] %v5578_v39  ;;  %v2203_v2 = vshrl.u32 %v7085_v20, %v5392_v63  ;;  %v2224_v53 = vsel %vm2222_vm7, %v5463_v44, 2102212464  ;;  %v1338_v3 = vsel %vm915_vm3, nan, %v1337_v24  ;;  %vm2491_vm4 = vcmp.eq.s32.totalorder %v5552_v16, 0 }
 0x2b4   : >> { %v3274_v35 = vmul.f32 %v3270_v23, %v4430_v61  ;;  %v2617_v37 = vsel %vm5562_vm9, 1.0, %v5291_v41  ;;  %v2974_v47 = vadd.f32 %v7170_v18, %v2968_v42  ;;  %v1415_v15 = vclz %v3554_v22 }
 0x2b5   : >> { %v1822_v13 = vmul.u32 %v5329_v58, %v1806_v0  ;;  %v1826_v63 = vsel %vm1824_vm2, %v1825_v29, %v5506_v45  ;;  %v2223_v44 = vsel %vm2219_vm10, %v2203_v2, %v5459_v55  ;;  %vm2070_vm3 = vcmp.lt.s32.totalorder %v5114_v62, 2 }
 0x2b6   : >> { %v3278_v11 = vsub.f32 %v3274_v35, %v3256_v32  ;;  %v2225_v41 = vsel %vm2221_vm11, %v5461_v57, %v2224_v53  ;;  %v2978_v32 = vmul.f32 %v2974_v47, %v4876_v46  ;;  %v5603_v7 = vmul.f32 2.0, %v1338_v3  ;;  %v7172_v53 = vld [vmem:[#allocation60_spill] sm:$0xff] }
 0x2b7   : >> { %v2072_v58 = vxor.u32 2147483648, %v5366_v14  ;;  %v2075_v45 = vxor.u32 2147483648, %v5362_v52  ;;  %v2495_v1 = vxor.u32 2147483648, %v5375_v25  ;;  %v2245_v55 = vadd.s32 1, %v5540_v38 }
 0x2b8   : >> { %v3284_v24 = vadd.f32 %v5578_v39, %v3278_v11  ;;  %v5612_v22 = vadd.s32 %v1826_v63, %v1822_v13  ;;  %vm2244_vm5 = vc.u32 %v5549_v19, %v5539_v49  ;;  %v2982_v57 = vsub.f32 %v2978_v32, %v2960_v34  ;;  %v7173_v11 = vld [vmem:[#allocation34_spill] sm:$0xff] }
 0x2b9   : >> { %v2492_v29 = vxor.u32 2147483648, %v5380_v5  ;;  %v5618_v35 = vstv %s5566_s25  ;;  %v3555_v0 = vadd.s32 4294967294, %v1415_v15  ;;  %v2226_v42 = vsel %vm2220_vm12, %v2223_v44, %v2225_v41  ;;  %s6827_s25 = scalar_lea.hbm (%p306_p4), %s6881_s5, %s3657_s7 }
 0x2ba   : >> { %v3288_v21 = vmul.f32 %v3284_v24, %v4430_v61  ;;  %7171 = vst [vmem:[#allocation65_spill] sm:$0xff] %v5618_v35  ;;  %vm2494_vm6 = vcmp.eq.s32.totalorder %v5552_v16, 2  ;;  %v2988_v3 = vadd.f32 %v7172_v53, %v2982_v57  ;;  %v2663_v13 = vmul.f32 %v7173_v11, %v5603_v7 }
 0x2bb   : >> { %v2073_v34 = vsel %vm2071_vm0, %v5362_v52, %v2072_v58  ;;  %v2076_v63 = vsel %vm2074_vm1, %v2075_v45, %v5366_v14  ;;  %v2246_v15 = vsel %vm2244_vm5, %v2245_v55, %v5540_v38  ;;  %v484_v27 = vmul.f32 0.00014247585, %v5063_v26  ;;  %v7174_v45 = vld [vmem:[#allocation35_spill] sm:$0xff] }
 0x2bc   : >> { %v3292_v2 = vsub.f32 %v3288_v21, %v3270_v23  ;;  %v1828_v23 = vadd.s32 536870912, %v5612_v22  ;;  %v2242_v41 = vmul.u32 %v5522_v28, %v2226_v42  ;;  %v2992_v32 = vmul.f32 %v2988_v3, %v4876_v46  ;;  %v495_v28 = vpop.permute.xlu0 %494 }
 0x2bd   : >> { %v2493_v52 = vsel %vm2491_vm4, %v5375_v25, %v2492_v29  ;;  %v2496_v58 = vsel %vm2494_vm6, %v2495_v1, %v5380_v5  ;;  %3901 = vrcp.f32 %v2617_v37  ;;  %vm3556_vm7 = vcmp.lt.s32.totalorder %v3555_v0, 0  ;;  %v7176_v29 = vld [vmem:[#allocation61_spill] sm:$0xff] }
 0x2be   : >> { %v3298_v44 = vadd.f32 %v5618_v35, %v3292_v2  ;;  %v5645_v14 = vadd.s32 %v2246_v15, %v2242_v41  ;;  %v2996_v38 = vsub.f32 %v2992_v32, %v2974_v47  ;;  %v2669_v55 = vadd.f32 %v7174_v45, %v2663_v13  ;;  %v7178_v41 = vld [vmem:[#allocation36_spill] sm:$0xff]  ;;  %v7225_v45 = vld [vmem:[#allocation51_spill] sm:$0xff] }
 0x2bf   : >> { %v2077_v21 = vsel %vm2070_vm3, %v2073_v34, %v2076_v63  ;;  %vm2490_vm8 = vcmp.lt.s32.totalorder %v5552_v16, 2  ;;  %v5652_v25 = vstv %s5608_s26  ;;  %v5654_v5 = vadd.f32 %v495_v28, %v484_v27  ;;  %s3377_s26 = sshll.u32 (%p306_p4), %s274_s16, 4  ;;  %s6831_s26 = int_to_ptr.vmem [resolvable:$true] %s3377_s26 }
 0x2c0   : >> { %v3302_v26 = vmul.f32 %v3298_v44, %v4430_v61  ;;  %7175 = vst [vmem:[#allocation34_spill] sm:$0xff] %v5652_v25  ;;  %v2497_v37 = vsel %vm2490_vm8, %v2493_v52, %v2496_v58  ;;  %v5656_v57 = vshrl.u32 %v1828_v23, 30  ;;  %v3002_v42 = vadd.f32 %v7176_v29, %v2996_v38  ;;  %v7179_v38 = vld [vmem:[#allocation63_spill] sm:$0xff]  ;;  %s4016_s6 = scalar_lea.vmem (%p306_p4), %s6831_s26, 1024  ;;  %p4023_p1 = scmp.lt.s32.totalorder (%p306_p4), %s6831_s26, %s4021_s12 }
 0x2c1   : >> { %v2653_v47 = vmul.f32 1.442695, %v5558_v4  ;;  %vm2067_vm10 = vweird.f32 %v4451_v43  ;;  %v1418_v2 = vsel %vm3556_vm7, 0, %v3555_v0  ;;  %v2673_v62 = vmul.f32 %v2669_v55, %v5603_v7  ;;  %p4017_p7 = scmp.ne.s32.totalorder (%p306_p4), %s6831_s26, %s4016_s6  ;;  %p4024_p6 = scmp.lt.s32.totalorder (%p306_p4), %s4022_s13, %s4016_s6 }
 0x2c2   : >> { %v3306_v1 = vsub.f32 %v3302_v26, %v3284_v24  ;;  %vm2487_vm11 = vweird.f32 %v7132_v36  ;;  %v2248_v13 = vadd.s32 536870912, %v5645_v14  ;;  %v3006_v24 = vmul.f32 %v3002_v42, %v4876_v46 }
 0x2c3   : >> { %v2078_v34 = vsel %vm2067_vm10, nan, %v2077_v21  ;;  %v2498_v63 = vsel %vm2487_vm11, nan, %v2497_v37  ;;  %v2677_v4 = vsub.f32 %v2673_v62, %v7173_v11  ;;  %v618_v43 = vand.u32 2139095040, %v5654_v5  ;;  %p4018_p11 = pnand (%p306_p4), %p4017_p7, %p7321_p8  ;;  %p4025_p5 = por (%p306_p4), %p4024_p6, %p4023_p1 }
 0x2c4   : >> { %v3312_v16 = vadd.f32 %v5652_v25, %v3306_v1  ;;  %v1423_v15 = vsub.s32 4294967266, %v1418_v2  ;;  %v1830_v27 = vshll.u32 %v5656_v57, 30  ;;  %v3010_v23 = vsub.f32 %v3006_v24, %v2988_v3 }
 0x2c5   : >> { %3903 = vpow2.f32 %v2653_v47  ;;  %v5672_v36 = vstv %s5642_s23  ;;  %v2683_v32 = vadd.f32 %v7178_v41, %v2677_v4  ;;  %v619_v52 = vshrl.u32 %v618_v43, 23  ;;  %p4019_p13 = pneg (%p306_p4), %p4018_p11 }
 0x2c6   : >> { %v3316_v0 = vmul.f32 %v3312_v16, %v4430_v61  ;;  %7177 = vst [vmem:[#allocation87_spill] sm:$0xff] %v5672_v36  ;;  %v5675_v26 = vshrl.u32 %v2248_v13, 30  ;;  %v3016_v28 = vadd.f32 %v7179_v38, %v3010_v23  ;;  %v2605_v37 = vmul.f32 %v2498_v63, %v2078_v34 }
 0x2c7   : >> { %v3902_v21 = vpop.eup %3901  ;;  %v2687_v1 = vmul.f32 %v2683_v32, %v5603_v7  ;;  %v3525_v62 = vadd.s32 4294967169, %v619_v52  ;;  %v1424_v53 = vadd.s32 127, %v1423_v15  ;;  %v5681_v3 = vsub.s32 %v5612_v22, %v1830_v27  ;;  %v7181_v15 = vld [vmem:[#allocation37_spill] sm:$0xff]  ;;  %p4026_p0 = pnand (%p306_p4), %p4025_p5, %p4019_p13 }
 0x2c8   : >> { %v3320_v58 = vsub.f32 %v3316_v0, %v3298_v44  ;;  %v3020_v47 = vmul.f32 %v3016_v28, %v4876_v46  ;;  %v1419_v24 = vsub.s32 32, %v1418_v2  ;;  %v2625_v13 = vmul.f32 %v3902_v21, %v2605_v37 }
 0x2c9   : >> { %v2691_v4 = vsub.f32 %v2687_v1, %v2669_v55  ;;  %v625_v44 = vadd.s32 1, %v3525_v62  ;;  %v2250_v0 = vshll.u32 %v5675_v26, 30  ;;  %v5686_v63 = vstv %s3336_s8  ;;  %v7182_v55 = vld [vmem:[#allocation66_spill] sm:$0xff] }
 0x2ca   : >> { %v3326_v29 = vadd.f32 %v5672_v36, %v3320_v58  ;;  %v3024_v34 = vsub.f32 %v3020_v47, %v3002_v42  ;;  %7180 = vst [vmem:[#allocation88_spill] sm:$0xff] %v5686_v63  ;;  %v1403_v23 = vadd.s32 %v5223_v6, %v5235_v50  ;;  %v1425_v27 = vshll.u32 %v1424_v53, 23 }
 0x2cb   : >> { %v2697_v52 = vadd.f32 %v7181_v15, %v2691_v4  ;;  %vm626_vm12 = vcmp.gt.s32.totalorder %v625_v44, 0  ;;  %v1833_v58 = vsub.s32 0, %v5681_v3  ;;  %v2629_v42 = vsel %vm5562_vm9, 0.0, %v2625_v13 }
 0x2cc   : >> { %v3330_v43 = vmul.f32 %v3326_v29, %v4430_v61  ;;  %v3030_v1 = vadd.f32 %v7182_v55, %v3024_v34  ;;  %v1421_v21 = vshrl.u32 %v1403_v23, %v1419_v24  ;;  %v627_v29 = vsel %vm626_vm12, %v625_v44, 0  ;;  %v7183_v24 = vld [vmem:[#allocation33_spill] sm:$0xff]  ;;  %v7184_v23 = vld [vmem:[#allocation38_spill] sm:$0xff] }
 0x2cd   : >> { %v2701_v61 = vmul.f32 %v2697_v52, %v5603_v7  ;;  %v5698_v6 = vsub.s32 %v5645_v14, %v2250_v0  ;;  %v629_v47 = vand.u32 31, %v627_v29  ;;  %v1426_v44 = vor.u32 4788187, %v1425_v27 }
 0x2ce   : >> { %v3334_v22 = vsub.f32 %v3330_v43, %v3312_v16  ;;  %v3034_v50 = vmul.f32 %v3030_v1, %v4876_v46  ;;  %v1420_v16 = vshll.u32 %v5411_v51, %v1418_v2  ;;  %v3570_v40 = vmin.u32 %v1833_v58, %v5681_v3 }
 0x2cf   : >> { %v3904_v53 = vpop.eup %3903  ;;  %v2705_v62 = vsub.f32 %v2701_v61, %v2683_v32  ;;  %v3352_v43 = vmul.f32 1e-08, %v2629_v42  ;;  %v6995_v15 = vand.u32 2147483647, %v5654_v5  ;;  %v630_v2 = vsub.s32 32, %v629_v47 }
 0x2d0   : >> { %v3340_v37 = vadd.f32 %v5686_v63, %v3334_v22  ;;  %v3038_v13 = vsub.f32 %v3034_v50, %v3016_v28  ;;  %v1422_v34 = vor.u32 %v1421_v21, %v1420_v16  ;;  %v2253_v22 = vsub.s32 0, %v5698_v6  ;;  %v7190_v63 = vld [vmem:[#allocation69_spill] sm:$0xff] }
 0x2d1   : >> { %v2711_v14 = vadd.f32 %v7184_v23, %v2705_v62  ;;  %v1427_v28 = vand.u32 2147483647, %v1426_v44  ;;  %v1835_v27 = vclz %v3570_v40  ;;  %v622_v50 = vand.u32 8388607, %v6995_v15 }
 0x2d2   : >> { %v3344_v4 = vmul.f32 %v3340_v37, %v7183_v24  ;;  %v3044_v55 = vadd.f32 %v4987_v31, %v3038_v13  ;;  %v1429_v61 = vcvt.s32.f32 %v1422_v34  ;;  %v3586_v42 = vmin.u32 %v2253_v22, %v5698_v6  ;;  %v7188_v31 = vld [vmem:[#allocation40_spill] sm:$0xff] }
 0x2d3   : >> { %v2715_v51 = vmul.f32 %v2711_v14, %v5603_v7  ;;  %v633_v62 = vshrl.u32 %v7096_v8, %v630_v2  ;;  %v636_v24 = vshrl.u32 %v7097_v9, %v630_v2  ;;  %v3571_v44 = vadd.s32 4294967294, %v1835_v27 }
 0x2d4   : >> { %v3348_v0 = vmul.f32 %v3904_v53, %v3344_v4  ;;  %v3048_v58 = vmul.f32 %v3044_v55, %v4876_v46  ;;  %v7185_v53 = vld [vmem:[#allocation39_spill] sm:$0xff]  ;;  %v5722_v4 = vmul.f32 %v1429_v61, %v1427_v28  ;;  %v632_v13 = vshll.u32 %v7085_v20, %v629_v47 }
 0x2d5   : >> { %v2719_v21 = vsub.f32 %v2715_v51, %v2697_v52  ;;  %v623_v51 = vor.u32 8388608, %v622_v50  ;;  %v628_v28 = vshrl.u32 %v627_v29, 5  ;;  %vm3572_vm13 = vcmp.lt.s32.totalorder %v3571_v44, 0 }
 0x2d6   : >> { %v3356_v32 = vadd.f32 %v3352_v43, %v3348_v0  ;;  %v3052_v37 = vsub.f32 %v3048_v58, %v3030_v1  ;;  %v635_v1 = vshll.u32 %v7096_v8, %v629_v47  ;;  %v7186_v43 = vmov 2102212464  }
 0x2d7   : >> { %v2725_v16 = vadd.f32 %v7185_v53, %v2719_v21  ;;  %v639_v34 = vshrl.u32 %v7186_v43, %v630_v2  ;;  %v2255_v0 = vclz %v3586_v42  ;;  %v634_v21 = vor.u32 %v633_v62, %v632_v13 }
 0x2d8   : >> { %3361 = vst [vmem:[%s5711_s9 + $0x10] sm:$0xff] %v3356_v32  ;;  %v3058_v40 = vadd.f32 %v5011_v48, %v3052_v37  ;;  %v638_v32 = vshll.u32 %v7097_v9, %v629_v47  ;;  %v637_v27 = vor.u32 %v636_v24, %v635_v1  ;;  %v641_v15 = vshll.u32 %v7186_v43, %v629_v47 }
 0x2d9   : >> { %v2729_v52 = vmul.f32 %v2725_v16, %v5603_v7  ;;  %v7187_v48 = vmov 920167782   ;;  %v7189_v38 = vmov 1326507024   ;;  %v3587_v50 = vadd.s32 4294967294, %v2255_v0 }
 0x2da   : >> { %v3062_v22 = vmul.f32 %v3058_v40, %v4876_v46  ;;  %v640_v37 = vor.u32 %v639_v34, %v638_v32  ;;  %v642_v53 = vshrl.u32 %v7187_v48, %v630_v2  ;;  %v644_v42 = vshll.u32 %v7187_v48, %v629_v47 }
 0x2db   : >> { %v2733_v58 = vsub.f32 %v2729_v52, %v2711_v14  ;;  %v645_v41 = vshrl.u32 %v7189_v38, %v630_v2  ;;  %v663_v29 = vshll.u32 %v623_v51, 8  ;;  %vm647_vm14 = vcmp.lt.s32.totalorder %v628_v28, 1  ;;  %v7191_v51 = vld [vmem:[#allocation41_spill] sm:$0xff] }
 0x2dc   : >> { %v3066_v61 = vsub.f32 %v3062_v22, %v3044_v55  ;;  %v643_v14 = vor.u32 %v642_v53, %v641_v15  ;;  %vm650_vm15 = vcmp.lt.s32.totalorder %v628_v28, 4  ;;  %v631_v52 = vshrl.u32 %v7085_v20, %v630_v2  ;;  %v7192_v2 = vld [vmem:[#allocation70_spill] sm:$0xff] }
 0x2dd   : >> { %v2739_v23 = vadd.f32 %v7188_v31, %v2733_v58  ;;  %v646_v55 = vor.u32 %v645_v41, %v644_v42  ;;  %v652_v13 = vsel %vm650_vm15, %v640_v37, 2102212464  ;;  %v655_v1 = vsel %vm647_vm14, %v634_v21, %v637_v27 }
 0x2de   : >> { %v3072_v36 = vadd.f32 %v7190_v63, %v3066_v61  ;;  %vm648_vm9 = vcmp.lt.s32.totalorder %v628_v28, 2  ;;  %vm649_vm0 = vcmp.lt.s32.totalorder %v628_v28, 3  ;;  %v656_v34 = vsel %vm650_vm15, %v643_v14, 920167782 }
 0x2df   : >> { %v2743_v62 = vmul.f32 %v2739_v23, %v5603_v7  ;;  %v651_v15 = vsel %vm647_vm14, %v631_v52, %v634_v21  ;;  %v657_v53 = vsel %vm649_vm0, %v640_v37, %v656_v34  ;;  %v659_v22 = vsel %vm647_vm14, %v637_v27, %v640_v37 }
 0x2e0   : >> { %v3076_v24 = vmul.f32 %v3072_v36, %v4876_v46  ;;  %v653_v32 = vsel %vm649_vm0, %v637_v27, %v652_v13  ;;  %v658_v58 = vsel %vm648_vm9, %v655_v1, %v657_v53  ;;  %v660_v61 = vsel %vm650_vm15, %v646_v55, 1326507024  ;;  %v7193_v13 = vld [vmem:[#allocation80_spill] sm:$0xff] }
 0x2e1   : >> { %v2747_v47 = vsub.f32 %v2743_v62, %v2725_v16  ;;  %v661_v63 = vsel %vm649_vm0, %v643_v14, %v660_v61  ;;  %v5746_v31 = vmul.u32.u64.low %v663_v29, %v658_v58  ;;  %v5747_v16 = vmul.u32.u64.high %v663_v29, %v658_v58, %v5746_v31  ;;  %v7194_v53 = vld [vmem:[#allocation64_spill] sm:$0xff] }
 0x2e2   : >> { %v3080_v0 = vsub.f32 %v3076_v24, %v3058_v40  ;;  %v1431_v62 = vxor.u32 2147483648, %v5722_v4  ;;  %vm3588_vm1 = vcmp.lt.s32.totalorder %v3587_v50, 0  ;;  %v662_v21 = vsel %vm648_vm9, %v659_v22, %v661_v63  ;;  %v7195_v63 = vld [vmem:[#allocation42_spill] sm:$0xff]  ;;  %v7196_v61 = vld [vmem:[#allocation72_spill] sm:$0xff] }
 0x2e3   : >> { %v2753_v41 = vadd.f32 %v7191_v51, %v2747_v47  ;;  %v1838_v27 = vsel %vm3572_vm13, 0, %v3571_v44  ;;  %v5755_v24 = vmul.u32.u64.low %v663_v29, %v662_v21  ;;  %v5756_v55 = vmul.u32.u64.high %v663_v29, %v662_v21, %v5755_v24 }
 0x2e4   : >> { %v3086_v42 = vadd.f32 %v7192_v2, %v3080_v0  ;;  %v654_v14 = vsel %vm648_vm9, %v651_v15, %v653_v32  ;;  %v1433_v1 = vsub.s32 4, %v7193_v13  ;;  %v2258_v47 = vsel %vm3588_vm1, 0, %v3587_v50 }
 0x2e5   : >> { %v2757_v40 = vmul.f32 %v2753_v41, %v5603_v7  ;;  %v673_v0 = vadd.s32 1, %v5747_v16  ;;  %vm1349_vm2 = vcmp.lt.s32.totalorder %v7194_v53, 0  ;;  %v1843_v58 = vsub.s32 4294967266, %v1838_v27 }
 0x2e6   : >> { %v3090_v37 = vmul.f32 %v3086_v42, %v4876_v46  ;;  %v1432_v44 = vsel %vm1349_vm2, %v1431_v62, %v5722_v4  ;;  %v670_v21 = vmul.u32 %v663_v29, %v654_v14  ;;  %vm672_vm4 = vc.u32 %v5756_v55, %v5746_v31 }
 0x2e7   : >> { %v2761_v52 = vsub.f32 %v2757_v40, %v2739_v23  ;;  %v2263_v23 = vsub.s32 4294967266, %v2258_v47  ;;  %v7197_v50 = vand.u32 2147483647, %v7194_v53  ;;  %v1434_v32 = vsel %vm1349_vm2, %v1433_v1, %v7193_v13  ;;  %v7200_v13 = vld [vmem:[#allocation43_spill] sm:$0xff] }
 0x2e8   : >> { %v3094_v34 = vsub.f32 %v3090_v37, %v3072_v36  ;;  %v674_v36 = vsel %vm672_vm4, %v673_v0, %v5747_v16  ;;  %v1844_v40 = vadd.s32 127, %v1843_v58  ;;  %v1839_v24 = vsub.s32 32, %v1838_v27 }
 0x2e9   : >> { %v2767_v22 = vadd.f32 %v7195_v63, %v2761_v52  ;;  %vm5771_vm3 = vcmp.le.f32.partialorder %v7197_v50, 0.7853982  ;;  %v675_v62 = vadd.s32 %v674_v36, %v670_v21  ;;  %v5783_v0 = vmul.f32 0.5, %v4900_v10  ;;  %v7201_v36 = vld [vmem:[#allocation73_spill] sm:$0xff] }
 0x2ea   : >> { %v3100_v2 = vadd.f32 %v7196_v61, %v3094_v34  ;;  %v1435_v29 = vsel %vm5771_vm3, %v7194_v53, %v1432_v44  ;;  %v1436_v14 = vsel %vm5771_vm3, 0, %v1434_v32  ;;  %v2264_v34 = vadd.s32 127, %v2263_v23 }
 0x2eb   : >> { %v2771_v28 = vmul.f32 %v2767_v22, %v5603_v7  ;;  %v676_v16 = vadd.s32 536870912, %v675_v62  ;;  %3905 = vcosq.f32 %v1435_v29  ;;  %v1823_v21 = vadd.s32 %v5505_v30, %v5502_v17 }
 0x2ec   : >> { %v3104_v4 = vmul.f32 %v3100_v2, %v4876_v46  ;;  %3907 = vsinq.f32 %v1435_v29  ;;  %v2243_v15 = vadd.s32 %v5539_v49, %v5549_v19  ;;  %v2265_v32 = vshll.u32 %v2264_v34, 23 }
 0x2ed   : >> { %v2775_v37 = vsub.f32 %v2771_v28, %v2753_v41  ;;  %v5789_v58 = vshrl.u32 %v676_v16, 30  ;;  %v1845_v41 = vshll.u32 %v1844_v40, 23  ;;  %v1841_v50 = vshrl.u32 %v1823_v21, %v1839_v24 }
 0x2ee   : >> { %v3108_v52 = vsub.f32 %v3104_v4, %v3086_v42  ;;  %v2259_v42 = vsub.s32 32, %v2258_v47  ;;  %v1662_v17 = vand.u32 2139095040, %v5783_v0  ;;  %v1440_v4 = vadd.s32 3, %v1436_v14 }
 0x2ef   : >> { %v2781_v1 = vadd.f32 %v7200_v13, %v2775_v37  ;;  %v678_v10 = vshll.u32 %v5789_v58, 30  ;;  %v1840_v37 = vshll.u32 %v5681_v3, %v1838_v27  ;;  %v7203_v13 = vld [vmem:[#allocation44_spill] sm:$0xff]  ;;  %v2260_v51 = vshll.u32 %v5698_v6, %v2258_v47  ;;  %v7205_v47 = vld [vmem:[#allocation71_spill] sm:$0xff] }
 0x2f0   : >> { %v3114_v44 = vadd.f32 %v7201_v36, %v3108_v52  ;;  %v1846_v52 = vor.u32 4788187, %v1845_v41  ;;  %v2261_v16 = vshrl.u32 %v2243_v15, %v2259_v42  ;;  %v7202_v36 = vld [vmem:[#allocation45_spill] sm:$0xff]  ;;  %v2266_v49 = vor.u32 4788187, %v2265_v32  ;;  %v7206_v32 = vld [vmem:[#allocation74_spill] sm:$0xff] }
 0x2f1   : >> { %v2785_v28 = vmul.f32 %v2781_v1, %v5603_v7  ;;  %v679_v40 = vsub.s32 %v675_v62, %v678_v10  ;;  %v1842_v21 = vor.u32 %v1841_v50, %v1840_v37  ;;  %v1663_v19 = vshrl.u32 %v1662_v17, 23 }
 0x2f2   : >> { %v3118_v23 = vmul.f32 %v3114_v44, %v4876_v46  ;;  %v2262_v27 = vor.u32 %v2261_v16, %v2260_v51  ;;  %v2267_v10 = vand.u32 2147483647, %v2266_v49  ;;  %vm1769_vm6 = vcmp.lt.s32.totalorder %v7205_v47, 0 }
 0x2f3   : >> { %v2789_v30 = vsub.f32 %v2785_v28, %v2767_v22  ;;  %v681_v63 = vsub.s32 0, %v679_v40  ;;  %v1441_v22 = vand.u32 3, %v1440_v4  ;;  %v3565_v15 = vadd.s32 4294967169, %v1663_v19 }
 0x2f4   : >> { %v3122_v29 = vsub.f32 %v3118_v23, %v3100_v2  ;;  %v1847_v2 = vand.u32 2147483647, %v1846_v52  ;;  %v1849_v23 = vcvt.s32.f32 %v1842_v21  ;;  %v2269_v37 = vcvt.s32.f32 %v2262_v27 }
 0x2f5   : >> { %v2795_v24 = vadd.f32 %v7202_v36, %v2789_v30  ;;  %v3526_v3 = vmin.u32 %v681_v63, %v679_v40  ;;  %v3906_v41 = vpop.eup %3905  ;;  %v7204_v30 = vld [vmem:[#allocation46_spill] sm:$0xff]  ;;  %vm1443_vm5 = vcmp.eq.s32.totalorder %v1441_v22, 0  ;;  %v7207_v63 = vand.u32 2147483647, %v7205_v47 }
 0x2f6   : >> { %v3128_v61 = vadd.f32 %v7203_v13, %v3122_v29  ;;  %v3908_v50 = vpop.eup %3907  ;;  %v1447_v16 = vxor.u32 2147483648, %v3906_v41  ;;  %v2270_v49 = vmul.f32 %v2269_v37, %v2267_v10  ;;  %v1669_v19 = vadd.s32 1, %v3565_v15  ;;  %v7211_v10 = vld [vmem:[#allocation76_spill] sm:$0xff] }
 0x2f7   : >> { %v2799_v34 = vmul.f32 %v2795_v24, %v5603_v7  ;;  %v683_v28 = vclz %v3526_v3  ;;  %vm5808_vm7 = vcmp.le.f32.partialorder %v7207_v63, 0.7853982  ;;  %v1444_v52 = vxor.u32 2147483648, %v3908_v50 }
 0x2f8   : >> { %v3132_v14 = vmul.f32 %v3128_v61, %v4876_v46  ;;  %vm1446_vm10 = vcmp.eq.s32.totalorder %v1441_v22, 2  ;;  %vm1439_vm11 = vweird.f32 %v7194_v53  ;;  %vm1670_vm12 = vcmp.gt.s32.totalorder %v1669_v19, 0  ;;  %v7219_v53 = vld [vmem:[#allocation78_spill] sm:$0xff] }
 0x2f9   : >> { %v2803_v62 = vsub.f32 %v2799_v34, %v2781_v1  ;;  %v3527_v4 = vadd.s32 4294967294, %v683_v28  ;;  %v1850_v1 = vmul.f32 %v1849_v23, %v1847_v2  ;;  %v7210_v23 = vld [vmem:[#allocation47_spill] sm:$0xff]  ;;  %v1448_v37 = vsel %vm1446_vm10, %v1447_v16, %v3908_v50 }
 0x2fa   : >> { %v3136_v42 = vsub.f32 %v3132_v14, %v3114_v44  ;;  %v1853_v44 = vsub.s32 4, %v5656_v57  ;;  %vm1442_vm13 = vcmp.lt.s32.totalorder %v1441_v22, 2  ;;  %vm617_vm9 = vcmp.lt.s32.totalorder %v5654_v5, 0 }
 0x2fb   : >> { %v2809_v6 = vadd.f32 %v7204_v30, %v2803_v62  ;;  %vm3528_vm8 = vcmp.lt.s32.totalorder %v3527_v4, 0  ;;  %v671_v62 = vadd.s32 %v5746_v31, %v5756_v55  ;;  %v1851_v28 = vxor.u32 2147483648, %v1850_v1 }
 0x2fc   : >> { %v3142_v17 = vadd.f32 %v7206_v32, %v3136_v42  ;;  %v686_v14 = vsel %vm3528_vm8, 0, %v3527_v4  ;;  %v1854_v27 = vsel %vm1769_vm6, %v1853_v44, %v5656_v57  ;;  %v1445_v55 = vsel %vm1443_vm5, %v3906_v41, %v1444_v52 }
 0x2fd   : >> { %v2813_v29 = vmul.f32 %v2809_v6, %v5603_v7  ;;  %v687_v42 = vsub.s32 32, %v686_v14  ;;  %v691_v2 = vsub.s32 4294967266, %v686_v14  ;;  %v1852_v44 = vsel %vm1769_vm6, %v1851_v28, %v1850_v1 }
 0x2fe   : >> { %v3146_v21 = vmul.f32 %v3142_v17, %v4876_v46  ;;  %v1856_v50 = vsel %vm5808_vm7, 0, %v1854_v27  ;;  %v2273_v52 = vsub.s32 4, %v5675_v26  ;;  %v1855_v1 = vsel %vm5808_vm7, %v7205_v47, %v1852_v44 }
 0x2ff   : >> { %v2817_v34 = vsub.f32 %v2813_v29, %v2795_v24  ;;  %v688_v24 = vshll.u32 %v679_v40, %v686_v14  ;;  %v689_v4 = vshrl.u32 %v671_v62, %v687_v42  ;;  %v2271_v29 = vxor.u32 2147483648, %v2270_v49  ;;  %v7213_v42 = vld [vmem:[#allocation48_spill] sm:$0xff] }
 0x300   : >> { %v3150_v3 = vsub.f32 %v3146_v21, %v3128_v61  ;;  %v692_v61 = vadd.s32 127, %v691_v2  ;;  %v1671_v14 = vsel %vm1670_vm12, %v1669_v19, 0  ;;  %v1449_v62 = vsel %vm1442_vm13, %v1445_v55, %v1448_v37  ;;  %v7214_v2 = vld [vmem:[#allocation77_spill] sm:$0xff] }
 0x301   : >> { %v2823_v63 = vadd.f32 %v7210_v23, %v2817_v34  ;;  %v690_v32 = vor.u32 %v689_v4, %v688_v24  ;;  %v7212_v34 = vld [vmem:[#allocation75_spill] sm:$0xff]  ;;  %v1860_v27 = vadd.s32 3, %v1856_v50  ;;  %3909 = vcosq.f32 %v1855_v1  ;;  %v7218_v50 = vld [vmem:[#allocation49_spill] sm:$0xff] }
 0x302   : >> { %v3156_v15 = vadd.f32 %v7211_v10, %v3150_v3  ;;  %v693_v57 = vshll.u32 %v692_v61, 23  ;;  %vm2189_vm14 = vcmp.lt.s32.totalorder %v7212_v34, 0  ;;  %3911 = vsinq.f32 %v1855_v1 }
 0x303   : >> { %v2827_v31 = vmul.f32 %v2823_v63, %v5603_v7  ;;  %v2272_v41 = vsel %vm2189_vm14, %v2271_v29, %v2270_v49  ;;  %v697_v24 = vcvt.s32.f32 %v690_v32  ;;  %v1673_v49 = vand.u32 31, %v1671_v14 }
 0x304   : >> { %v3160_v21 = vmul.f32 %v3156_v15, %v4876_v46  ;;  %v694_v3 = vor.u32 4788187, %v693_v57  ;;  %v701_v29 = vsub.s32 4, %v5789_v58  ;;  %v5853_v32 = vsel %vm1439_vm11, nan, %v1449_v62 }
 0x305   : >> { %v2831_v40 = vsub.f32 %v2827_v31, %v2809_v6  ;;  %v2274_v31 = vsel %vm2189_vm14, %v2273_v52, %v5675_v26  ;;  %v7004_v57 = vand.u32 2147483647, %v5783_v0  ;;  %v7220_v62 = vand.u32 2147483647, %v5654_v5 }
 0x306   : >> { %v3164_v16 = vsub.f32 %v3160_v21, %v3142_v17  ;;  %v695_v28 = vand.u32 2147483647, %v694_v3  ;;  %v7215_v17 = vand.u32 2147483647, %v7212_v34  ;;  %v702_v26 = vsel %vm617_vm9, %v701_v29, %v5789_v58  ;;  %v7221_v29 = vld [vmem:[#allocation50_spill] sm:$0xff] }
 0x307   : >> { %v2837_v22 = vadd.f32 %v7213_v42, %v2831_v40  ;;  %v5859_v40 = vsub.s32 32, %v1673_v49  ;;  %vm616_vm0 = vcmp.le.f32.partialorder %v7220_v62, 0.7853982  ;;  %v5869_v52 = vand.u32 3, %v1860_v27 }
 0x308   : >> { %v3170_v6 = vadd.f32 %v7214_v2, %v3164_v16  ;;  %vm5841_vm15 = vcmp.le.f32.partialorder %v7215_v17, 0.7853982  ;;  %v698_v37 = vmul.f32 %v697_v24, %v695_v28  ;;  %v2607_v1 = vand.u32 2147483647, %v5853_v32 }
 0x309   : >> { %v2841_v4 = vmul.f32 %v2837_v22, %v5603_v7  ;;  %v2275_v61 = vsel %vm5841_vm15, %v7212_v34, %v2272_v41  ;;  %v2276_v24 = vsel %vm5841_vm15, 0, %v2274_v31  ;;  %v1686_v27 = vshrl.u32 %v7187_v48, %v5859_v40  ;;  %v7222_v31 = vld [vmem:[#allocation79_spill] sm:$0xff] }
 0x30a   : >> { %v3174_v51 = vmul.f32 %v3170_v6, %v4876_v46  ;;  %v699_v44 = vxor.u32 2147483648, %v698_v37  ;;  %3913 = vcosq.f32 %v2275_v61  ;;  %v1677_v19 = vshrl.u32 %v7096_v8, %v5859_v40 }
 0x30b   : >> { %v2845_v55 = vsub.f32 %v2841_v4, %v2823_v63  ;;  %3915 = vsinq.f32 %v2275_v61  ;;  %v5875_v4 = vsel %vm616_vm0, 0, %v702_v26  ;;  %v5879_v61 = vand.u32 8388607, %v7004_v57 }
 0x30c   : >> { %v3178_v21 = vsub.f32 %v3174_v51, %v3156_v15  ;;  %v700_v41 = vsel %vm617_vm9, %v699_v44, %v698_v37  ;;  %v5884_v51 = vmul.f32 50.0, %v5783_v0  ;;  %v5886_v37 = vshrl.u32 %v1671_v14, 5 }
 0x30d   : >> { %v2851_v16 = vadd.f32 %v7218_v50, %v2845_v55  ;;  %v703_v15 = vsel %vm616_vm0, %v5654_v5, %v700_v41  ;;  %v1689_v44 = vshrl.u32 %v7189_v38, %v5859_v40  ;;  %v708_v62 = vadd.s32 3, %v5875_v4  ;;  %v5898_v41 = vpop.eup %3909 }
 0x30e   : >> { %v3184_v3 = vadd.f32 %v7219_v53, %v3178_v21  ;;  %3917 = vcosq.f32 %v703_v15  ;;  %v1685_v21 = vshll.u32 %v7186_v43, %v1673_v49  ;;  %vm5900_vm1 = vcmp.lt.f32.partialorder %v2607_v1, 1e-05 }
 0x30f   : >> { %v2855_v63 = vmul.f32 %v2851_v16, %v5603_v7  ;;  %3919 = vsinq.f32 %v703_v15  ;;  %v1676_v26 = vshll.u32 %v7085_v20, %v1673_v49  ;;  %v1683_v15 = vshrl.u32 %v7186_v43, %v5859_v40 }
 0x310   : >> { %v3188_v28 = vmul.f32 %v3184_v3, %v4876_v46  ;;  %v1687_v57 = vor.u32 %v1686_v27, %v1685_v21  ;;  %v2082_v1 = vand.u32 2139095040, %v5884_v51  ;;  %v1682_v2 = vshll.u32 %v7097_v9, %v1673_v49 }
 0x311   : >> { %v2859_v17 = vsub.f32 %v2855_v63, %v2837_v22  ;;  %v1680_v22 = vshrl.u32 %v7097_v9, %v5859_v40  ;;  %v1679_v63 = vshll.u32 %v7096_v8, %v1673_v49  ;;  %v5916_v53 = vor.u32 %v1677_v19, %v1676_v26 }
 0x312   : >> { %v3192_v58 = vsub.f32 %v3188_v28, %v3170_v6  ;;  %v2280_v10 = vadd.s32 3, %v2276_v24  ;;  %v709_v13 = vand.u32 3, %v708_v62  ;;  %v1667_v27 = vor.u32 8388608, %v5879_v61 }
 0x313   : >> { %v2865_v6 = vadd.f32 %v7221_v29, %v2859_v17  ;;  %v5909_v17 = vpop.eup %3911  ;;  %v5918_v50 = vor.u32 %v1680_v22, %v1679_v63  ;;  %v5924_v21 = vor.u32 %v1683_v15, %v1682_v2  ;;  %vm1694_vm2 = vcmp.lt.s32.totalorder %v5886_v37, 4  ;;  %v7226_v22 = vld [vmem:[#allocation82_spill] sm:$0xff] }
 0x314   : >> { %v3198_v55 = vadd.f32 %v7222_v31, %v3192_v58  ;;  %v1688_v31 = vshll.u32 %v7187_v48, %v1673_v49  ;;  %v5914_v29 = vpop.eup %3913  ;;  %vm1691_vm4 = vcmp.lt.s32.totalorder %v5886_v37, 1  ;;  %v1700_v49 = vsel %vm1694_vm2, %v1687_v57, 920167782 }
 0x315   : >> { %v2869_v28 = vmul.f32 %v2865_v6, %v5603_v7  ;;  %v5921_v36 = vpop.eup %3915  ;;  %vm1693_vm3 = vcmp.lt.s32.totalorder %v5886_v37, 3  ;;  %v1699_v2 = vsel %vm1691_vm4, %v5916_v53, %v5918_v50  ;;  %vm714_vm5 = vcmp.eq.s32.totalorder %v709_v13, 2 }
 0x316   : >> { %v3202_v58 = vmul.f32 %v3198_v55, %v4876_v46  ;;  %v1690_v30 = vor.u32 %v1689_v44, %v1688_v31  ;;  %v1701_v44 = vsel %vm1693_vm3, %v5924_v21, %v1700_v49  ;;  %vm711_vm6 = vcmp.eq.s32.totalorder %v709_v13, 0 }
 0x317   : >> { %v2873_v42 = vsub.f32 %v2869_v28, %v2851_v16  ;;  %v2083_v16 = vshrl.u32 %v2082_v1, 23  ;;  %vm710_vm7 = vcmp.lt.s32.totalorder %v709_v13, 2  ;;  %vm1863_vm8 = vcmp.eq.s32.totalorder %v5869_v52, 0  ;;  %v7227_v1 = vld [vmem:[#allocation52_spill] sm:$0xff] }
 0x318   : >> { %v3206_v23 = vsub.f32 %v3202_v58, %v3184_v3  ;;  %v5928_v26 = vpop.eup %3917  ;;  %v1704_v61 = vsel %vm1694_vm2, %v1690_v30, 1326507024  ;;  %v1703_v58 = vsel %vm1691_vm4, %v5918_v50, %v5924_v21  ;;  %vm707_vm10 = vweird.f32 %v5654_v5 }
 0x319   : >> { %v2879_v19 = vadd.f32 %v7225_v45, %v2873_v42  ;;  %v5934_v3 = vpop.eup %3919  ;;  %v7005_v24 = vxor.u32 2147483648, %v5928_v26  ;;  %vm1692_vm11 = vcmp.lt.s32.totalorder %v5886_v37, 2  ;;  %vm1866_vm12 = vcmp.eq.s32.totalorder %v5869_v52, 2 }
 0x31a   : >> { %v3212_v63 = vadd.f32 %v7226_v22, %v3206_v23  ;;  %v7006_v31 = vxor.u32 2147483648, %v5934_v3  ;;  %vm1859_vm15 = vweird.f32 %v7205_v47  ;;  %vm1862_vm9 = vcmp.lt.s32.totalorder %v5869_v52, 2 }
 0x31b   : >> { %v2883_v42 = vmul.f32 %v2879_v19, %v5603_v7  ;;  %v716_v15 = vsel %vm714_vm5, %v7005_v24, %v5934_v3 }
 0x31c   : >> { %v3216_v23 = vmul.f32 %v3212_v63, %v4876_v46  ;;  %v713_v30 = vsel %vm711_vm6, %v5928_v26, %v7006_v31  ;;  %v2281_v31 = vand.u32 3, %v2280_v10  ;;  %v1867_v10 = vxor.u32 2147483648, %v5898_v41 }
 0x31d   : >> { %v2887_v62 = vsub.f32 %v2883_v42, %v2865_v6  ;;  %v1705_v6 = vsel %vm1693_vm3, %v1687_v57, %v1704_v61  ;;  %v2615_v42 = vsel %vm5900_vm1, 1.0, %v5853_v32  ;;  %v1702_v57 = vsel %vm1692_vm11, %v1699_v2, %v1701_v44 }
 0x31e   : >> { %v3220_v28 = vsub.f32 %v3216_v23, %v3198_v55  ;;  %v717_v55 = vsel %vm710_vm7, %v713_v30, %v716_v15  ;;  %v7228_v23 = vld [vmem:[#allocation83_spill] sm:$0xff]  ;;  %v5977_v61 = vmul.f32 51.0, %v5783_v0  ;;  %v1706_v32 = vsel %vm1692_vm11, %v1703_v58, %v1705_v6  ;;  %v7230_v6 = vld [vmem:[#allocation53_spill] sm:$0xff] }
 0x31f   : >> { %v2893_v49 = vadd.f32 %v7227_v1, %v2887_v62  ;;  %v5972_v24 = vsel %vm707_vm10, nan, %v717_v55  ;;  %v3581_v30 = vadd.s32 4294967169, %v2083_v16  ;;  %v1864_v55 = vxor.u32 2147483648, %v5909_v17 }
 0x320   : >> { %v3226_v13 = vadd.f32 %v7228_v23, %v3220_v28  ;;  %7229 = vst [vmem:[#allocation33_spill] sm:$0xff] %v5972_v24  ;;  %v5983_v28 = vshll.u32 %v1667_v27, 8  ;;  %v2287_v24 = vxor.u32 2147483648, %v5914_v29  ;;  %v2284_v44 = vxor.u32 2147483648, %v5921_v36 }
 0x321   : >> { %v2897_v62 = vmul.f32 %v2893_v49, %v5603_v7  ;;  %v2502_v16 = vand.u32 2139095040, %v5977_v61  ;;  %3921 = vrcp.f32 %v2615_v42  ;;  %vm2283_vm13 = vcmp.eq.s32.totalorder %v2281_v31, 0 }
 0x322   : >> { %v3230_v15 = vmul.f32 %v3226_v13, %v4876_v46  ;;  %v5990_v1 = vmul.u32.u64.low %v5983_v28, %v1702_v57  ;;  %v5991_v22 = vmul.u32.u64.high %v5983_v28, %v1702_v57, %v5990_v1  ;;  %vm2286_vm14 = vcmp.eq.s32.totalorder %v2281_v31, 2 }
 0x323   : >> { %v2901_v2 = vsub.f32 %v2897_v62, %v2879_v19  ;;  %v5995_v58 = vmul.u32.u64.low %v5983_v28, %v1706_v32  ;;  %v5996_v27 = vmul.u32.u64.high %v5983_v28, %v1706_v32, %v5995_v58  ;;  %v2089_v62 = vadd.s32 1, %v3581_v30 }
 0x324   : >> { %v3234_v23 = vsub.f32 %v3230_v15, %v3212_v63  ;;  %v1868_v63 = vsel %vm1866_vm12, %v1867_v10, %v5909_v17  ;;  %v1865_v15 = vsel %vm1863_vm8, %v5898_v41, %v1864_v55  ;;  %v2288_v32 = vsel %vm2286_vm14, %v2287_v24, %v5921_v36 }
 0x325   : >> { %v2907_v45 = vadd.f32 %v7230_v6, %v2901_v2  ;;  %v1696_v42 = vsel %vm1694_vm2, %v5924_v21, 2102212464  ;;  %v1675_v17 = vshrl.u32 %v7085_v20, %v5859_v40  ;;  %v2503_v30 = vshrl.u32 %v2502_v16, 23  ;;  %v7231_v21 = vld [vmem:[#allocation55_spill] sm:$0xff] }
 0x326   : >> { %v3240_v19 = vadd.f32 %v5448_v54, %v3234_v23  ;;  %v2285_v23 = vsel %vm2283_vm13, %v5914_v29, %v2284_v44  ;;  %vm2090_vm0 = vcmp.gt.s32.totalorder %v2089_v62, 0  ;;  %vm2282_vm5 = vcmp.lt.s32.totalorder %v2281_v31, 2 }
 0x327   : >> { %v2911_v57 = vmul.f32 %v2907_v45, %v5603_v7  ;;  %v1695_v36 = vsel %vm1691_vm4, %v1675_v17, %v5916_v53  ;;  %v1697_v29 = vsel %vm1693_vm3, %v5918_v50, %v1696_v42  ;;  %v1869_v40 = vsel %vm1862_vm9, %v1865_v15, %v1868_v63  ;;  %v7232_v17 = vld [vmem:[#allocation30_spill] sm:$0xff] }
 0x328   : >> { %v3244_v2 = vmul.f32 %v3240_v19, %v4876_v46  ;;  %v2289_v55 = vsel %vm2282_vm5, %v2285_v23, %v2288_v32  ;;  %v1717_v44 = vadd.s32 1, %v5991_v22  ;;  %vm1716_vm2 = vc.u32 %v5996_v27, %v5990_v1 }
 0x329   : >> { %v2915_v10 = vsub.f32 %v2911_v57, %v2893_v49  ;;  %v2091_v52 = vsel %vm2090_vm0, %v2089_v62, 0  ;;  %v3597_v31 = vadd.s32 4294967169, %v2503_v30  ;;  %vm2279_vm4 = vweird.f32 %v7212_v34 }
 0x32a   : >> { %v3248_v41 = vsub.f32 %v3244_v2, %v3226_v13  ;;  %v1698_v50 = vsel %vm1692_vm11, %v1695_v36, %v1697_v29  ;;  %v7007_v58 = vand.u32 2147483647, %v5884_v51  ;;  %v1870_v16 = vsel %vm1859_vm15, nan, %v1869_v40 }
 0x32b   : >> { %v2921_v24 = vadd.f32 %v7231_v21, %v2915_v10  ;;  %v2290_v63 = vsel %vm2279_vm4, nan, %v2289_v55  ;;  %v3922_v15 = vpop.eup %3921  ;;  %v1718_v62 = vsel %vm1716_vm2, %v1717_v44, %v5991_v22  ;;  %v2093_v2 = vand.u32 31, %v2091_v52 }
 0x32c   : >> { %v3254_v49 = vadd.f32 %v5483_v59, %v3248_v41  ;;  %v1123_v42 = vand.u32 3, %v5875_v4  ;;  %v1714_v34 = vmul.u32 %v5983_v28, %v1698_v50  ;;  %v2509_v23 = vadd.s32 1, %v3597_v31 }
 0x32d   : >> { %v2925_v13 = vmul.f32 %v2921_v24, %v5603_v7  ;;  %v2649_v30 = vmul.f32 1.442695, %v7232_v17  ;;  %v2086_v47 = vand.u32 8388607, %v7007_v58  ;;  %v6048_v4 = vsub.s32 32, %v2093_v2 }
 0x32e   : >> { %v3258_v53 = vmul.f32 %v3254_v49, %v4876_v46  ;;  %v6044_v41 = vadd.s32 %v1718_v62, %v1714_v34  ;;  %vm1125_vm3 = vcmp.eq.s32.totalorder %v1123_v42, 0  ;;  %vm1128_vm6 = vcmp.eq.s32.totalorder %v1123_v42, 2 }
 0x32f   : >> { %v2929_v57 = vsub.f32 %v2925_v13, %v2907_v45  ;;  %v2603_v45 = vmul.f32 %v2290_v63, %v1870_v16  ;;  %vm2510_vm7 = vcmp.gt.s32.totalorder %v2509_v23, 0  ;;  %v7233_v36 = vxor.u32 2147483648, %v5934_v3 }
 0x330   : >> { %v3262_v32 = vsub.f32 %v3258_v53, %v3240_v19  ;;  %v7234_v40 = vxor.u32 2147483648, %v5928_v26  ;;  %3923 = vpow2.f32 %v2649_v30  ;;  %v2087_v13 = vor.u32 8388608, %v2086_v47 }
 0x331   : >> { %v2935_v37 = vadd.f32 %v4857_v12, %v2929_v57  ;;  %v1127_v29 = vsel %vm1125_vm3, %v5928_v26, %v7233_v36  ;;  %v6056_v44 = vmul.f32 %v3922_v15, %v2603_v45  ;;  %v1720_v53 = vadd.s32 536870912, %v6044_v41 }
 0x332   : >> { %v3268_v10 = vadd.f32 %v5526_v60, %v3262_v32  ;;  %v1130_v55 = vsel %vm1128_vm6, %v7234_v40, %v5934_v3  ;;  %v7008_v50 = vand.u32 2147483647, %v5977_v61  ;;  %vm1124_vm8 = vcmp.lt.s32.totalorder %v1123_v42, 2 }
 0x333   : >> { %v2939_v22 = vmul.f32 %v2935_v37, %v5603_v7  ;;  %v2106_v63 = vshrl.u32 %v7187_v48, %v6048_v4  ;;  %v2511_v57 = vsel %vm2510_vm7, %v2509_v23, 0  ;;  %v1131_v26 = vsel %vm1124_vm8, %v1127_v29, %v1130_v55 }
 0x334   : >> { %v3272_v19 = vmul.f32 %v3268_v10, %v4876_v46  ;;  %v6064_v3 = vshrl.u32 %v2091_v52, 5  ;;  %v2109_v15 = vshrl.u32 %v7189_v38, %v6048_v4  ;;  %v2100_v42 = vshrl.u32 %v7097_v9, %v6048_v4 }
 0x335   : >> { %v2943_v28 = vsub.f32 %v2939_v22, %v2921_v24  ;;  %v2103_v34 = vshrl.u32 %v7186_v43, %v6048_v4  ;;  %v2105_v23 = vshll.u32 %v7186_v43, %v2093_v2  ;;  %v2108_v52 = vshll.u32 %v7187_v48, %v2093_v2 }
 0x336   : >> { %v3276_v31 = vsub.f32 %v3272_v19, %v3254_v49  ;;  %v2097_v49 = vshrl.u32 %v7096_v8, %v6048_v4  ;;  %v2513_v17 = vand.u32 31, %v2511_v57  ;;  %v1132_v47 = vsel %vm707_vm10, nan, %v1131_v26 }
 0x337   : >> { %v2949_v16 = vadd.f32 %v4874_v33, %v2943_v28  ;;  %v2096_v22 = vshll.u32 %v7085_v20, %v2093_v2  ;;  %v2099_v19 = vshll.u32 %v7096_v8, %v2093_v2  ;;  %v2107_v28 = vor.u32 %v2106_v63, %v2105_v23 }
 0x338   : >> { %v3282_v24 = vadd.f32 %v5578_v39, %v3276_v31  ;;  %v2102_v36 = vshll.u32 %v7097_v9, %v2093_v2  ;;  %v2110_v29 = vor.u32 %v2109_v15, %v2108_v52  ;;  %v6083_v40 = vshll.u32 %v2087_v13, 8 }
 0x339   : >> { %v2953_v32 = vmul.f32 %v2949_v16, %v5603_v7  ;;  %v6087_v58 = vor.u32 %v2097_v49, %v2096_v22  ;;  %v6091_v26 = vmul.f32 2.0, %v1132_v47  ;;  %vm2114_vm10 = vcmp.lt.s32.totalorder %v6064_v3, 4 }
 0x33a   : >> { %v3286_v62 = vmul.f32 %v3282_v24, %v4876_v46  ;;  %v6096_v63 = vsub.s32 32, %v2513_v17  ;;  %v6099_v13 = vpop.eup %3923  ;;  %v2120_v49 = vsel %vm2114_vm10, %v2107_v28, 920167782  ;;  %vm2111_vm11 = vcmp.lt.s32.totalorder %v6064_v3, 1 }
 0x33b   : >> { %v2957_v30 = vsub.f32 %v2953_v32, %v2935_v37  ;;  %v6089_v37 = vor.u32 %v2100_v42, %v2099_v19  ;;  %v6102_v32 = vshrl.u32 %v1720_v53, 30  ;;  %vm2112_vm12 = vcmp.lt.s32.totalorder %v6064_v3, 2 }
 0x33c   : >> { %v3290_v45 = vsub.f32 %v3286_v62, %v3268_v10  ;;  %v6093_v10 = vor.u32 %v2103_v34, %v2102_v36  ;;  %v6108_v62 = vand.u32 8388607, %v7008_v50  ;;  %v2124_v42 = vsel %vm2114_vm10, %v2110_v29, 1326507024 }
 0x33d   : >> { %v2963_v55 = vadd.f32 %v7163_v56, %v2957_v30  ;;  %vm2113_vm13 = vcmp.lt.s32.totalorder %v6064_v3, 3  ;;  %v2119_v53 = vsel %vm2111_vm11, %v6087_v58, %v6089_v37  ;;  %v2661_v52 = vmul.f32 %v7173_v11, %v6091_v26 }
 0x33e   : >> { %v3296_v31 = vadd.f32 %v5618_v35, %v3290_v45  ;;  %v2121_v30 = vsel %vm2113_vm13, %v6093_v10, %v2120_v49  ;;  %v2125_v22 = vsel %vm2113_vm13, %v2107_v28, %v2124_v42  ;;  %v6134_v19 = vshrl.u32 %v2511_v57, 5  ;;  %v7235_v42 = vld [vmem:[#allocation35_spill] sm:$0xff] }
 0x33f   : >> { %v2967_v2 = vmul.f32 %v2963_v55, %v5603_v7  ;;  %v2529_v36 = vshrl.u32 %v7189_v38, %v6096_v63  ;;  %v2517_v29 = vshrl.u32 %v7096_v8, %v6096_v63  ;;  %v2523_v28 = vshrl.u32 %v7186_v43, %v6096_v63 }
 0x340   : >> { %v3300_v15 = vmul.f32 %v3296_v31, %v4876_v46  ;;  %v2528_v57 = vshll.u32 %v7187_v48, %v2513_v17  ;;  %v2516_v50 = vshll.u32 %v7085_v20, %v2513_v17  ;;  %v2522_v33 = vshll.u32 %v7097_v9, %v2513_v17 }
 0x341   : >> { %v2971_v34 = vsub.f32 %v2967_v2, %v2949_v16  ;;  %v2123_v16 = vsel %vm2111_vm11, %v6089_v37, %v6093_v10  ;;  %v2520_v2 = vshrl.u32 %v7097_v9, %v6096_v63  ;;  %vm2534_vm14 = vcmp.lt.s32.totalorder %v6134_v19, 4 }
 0x342   : >> { %v3304_v23 = vsub.f32 %v3300_v15, %v3282_v24  ;;  %v2526_v24 = vshrl.u32 %v7187_v48, %v6096_v63  ;;  %v2525_v15 = vshll.u32 %v7186_v43, %v2513_v17  ;;  %v2126_v39 = vsel %vm2112_vm12, %v2123_v16, %v2125_v22  ;;  %v7237_v48 = vld [vmem:[#allocation87_spill] sm:$0xff] }
 0x343   : >> { %v2977_v47 = vadd.f32 %v7170_v18, %v2971_v34  ;;  %v2530_v60 = vor.u32 %v2529_v36, %v2528_v57  ;;  %v2122_v43 = vsel %vm2112_vm12, %v2119_v53, %v2121_v30  ;;  %v6156_v38 = vor.u32 %v2517_v29, %v2516_v50  ;;  %v7239_v36 = vld [vmem:[#allocation88_spill] sm:$0xff] }
 0x344   : >> { %v3310_v45 = vadd.f32 %v5652_v25, %v3304_v23  ;;  %v2667_v23 = vadd.f32 %v7235_v42, %v2661_v52  ;;  %v2519_v25 = vshll.u32 %v7096_v8, %v2513_v17  ;;  %v2527_v18 = vor.u32 %v2526_v24, %v2525_v15  ;;  %v7236_v52 = vld [vmem:[#allocation60_spill] sm:$0xff] }
 0x345   : >> { %v2981_v49 = vmul.f32 %v2977_v47, %v5603_v7  ;;  %v2524_v24 = vor.u32 %v2523_v28, %v2522_v33  ;;  %v2544_v33 = vsel %vm2534_vm14, %v2530_v60, 1326507024  ;;  %vm2531_vm15 = vcmp.lt.s32.totalorder %v6134_v19, 1 }
 0x346   : >> { %v3314_v34 = vmul.f32 %v3310_v45, %v4876_v46  ;;  %v6158_v12 = vor.u32 %v2520_v2, %v2519_v25  ;;  %v2540_v53 = vsel %vm2534_vm14, %v2527_v18, 920167782  ;;  %vm2533_vm9 = vcmp.lt.s32.totalorder %v6134_v19, 3 }
 0x347   : >> { %v2985_v35 = vsub.f32 %v2981_v49, %v2963_v55  ;;  %v2671_v55 = vmul.f32 %v2667_v23, %v6091_v26  ;;  %v2627_v60 = vsel %vm5900_vm1, 0.0, %v6056_v44  ;;  %v1722_v2 = vshll.u32 %v6102_v32, 30 }
 0x348   : >> { %v3318_v56 = vsub.f32 %v3314_v34, %v3296_v31  ;;  %v6165_v31 = vmul.u32.u64.low %v6083_v40, %v2126_v39  ;;  %v6166_v17 = vmul.u32.u64.high %v6083_v40, %v2126_v39, %v6165_v31  ;;  %vm2532_vm0 = vcmp.lt.s32.totalorder %v6134_v19, 2  ;;  %v7241_v34 = vld [vmem:[#allocation54_spill] sm:$0xff] }
 0x349   : >> { %v2991_v42 = vadd.f32 %v7236_v52, %v2985_v35  ;;  %v6173_v35 = vmul.u32.u64.low %v6083_v40, %v2122_v43  ;;  %v6174_v30 = vmul.u32.u64.high %v6083_v40, %v2122_v43, %v6173_v35  ;;  %v2675_v43 = vsub.f32 %v2671_v55, %v7173_v11  ;;  %v7240_v11 = vld [vmem:[#allocation36_spill] sm:$0xff] }
 0x34a   : >> { %v3324_v8 = vadd.f32 %v7237_v48, %v3318_v56  ;;  %v2507_v56 = vor.u32 8388608, %v6108_v62  ;;  %v2543_v62 = vsel %vm2531_vm15, %v6158_v12, %v2524_v24  ;;  %v2095_v14 = vshrl.u32 %v7085_v20, %v6048_v4 }
 0x34b   : >> { %v2995_v50 = vmul.f32 %v2991_v42, %v5603_v7  ;;  %v2681_v15 = vadd.f32 %v7240_v11, %v2675_v43  ;;  %v2116_v44 = vsel %vm2114_vm10, %v6093_v10, 2102212464  ;;  %vm2136_vm1 = vc.u32 %v6166_v17, %v6173_v35 }
 0x34c   : >> { %v3328_v25 = vmul.f32 %v3324_v8, %v4876_v46  ;;  %v2539_v8 = vsel %vm2531_vm15, %v6156_v38, %v6158_v12  ;;  %v2541_v46 = vsel %vm2533_vm9, %v2524_v24, %v2540_v53  ;;  %v2547_v55 = vshll.u32 %v2507_v56, 8 }
 0x34d   : >> { %v2999_v39 = vsub.f32 %v2995_v50, %v2977_v47  ;;  %v2545_v47 = vsel %vm2533_vm9, %v2527_v18, %v2544_v33  ;;  %v2542_v18 = vsel %vm2532_vm0, %v2539_v8, %v2541_v46  ;;  %v2685_v31 = vmul.f32 %v2681_v15, %v6091_v26  ;;  %v7242_v46 = vld [vmem:[#allocation63_spill] sm:$0xff] }
 0x34e   : >> { %v3332_v16 = vsub.f32 %v3328_v25, %v3310_v45  ;;  %v7238_v45 = vld [vmem:[#allocation61_spill] sm:$0xff]  ;;  %v2546_v57 = vsel %vm2532_vm0, %v2543_v62, %v2545_v47  ;;  %v3350_v53 = vmul.f32 1e-08, %v2627_v60  ;;  %v2115_v4 = vsel %vm2111_vm11, %v2095_v14, %v6087_v58 }
 0x34f   : >> { %v3005_v22 = vadd.f32 %v7238_v45, %v2999_v39  ;;  %v6218_v25 = vmul.u32.u64.low %v2547_v55, %v2542_v18  ;;  %v6219_v33 = vmul.u32.u64.high %v2547_v55, %v2542_v18, %v6218_v25  ;;  %v2689_v39 = vsub.f32 %v2685_v31, %v2667_v23 }
 0x350   : >> { %v3338_v29 = vadd.f32 %v7239_v36, %v3332_v16  ;;  %v2117_v56 = vsel %vm2113_vm13, %v6089_v37, %v2116_v44  ;;  %v6225_v16 = vmul.u32.u64.low %v2547_v55, %v2546_v57  ;;  %v6226_v8 = vmul.u32.u64.high %v2547_v55, %v2546_v57, %v6225_v16 }
 0x351   : >> { %v3009_v49 = vmul.f32 %v3005_v22, %v5603_v7  ;;  %v6230_v58 = vsub.s32 %v6044_v41, %v1722_v2  ;;  %v2118_v37 = vsel %vm2112_vm12, %v2115_v4, %v2117_v56  ;;  %v2536_v47 = vsel %vm2534_vm14, %v2524_v24, 2102212464  ;;  %v7247_v16 = vld [vmem:[#allocation39_spill] sm:$0xff] }
 0x352   : >> { %v3342_v28 = vmul.f32 %v3338_v29, %v7241_v34  ;;  %v2515_v41 = vshrl.u32 %v7085_v20, %v6096_v63  ;;  %v2134_v18 = vmul.u32 %v6083_v40, %v2118_v37  ;;  %v2537_v24 = vsel %vm2533_vm9, %v6158_v12, %v2536_v47 }
 0x353   : >> { %v3013_v10 = vsub.f32 %v3009_v49, %v2991_v42  ;;  %v7243_v42 = vld [vmem:[#allocation37_spill] sm:$0xff]  ;;  %v1725_v11 = vsub.s32 0, %v6230_v58  ;;  %v7244_v49 = vld [vmem:[#allocation66_spill] sm:$0xff]  ;;  %v2557_v63 = vadd.s32 1, %v6219_v33  ;;  %vm2556_vm5 = vc.u32 %v6226_v8, %v6218_v25 }
 0x354   : >> { %v3346_v50 = vmul.f32 %v6099_v13, %v3342_v28  ;;  %v2137_v13 = vadd.s32 1, %v6174_v30  ;;  %v2695_v62 = vadd.f32 %v7243_v42, %v2689_v39  ;;  %v2535_v3 = vsel %vm2531_vm15, %v2515_v41, %v6156_v38  ;;  %v7249_v41 = vld [vmem:[#allocation40_spill] sm:$0xff] }
 0x355   : >> { %v3019_v43 = vadd.f32 %v7242_v46, %v3013_v10  ;;  %v2538_v38 = vsel %vm2532_vm0, %v2535_v3, %v2537_v24  ;;  %v2558_v31 = vsel %vm2556_vm5, %v2557_v63, %v6219_v33  ;;  %v7248_v33 = vld [vmem:[#allocation68_spill] sm:$0xff]  ;;  %v7250_v63 = vld [vmem:[#allocation69_spill] sm:$0xff]  ;;  %vm1661_vm6 = vcmp.lt.s32.totalorder %v5783_v0, 0 }
 0x356   : >> { %v3354_v60 = vadd.f32 %v3350_v53, %v3346_v50  ;;  %v2699_v29 = vmul.f32 %v2695_v62, %v6091_v26  ;;  %v2138_v14 = vsel %vm2136_vm1, %v2137_v13, %v6174_v30  ;;  %v3566_v30 = vmin.u32 %v1725_v11, %v6230_v58  ;;  %v7246_v50 = vld [vmem:[#allocation67_spill] sm:$0xff] }
 0x357   : >> { %v3023_v23 = vmul.f32 %v3019_v43, %v5603_v7  ;;  %v2139_v57 = vadd.s32 %v2138_v14, %v2134_v18  ;;  %v2554_v10 = vmul.u32 %v2547_v55, %v2538_v38  ;;  %vm2081_vm8 = vcmp.lt.s32.totalorder %v5884_v51, 0 }
 0x358   : >> { %3359 = vst [vmem:[%s5711_s9] sm:$0xff] %v3354_v60  ;;  %v2703_v44 = vsub.f32 %v2699_v29, %v2681_v15  ;;  %v1727_v56 = vclz %v3566_v30  ;;  %vm2501_vm14 = vcmp.lt.s32.totalorder %v5977_v61, 0  ;;  %vm1751_vm15 = vweird.f32 %v5783_v0 }
 0x359   : >> { %v3027_v2 = vsub.f32 %v3023_v23, %v3005_v22  ;;  %v7245_v22 = vld [vmem:[#allocation38_spill] sm:$0xff]  ;;  %v2140_v4 = vadd.s32 536870912, %v2139_v57  ;;  %v2559_v13 = vadd.s32 %v2558_v31, %v2554_v10 }
 0x35a   : >> { %v2709_v28 = vadd.f32 %v7245_v22, %v2703_v44  ;;  %v3567_v47 = vadd.s32 4294967294, %v1727_v56 }
 0x35b   : >> { %v3033_v34 = vadd.f32 %v7244_v49, %v3027_v2  ;;  %v6269_v19 = vshrl.u32 %v2140_v4, 30  ;;  %v2560_v29 = vadd.s32 536870912, %v2559_v13 }
 0x35c   : >> { %v2713_v15 = vmul.f32 %v2709_v28, %v6091_v26  ;;  %vm3568_vm2 = vcmp.lt.s32.totalorder %v3567_v47, 0 }
 0x35d   : >> { %v3037_v40 = vmul.f32 %v3033_v34, %v5603_v7  ;;  %v2142_v2 = vshll.u32 %v6269_v19, 30  ;;  %v6276_v44 = vshrl.u32 %v2560_v29, 30  ;;  %v1730_v24 = vsel %vm3568_vm2, 0, %v3567_v47 }
 0x35e   : >> { %v2717_v53 = vsub.f32 %v2713_v15, %v2695_v62  ;;  %v1735_v15 = vsub.s32 4294967266, %v1730_v24 }
 0x35f   : >> { %v3041_v12 = vsub.f32 %v3037_v40, %v3019_v43  ;;  %v2562_v30 = vshll.u32 %v6276_v44, 30 }
 0x360   : >> { %v2723_v60 = vadd.f32 %v7247_v16, %v2717_v53  ;;  %v1736_v56 = vadd.s32 127, %v1735_v15  ;;  %v7253_v16 = vld [vmem:[#allocation42_spill] sm:$0xff] }
 0x361   : >> { %v3047_v39 = vadd.f32 %v7246_v50, %v3041_v12  ;;  %v6286_v10 = vsub.s32 %v2559_v13, %v2562_v30 }
 0x362   : >> { %v2727_v23 = vmul.f32 %v2723_v60, %v6091_v26  ;;  %v1737_v13 = vshll.u32 %v1736_v56, 23 }
 0x363   : >> { %v3051_v42 = vmul.f32 %v3047_v39, %v5603_v7 }
 0x364   : >> { %v2731_v43 = vsub.f32 %v2727_v23, %v2709_v28  ;;  %v7251_v28 = vld [vmem:[#allocation41_spill] sm:$0xff]  ;;  %v1738_v15 = vor.u32 4788187, %v1737_v13 }
 0x365   : >> { %v3055_v37 = vsub.f32 %v3051_v42, %v3033_v34  ;;  %v6278_v34 = vsub.s32 %v2139_v57, %v2142_v2  ;;  %v7254_v2 = vld [vmem:[#allocation72_spill] sm:$0xff] }
 0x366   : >> { %v2737_v55 = vadd.f32 %v7249_v41, %v2731_v43  ;;  %v2565_v43 = vsub.s32 0, %v6286_v10  ;;  %v1739_v56 = vand.u32 2147483647, %v1738_v15 }
 0x367   : >> { %v3061_v62 = vadd.f32 %v7248_v33, %v3055_v37  ;;  %v2145_v31 = vsub.s32 0, %v6278_v34  ;;  %v1731_v37 = vsub.s32 32, %v1730_v24 }
 0x368   : >> { %v2741_v14 = vmul.f32 %v2737_v55, %v6091_v26 }
 0x369   : >> { %v3065_v11 = vmul.f32 %v3061_v62, %v5603_v7  ;;  %v3582_v42 = vmin.u32 %v2145_v31, %v6278_v34 }
 0x36a   : >> { %v2745_v3 = vsub.f32 %v2741_v14, %v2723_v60 }
 0x36b   : >> { %v3069_v18 = vsub.f32 %v3065_v11, %v3047_v39  ;;  %v7252_v39 = vld [vmem:[#allocation70_spill] sm:$0xff] }
 0x36c   : >> { %v2751_v40 = vadd.f32 %v7251_v28, %v2745_v3  ;;  %v3598_v28 = vmin.u32 %v2565_v43, %v6286_v10 }
 0x36d   : >> { %v3075_v22 = vadd.f32 %v7250_v63, %v3069_v18  ;;  %v7255_v18 = vld [vmem:[#allocation43_spill] sm:$0xff] }
 0x36e   : >> { %v2755_v12 = vmul.f32 %v2751_v40, %v6091_v26 }
 0x36f   : >> { %v3079_v38 = vmul.f32 %v3075_v22, %v5603_v7 }
 0x370   : >> { %v2759_v4 = vsub.f32 %v2755_v12, %v2737_v55  ;;  %v2147_v55 = vclz %v3582_v42 }
 0x371   : >> { %v3083_v53 = vsub.f32 %v3079_v38, %v3061_v62  ;;  %v1715_v62 = vadd.s32 %v5990_v1, %v5996_v27  ;;  %v1732_v38 = vshll.u32 %v6230_v58, %v1730_v24 }
 0x372   : >> { %v2765_v60 = vadd.f32 %v7253_v16, %v2759_v4  ;;  %v3583_v12 = vadd.s32 4294967294, %v2147_v55  ;;  %v7257_v16 = vld [vmem:[#allocation45_spill] sm:$0xff] }
 0x373   : >> { %v3089_v57 = vadd.f32 %v7252_v39, %v3083_v53  ;;  %v1733_v14 = vshrl.u32 %v1715_v62, %v1731_v37  ;;  %v7256_v53 = vld [vmem:[#allocation73_spill] sm:$0xff] }
 0x374   : >> { %v2769_v47 = vmul.f32 %v2765_v60, %v6091_v26  ;;  %vm3584_vm4 = vcmp.lt.s32.totalorder %v3583_v12, 0 }
 0x375   : >> { %v3093_v23 = vmul.f32 %v3089_v57, %v5603_v7  ;;  %v1734_v1 = vor.u32 %v1733_v14, %v1732_v38 }
 0x376   : >> { %v2773_v41 = vsub.f32 %v2769_v47, %v2751_v40  ;;  %v2567_v40 = vclz %v3598_v28 }
 0x377   : >> { %v3097_v29 = vsub.f32 %v3093_v23, %v3075_v22  ;;  %v1741_v37 = vcvt.s32.f32 %v1734_v1 }
 0x378   : >> { %v2779_v3 = vadd.f32 %v7255_v18, %v2773_v41  ;;  %v3599_v58 = vadd.s32 4294967294, %v2567_v40 }
 0x379   : >> { %v3103_v11 = vadd.f32 %v7254_v2, %v3097_v29  ;;  %v1742_v43 = vmul.f32 %v1741_v37, %v1739_v56  ;;  %v2150_v29 = vsel %vm3584_vm4, 0, %v3583_v12  ;;  %v2135_v37 = vadd.s32 %v6173_v35, %v6166_v17 }
 0x37a   : >> { %v2783_v22 = vmul.f32 %v2779_v3, %v6091_v26  ;;  %v2155_v55 = vsub.s32 4294967266, %v2150_v29  ;;  %vm3600_vm3 = vcmp.lt.s32.totalorder %v3599_v58, 0 }
 0x37b   : >> { %v3107_v30 = vmul.f32 %v3103_v11, %v5603_v7  ;;  %v1743_v18 = vxor.u32 2147483648, %v1742_v43  ;;  %v2570_v38 = vsel %vm3600_vm3, 0, %v3599_v58 }
 0x37c   : >> { %v2787_v27 = vsub.f32 %v2783_v22, %v2765_v60  ;;  %v7259_v60 = vld [vmem:[#allocation46_spill] sm:$0xff]  ;;  %v2575_v40 = vsub.s32 4294967266, %v2570_v38 }
 0x37d   : >> { %v3111_v31 = vsub.f32 %v3107_v30, %v3089_v57  ;;  %v7258_v57 = vld [vmem:[#allocation44_spill] sm:$0xff]  ;;  %v7260_v22 = vld [vmem:[#allocation74_spill] sm:$0xff] }
 0x37e   : >> { %v2793_v42 = vadd.f32 %v7257_v16, %v2787_v27  ;;  %v2151_v27 = vsub.s32 32, %v2150_v29  ;;  %v7262_v16 = vand.u32 2147483647, %v5783_v0 }
 0x37f   : >> { %v3117_v4 = vadd.f32 %v7256_v53, %v3111_v31  ;;  %v7261_v31 = vld [vmem:[#allocation47_spill] sm:$0xff] }
 0x380   : >> { %v2797_v47 = vmul.f32 %v2793_v42, %v6091_v26  ;;  %vm6318_vm7 = vcmp.le.f32.partialorder %v7262_v16, 0.7853982 }
 0x381   : >> { %v3121_v23 = vmul.f32 %v3117_v4, %v5603_v7 }
 0x382   : >> { %v2801_v62 = vsub.f32 %v2797_v47, %v2779_v3  ;;  %v1744_v3 = vsel %vm1661_vm6, %v1743_v18, %v1742_v43  ;;  %v7266_v18 = vld [vmem:[#allocation48_spill] sm:$0xff] }
 0x383   : >> { %v3125_v24 = vsub.f32 %v3121_v23, %v3103_v11  ;;  %v2156_v11 = vadd.s32 127, %v2155_v55  ;;  %v1747_v23 = vsel %vm6318_vm7, %v5783_v0, %v1744_v3  ;;  %v7265_v55 = vld [vmem:[#allocation76_spill] sm:$0xff] }
 0x384   : >> { %v2807_v41 = vadd.f32 %v7259_v60, %v2801_v62  ;;  %v2153_v62 = vshrl.u32 %v2135_v37, %v2151_v27  ;;  %v2576_v60 = vadd.s32 127, %v2575_v40  ;;  %3925 = vcosq.f32 %v1747_v23  ;;  %v7268_v37 = vld [vmem:[#allocation49_spill] sm:$0xff] }
 0x385   : >> { %v3131_v13 = vadd.f32 %v7258_v57, %v3125_v24  ;;  %v2157_v47 = vshll.u32 %v2156_v11, 23  ;;  %v1745_v24 = vsub.s32 4, %v6102_v32  ;;  %3927 = vsinq.f32 %v1747_v23 }
 0x386   : >> { %v2811_v28 = vmul.f32 %v2807_v41, %v6091_v26  ;;  %v2577_v11 = vshll.u32 %v2576_v60, 23  ;;  %v2572_v23 = vshll.u32 %v6286_v10, %v2570_v38 }
 0x387   : >> { %v3135_v14 = vmul.f32 %v3131_v13, %v5603_v7  ;;  %v1746_v17 = vsel %vm1661_vm6, %v1745_v24, %v6102_v32 }
 0x388   : >> { %v2815_v15 = vsub.f32 %v2811_v28, %v2793_v42 }
 0x389   : >> { %v3139_v30 = vsub.f32 %v3135_v14, %v3117_v4 }
 0x38a   : >> { %v2821_v1 = vadd.f32 %v7261_v31, %v2815_v15  ;;  %v2158_v15 = vor.u32 4788187, %v2157_v47  ;;  %v2571_v31 = vsub.s32 32, %v2570_v38  ;;  %v7271_v38 = vld [vmem:[#allocation50_spill] sm:$0xff] }
 0x38b   : >> { %v3145_v12 = vadd.f32 %v7260_v22, %v3139_v30  ;;  %v2152_v30 = vshll.u32 %v6278_v34, %v2150_v29  ;;  %v7267_v29 = vld [vmem:[#allocation77_spill] sm:$0xff] }
 0x38c   : >> { %v2825_v42 = vmul.f32 %v2821_v1, %v6091_v26  ;;  %v7291_v22 = vld [vmem:[#allocation57_spill] sm:$0xff] }
 0x38d   : >> { %v3149_v56 = vmul.f32 %v3145_v12, %v5603_v7 }
 0x38e   : >> { %v2829_v43 = vsub.f32 %v2825_v42, %v2807_v41  ;;  %v2555_v41 = vadd.s32 %v6218_v25, %v6226_v8  ;;  %v1748_v42 = vsel %vm6318_vm7, 0, %v1746_v17  ;;  %v6346_v25 = vmul.f32 0.5, %v5654_v5 }
 0x38f   : >> { %v3153_v58 = vsub.f32 %v3149_v56, %v3131_v13  ;;  %v2154_v13 = vor.u32 %v2153_v62, %v2152_v30  ;;  %v2159_v56 = vand.u32 2147483647, %v2158_v15  ;;  %v3926_v62 = vpop.eup %3925  ;;  %v1752_v60 = vadd.s32 3, %v1748_v42  ;;  %v7270_v30 = vld [vmem:[#allocation78_spill] sm:$0xff]  ;;  %v7272_v42 = vld [vmem:[#allocation79_spill] sm:$0xff] }
 0x390   : >> { %v2835_v28 = vadd.f32 %v7266_v18, %v2829_v43  ;;  %v2573_v34 = vshrl.u32 %v2555_v41, %v2571_v31  ;;  %7269 = vst [vmem:[#allocation80_spill] sm:$0xff] %v6346_v25  ;;  %v3928_v31 = vpop.eup %3927  ;;  %v1454_v10 = vand.u32 2139095040, %v6346_v25 }
 0x391   : >> { %v3159_v14 = vadd.f32 %v7265_v55, %v3153_v58  ;;  %v2161_v32 = vcvt.s32.f32 %v2154_v13  ;;  %v2578_v58 = vor.u32 4788187, %v2577_v11  ;;  %v1753_v13 = vand.u32 3, %v1752_v60 }
 0x392   : >> { %v2839_v35 = vmul.f32 %v2835_v28, %v6091_v26  ;;  %v1759_v11 = vxor.u32 2147483648, %v3926_v62 }
 0x393   : >> { %v3163_v3 = vmul.f32 %v3159_v14, %v5603_v7  ;;  %v2579_v18 = vand.u32 2147483647, %v2578_v58  ;;  %vm1758_vm10 = vcmp.eq.s32.totalorder %v1753_v13, 2  ;;  %v7276_v58 = vld [vmem:[#allocation51_spill] sm:$0xff]  ;;  %vm1755_vm12 = vcmp.eq.s32.totalorder %v1753_v13, 0 }
 0x394   : >> { %v2843_v40 = vsub.f32 %v2839_v35, %v2821_v1  ;;  %v2574_v1 = vor.u32 %v2573_v34, %v2572_v23  ;;  %vm1754_vm13 = vcmp.lt.s32.totalorder %v1753_v13, 2  ;;  %v7279_v13 = vand.u32 2147483647, %v5977_v61 }
 0x395   : >> { %v3167_v27 = vsub.f32 %v3163_v3, %v3145_v12  ;;  %v2162_v12 = vmul.f32 %v2161_v32, %v2159_v56  ;;  %v7273_v32 = vand.u32 2147483647, %v5884_v51 }
 0x396   : >> { %v2849_v47 = vadd.f32 %v7268_v37, %v2843_v40  ;;  %v2581_v35 = vcvt.s32.f32 %v2574_v1  ;;  %v1756_v40 = vxor.u32 2147483648, %v3928_v31  ;;  %vm6381_vm9 = vcmp.le.f32.partialorder %v7279_v13, 0.7853982 }
 0x397   : >> { %v3173_v16 = vadd.f32 %v7267_v29, %v3167_v27  ;;  %v2163_v17 = vxor.u32 2147483648, %v2162_v12  ;;  %vm6360_vm11 = vcmp.le.f32.partialorder %v7273_v32, 0.7853982 }
 0x398   : >> { %v2853_v8 = vmul.f32 %v2849_v47, %v6091_v26 }
 0x399   : >> { %v3177_v24 = vmul.f32 %v3173_v16, %v5603_v7  ;;  %v2164_v34 = vsel %vm2081_vm8, %v2163_v17, %v2162_v12 }
 0x39a   : >> { %v2857_v4 = vsub.f32 %v2853_v8, %v2835_v28  ;;  %v1455_v28 = vshrl.u32 %v1454_v10, 23  ;;  %v2167_v12 = vsel %vm6360_vm11, %v5884_v51, %v2164_v34  ;;  %v2585_v10 = vsub.s32 4, %v6276_v44 }
 0x39b   : >> { %v3181_v43 = vsub.f32 %v3177_v24, %v3159_v14  ;;  %v2582_v14 = vmul.f32 %v2581_v35, %v2579_v18  ;;  %3929 = vcosq.f32 %v2167_v12 }
 0x39c   : >> { %v2863_v3 = vadd.f32 %v7271_v38, %v2857_v4  ;;  %v2165_v4 = vsub.s32 4, %v6269_v19  ;;  %3931 = vsinq.f32 %v2167_v12 }
 0x39d   : >> { %v3187_v15 = vadd.f32 %v7270_v30, %v3181_v43  ;;  %v2583_v8 = vxor.u32 2147483648, %v2582_v14  ;;  %v3557_v43 = vadd.s32 4294967169, %v1455_v28 }
 0x39e   : >> { %v2867_v41 = vmul.f32 %v2863_v3, %v6091_v26 }
 0x39f   : >> { %v3191_v5 = vmul.f32 %v3187_v15, %v5603_v7  ;;  %v2584_v17 = vsel %vm2501_vm14, %v2583_v8, %v2582_v14 }
 0x3a0   : >> { %v2871_v56 = vsub.f32 %v2867_v41, %v2849_v47  ;;  %v1757_v47 = vsel %vm1755_vm12, %v3926_v62, %v1756_v40  ;;  %v7277_v62 = vld [vmem:[#allocation82_spill] sm:$0xff]  ;;  %v7278_v41 = vld [vmem:[#allocation52_spill] sm:$0xff]  ;;  %v2586_v40 = vsel %vm2501_vm14, %v2585_v10, %v6276_v44  ;;  %v2587_v28 = vsel %vm6381_vm9, %v5977_v61, %v2584_v17 }
 0x3a1   : >> { %v3195_v27 = vsub.f32 %v3191_v5, %v3173_v16  ;;  %v1760_v16 = vsel %vm1758_vm10, %v1759_v11, %v3928_v31  ;;  %v1461_v5 = vadd.s32 1, %v3557_v43  ;;  %v2588_v32 = vsel %vm6381_vm9, 0, %v2586_v40 }
 0x3a2   : >> { %v2877_v24 = vadd.f32 %v7276_v58, %v2871_v56  ;;  %v1761_v38 = vsel %vm1754_vm13, %v1757_v47, %v1760_v16  ;;  %3933 = vcosq.f32 %v2587_v28  ;;  %v7282_v16 = vld [vmem:[#allocation83_spill] sm:$0xff]  ;;  %v6397_v44 = vmul.f32 50.0, %v6346_v25 }
 0x3a3   : >> { %v3201_v37 = vadd.f32 %v7272_v42, %v3195_v27  ;;  %v1762_v14 = vsel %vm1751_vm15, nan, %v1761_v38  ;;  %vm1462_vm0 = vcmp.gt.s32.totalorder %v1461_v5, 0  ;;  %3935 = vsinq.f32 %v2587_v28 }
 0x3a4   : >> { %v2881_v60 = vmul.f32 %v2877_v24, %v6091_v26  ;;  %v2610_v58 = vand.u32 2147483647, %v1762_v14  ;;  %v1463_v23 = vsel %vm1462_vm0, %v1461_v5, 0  ;;  %v2592_v12 = vadd.s32 3, %v2588_v32 }
 0x3a5   : >> { %v3205_v1 = vmul.f32 %v3201_v37, %v5603_v7  ;;  %v3930_v43 = vpop.eup %3929  ;;  %v1465_v10 = vand.u32 31, %v1463_v23  ;;  %vm2171_vm12 = vweird.f32 %v5884_v51  ;;  %vm2591_vm13 = vweird.f32 %v5977_v61 }
 0x3a6   : >> { %v2885_v31 = vsub.f32 %v2881_v60, %v2863_v3  ;;  %vm6402_vm1 = vcmp.lt.f32.partialorder %v2610_v58, 1e-05  ;;  %v2179_v27 = vxor.u32 2147483648, %v3930_v43 }
 0x3a7   : >> { %v3209_v18 = vsub.f32 %v3205_v1, %v3187_v15  ;;  %v2166_v15 = vsel %vm2081_vm8, %v2165_v4, %v6269_v19  ;;  %v2618_v5 = vsel %vm6402_vm1, 1.0, %v1762_v14  ;;  %v6417_v40 = vsub.s32 32, %v1465_v10 }
 0x3a8   : >> { %v2891_v11 = vadd.f32 %v7278_v41, %v2885_v31  ;;  %v2168_v19 = vsel %vm6360_vm11, 0, %v2166_v15  ;;  %v1874_v31 = vand.u32 2139095040, %v6397_v44  ;;  %v6410_v41 = vand.u32 3, %v2592_v12 }
 0x3a9   : >> { %v3215_v35 = vadd.f32 %v7277_v62, %v3209_v18  ;;  %v2172_v47 = vadd.s32 3, %v2168_v19  ;;  %v3932_v18 = vpop.eup %3931  ;;  %3937 = vrcp.f32 %v2618_v5  ;;  %v6433_v12 = vmul.f32 51.0, %v6346_v25  ;;  %v7290_v62 = vld [vmem:[#allocation86_spill] sm:$0xff] }
 0x3aa   : >> { %v2895_v0 = vmul.f32 %v2891_v11, %v6091_v26  ;;  %v2176_v13 = vxor.u32 2147483648, %v3932_v18  ;;  %vm2595_vm4 = vcmp.eq.s32.totalorder %v6410_v41, 0  ;;  %vm2598_vm3 = vcmp.eq.s32.totalorder %v6410_v41, 2 }
 0x3ab   : >> { %v3219_v3 = vmul.f32 %v3215_v35, %v5603_v7  ;;  %v6407_v17 = vand.u32 3, %v2172_v47  ;;  %v7285_v47 = vmov 920167782   ;;  %v6439_v5 = vshrl.u32 %v1463_v23, 5 }
 0x3ac   : >> { %v2899_v34 = vsub.f32 %v2895_v0, %v2877_v24  ;;  %v3934_v0 = vpop.eup %3933  ;;  %vm2594_vm8 = vcmp.lt.s32.totalorder %v6410_v41, 2 }
 0x3ad   : >> { %v3223_v56 = vsub.f32 %v3219_v3, %v3201_v37  ;;  %v7025_v3 = vand.u32 2147483647, %v6346_v25  ;;  %vm2175_vm5 = vcmp.eq.s32.totalorder %v6407_v17, 0  ;;  %vm2178_vm2 = vcmp.eq.s32.totalorder %v6407_v17, 2  ;;  %v3936_v14 = vpop.eup %3935 }
 0x3ae   : >> { %v2905_v1 = vadd.f32 %v7230_v6, %v2899_v34  ;;  %v2177_v19 = vsel %vm2175_vm5, %v3930_v43, %v2176_v13  ;;  %v2180_v34 = vsel %vm2178_vm2, %v2179_v27, %v3932_v18  ;;  %vm2174_vm6 = vcmp.lt.s32.totalorder %v6407_v17, 2 }
 0x3af   : >> { %v3229_v8 = vadd.f32 %v7282_v16, %v3223_v56  ;;  %v6427_v58 = vand.u32 8388607, %v7025_v3  ;;  %v2599_v43 = vxor.u32 2147483648, %v3934_v0  ;;  %v7288_v13 = vmov 2475754826  }
 0x3b0   : >> { %v2909_v24 = vmul.f32 %v2905_v1, %v6091_v26  ;;  %v1469_v27 = vshrl.u32 %v7288_v13, %v6417_v40  ;;  %v1480_v3 = vshll.u32 %v7285_v47, %v1465_v10  ;;  %v1471_v25 = vshll.u32 %v7288_v13, %v1465_v10 }
 0x3b1   : >> { %v3233_v37 = vmul.f32 %v3229_v8, %v5603_v7  ;;  %v2600_v29 = vsel %vm2598_vm3, %v2599_v43, %v3936_v14  ;;  %vm1486_vm7 = vcmp.lt.s32.totalorder %v6439_v5, 4  ;;  %vm1483_vm10 = vcmp.lt.s32.totalorder %v6439_v5, 1 }
 0x3b2   : >> { %v2913_v38 = vsub.f32 %v2909_v24, %v2891_v11  ;;  %v1875_v11 = vshrl.u32 %v1874_v31, 23  ;;  %v7286_v24 = vld [vmem:[#allocation56_spill] sm:$0xff]  ;;  %v7287_v31 = vmov 1326507024   ;;  %vm1485_vm11 = vcmp.lt.s32.totalorder %v6439_v5, 3 }
 0x3b3   : >> { %v3237_v4 = vsub.f32 %v3233_v37, %v3215_v35  ;;  %vm1484_vm14 = vcmp.lt.s32.totalorder %v6439_v5, 2 }
 0x3b4   : >> { %v2919_v15 = vadd.f32 %v7231_v21, %v2913_v38  ;;  %v3573_v37 = vadd.s32 4294967169, %v1875_v11  ;;  %v1481_v38 = vshrl.u32 %v7287_v31, %v6417_v40 }
 0x3b5   : >> { %v3243_v6 = vadd.f32 %v5448_v54, %v3237_v4  ;;  %v2294_v54 = vand.u32 2139095040, %v6433_v12 }
 0x3b6   : >> { %v2923_v28 = vmul.f32 %v2919_v15, %v6091_v26 }
 0x3b7   : >> { %v3247_v35 = vmul.f32 %v3243_v6, %v5603_v7 }
 0x3b8   : >> { %v2927_v21 = vsub.f32 %v2923_v28, %v2905_v1  ;;  %v2596_v1 = vxor.u32 2147483648, %v3936_v14 }
 0x3b9   : >> { %v3251_v56 = vsub.f32 %v3247_v35, %v3229_v8  ;;  %v1478_v8 = vshrl.u32 %v7285_v47, %v6417_v40  ;;  %v7289_v35 = vmov 2102212464  }
 0x3ba   : >> { %v2933_v4 = vadd.f32 %v7286_v24, %v2927_v21  ;;  %v1477_v28 = vshll.u32 %v7289_v35, %v1465_v10  ;;  %v1472_v21 = vshrl.u32 %v7097_v9, %v6417_v40  ;;  %v1475_v24 = vshrl.u32 %v7289_v35, %v6417_v40 }
 0x3bb   : >> { %v3257_v32 = vadd.f32 %v5483_v59, %v3251_v56  ;;  %v1468_v59 = vshll.u32 %v7085_v20, %v1465_v10  ;;  %v2597_v30 = vsel %vm2595_vm4, %v3934_v0, %v2596_v1  ;;  %v7292_v1 = vld [vmem:[#allocation62_spill] sm:$0xff] }
 0x3bc   : >> { %v2937_v11 = vmul.f32 %v2933_v4, %v6091_v26  ;;  %v1479_v23 = vor.u32 %v1478_v8, %v1477_v28  ;;  %v1473_v28 = vor.u32 %v1472_v21, %v1471_v25 }
 0x3bd   : >> { %v3261_v18 = vmul.f32 %v3257_v32, %v5603_v7  ;;  %v1470_v55 = vor.u32 %v1469_v27, %v1468_v59  ;;  %v2181_v59 = vsel %vm2174_vm6, %v2177_v19, %v2180_v34  ;;  %v1881_v19 = vadd.s32 1, %v3573_v37 }
 0x3be   : >> { %v2941_v16 = vsub.f32 %v2937_v11, %v2919_v15  ;;  %v3938_v11 = vpop.eup %3937 }
 0x3bf   : >> { %v3265_v56 = vsub.f32 %v3261_v18, %v3243_v6  ;;  %v1474_v6 = vshll.u32 %v7097_v9, %v1465_v10  ;;  %v1482_v18 = vor.u32 %v1481_v38, %v1480_v3  ;;  %v1492_v10 = vsel %vm1486_vm7, %v1479_v23, 920167782 }
 0x3c0   : >> { %v2947_v57 = vadd.f32 %v7291_v22, %v2941_v16  ;;  %v2295_v3 = vshrl.u32 %v2294_v54, 23  ;;  %v1459_v22 = vor.u32 8388608, %v6427_v58  ;;  %v2601_v16 = vsel %vm2594_vm8, %v2597_v30, %v2600_v29 }
 0x3c1   : >> { %v3271_v42 = vadd.f32 %v7290_v62, %v3265_v56  ;;  %v1476_v15 = vor.u32 %v1475_v24, %v1474_v6  ;;  %v1496_v25 = vsel %vm1486_vm7, %v1482_v18, 1326507024  ;;  %v1491_v54 = vsel %vm1483_vm10, %v1470_v55, %v1473_v28  ;;  %v7294_v18 = vld [vmem:[#allocation65_spill] sm:$0xff] }
 0x3c2   : >> { %v2951_v0 = vmul.f32 %v2947_v57, %v6091_v26  ;;  %v1497_v29 = vsel %vm1485_vm11, %v1479_v23, %v1496_v25  ;;  %v3589_v30 = vadd.s32 4294967169, %v2295_v3  ;;  %v2182_v38 = vsel %vm2171_vm12, nan, %v2181_v59  ;;  %v7295_v25 = vld [vmem:[#allocation59_spill] sm:$0xff] }
 0x3c3   : >> { %v3275_v8 = vmul.f32 %v3271_v42, %v5603_v7  ;;  %v1493_v17 = vsel %vm1485_vm11, %v1476_v15, %v1492_v10  ;;  %v1495_v34 = vsel %vm1483_vm10, %v1473_v28, %v1476_v15  ;;  %v2602_v27 = vsel %vm2591_vm13, nan, %v2601_v16 }
 0x3c4   : >> { %v2955_v41 = vsub.f32 %v2951_v0, %v2933_v4  ;;  %v1494_v37 = vsel %vm1484_vm14, %v1491_v54, %v1493_v17  ;;  %v1498_v24 = vsel %vm1484_vm14, %v1495_v34, %v1497_v29  ;;  %v1499_v23 = vshll.u32 %v1459_v22, 8 }
 0x3c5   : >> { %v3279_v14 = vsub.f32 %v3275_v8, %v3257_v32  ;;  %v7293_v32 = vld [vmem:[#allocation58_spill] sm:$0xff]  ;;  %vm1882_vm15 = vcmp.gt.s32.totalorder %v1881_v19, 0  ;;  %v2301_v51 = vadd.s32 1, %v3589_v30  ;;  %v2606_v61 = vmul.f32 %v2602_v27, %v2182_v38  ;;  %v7296_v30 = vld [vmem:[#allocation32_spill] sm:$0xff] }
 0x3c6   : >> { %v2961_v58 = vadd.f32 %v7293_v32, %v2955_v41  ;;  %v6493_v10 = vmul.u32.u64.low %v1499_v23, %v1494_v37  ;;  %v6494_v3 = vmul.u32.u64.high %v1499_v23, %v1494_v37, %v6493_v10  ;;  %v1488_v22 = vsel %vm1486_vm7, %v1476_v15, 2102212464  ;;  %v7297_v38 = vld [vmem:[#allocation34_spill] sm:$0xff] }
 0x3c7   : >> { %v3285_v43 = vadd.f32 %v7292_v1, %v3279_v14  ;;  %v6497_v0 = vmul.u32.u64.low %v1499_v23, %v1498_v24  ;;  %v6498_v59 = vmul.u32.u64.high %v1499_v23, %v1498_v24, %v6497_v0  ;;  %v1883_v14 = vsel %vm1882_vm15, %v1881_v19, 0 }
 0x3c8   : >> { %v2965_v56 = vmul.f32 %v2961_v58, %v6091_v26  ;;  %v2626_v41 = vmul.f32 %v3938_v11, %v2606_v61  ;;  %v1467_v54 = vshrl.u32 %v7085_v20, %v6417_v40  ;;  %vm2302_vm9 = vcmp.gt.s32.totalorder %v2301_v51, 0 }
 0x3c9   : >> { %v3289_v4 = vmul.f32 %v3285_v43, %v5603_v7  ;;  %v1885_v29 = vand.u32 31, %v1883_v14  ;;  %v2655_v19 = vmul.f32 1.442695, %v7296_v30  ;;  %v2303_v40 = vsel %vm2302_vm9, %v2301_v51, 0 }
 0x3ca   : >> { %v2969_v6 = vsub.f32 %v2965_v56, %v2947_v57  ;;  %v1871_v57 = vand.u32 2147483647, %v6397_v44  ;;  %v1487_v32 = vsel %vm1483_vm10, %v1467_v54, %v1470_v55  ;;  %vm1508_vm0 = vc.u32 %v6498_v59, %v6493_v10 }
 0x3cb   : >> { %v3293_v21 = vsub.f32 %v3289_v4, %v3271_v42  ;;  %v1489_v4 = vsel %vm1485_vm11, %v1473_v28, %v1488_v22  ;;  %v1509_v28 = vadd.s32 1, %v6494_v3  ;;  %3939 = vpow2.f32 %v2655_v19 }
 0x3cc   : >> { %v2975_v42 = vadd.f32 %v7295_v25, %v2969_v6  ;;  %v6516_v11 = vand.u32 8388607, %v1871_v57  ;;  %v1490_v55 = vsel %vm1484_vm14, %v1487_v32, %v1489_v4  ;;  %v6532_v5 = vshrl.u32 %v1883_v14, 5 }
 0x3cd   : >> { %v3299_v8 = vadd.f32 %v7294_v18, %v3293_v21  ;;  %v2305_v21 = vand.u32 31, %v2303_v40  ;;  %v1506_v61 = vmul.u32 %v1499_v23, %v1490_v55  ;;  %v1894_v19 = vshll.u32 %v7097_v9, %v1885_v29 }
 0x3ce   : >> { %v2979_v17 = vmul.f32 %v2975_v42, %v6091_v26  ;;  %v1879_v51 = vor.u32 8388608, %v6516_v11  ;;  %v1897_v32 = vshll.u32 %v7289_v35, %v1885_v29  ;;  %vm1903_vm2 = vcmp.lt.s32.totalorder %v6532_v5, 1 }
 0x3cf   : >> { %v3303_v16 = vmul.f32 %v3299_v8, %v5603_v7  ;;  %v6544_v23 = vsub.s32 32, %v2305_v21  ;;  %vm1905_vm4 = vcmp.lt.s32.totalorder %v6532_v5, 3  ;;  %vm1904_vm7 = vcmp.lt.s32.totalorder %v6532_v5, 2 }
 0x3d0   : >> { %v2983_v15 = vsub.f32 %v2979_v17, %v2961_v58  ;;  %v6525_v58 = vsub.s32 32, %v1885_v29  ;;  %v1891_v17 = vshll.u32 %v7288_v13, %v1885_v29 }
 0x3d1   : >> { %v3307_v34 = vsub.f32 %v3303_v16, %v3285_v43  ;;  %v2630_v43 = vsel %vm6402_vm1, 0.0, %v2626_v41  ;;  %v1510_v16 = vsel %vm1508_vm0, %v1509_v28, %v6494_v3  ;;  %v1888_v3 = vshll.u32 %v7085_v20, %v1885_v29 }
 0x3d2   : >> { %v2989_v37 = vadd.f32 %v7236_v52, %v2983_v15  ;;  %v2291_v52 = vand.u32 2147483647, %v6433_v12  ;;  %v3353_v6 = vmul.f32 1e-08, %v2630_v43  ;;  %v1889_v22 = vshrl.u32 %v7288_v13, %v6525_v58 }
 0x3d3   : >> { %v3313_v27 = vadd.f32 %v7297_v38, %v3307_v34  ;;  %v1892_v41 = vshrl.u32 %v7097_v9, %v6525_v58  ;;  %v1898_v54 = vshrl.u32 %v7285_v47, %v6525_v58  ;;  %v1901_v34 = vshrl.u32 %v7287_v31, %v6525_v58 }
 0x3d4   : >> { %v2993_v24 = vmul.f32 %v2989_v37, %v6091_v26  ;;  %v6552_v30 = vadd.s32 %v1510_v16, %v1506_v61  ;;  %v6557_v43 = vor.u32 %v1889_v22, %v1888_v3  ;;  %v2318_v28 = vshrl.u32 %v7285_v47, %v6544_v23 }
 0x3d5   : >> { %v3317_v56 = vmul.f32 %v3313_v27, %v5603_v7  ;;  %v1899_v55 = vor.u32 %v1898_v54, %v1897_v32  ;;  %vm1906_vm1 = vcmp.lt.s32.totalorder %v6532_v5, 4  ;;  %v2317_v16 = vshll.u32 %v7289_v35, %v2305_v21 }
 0x3d6   : >> { %v2997_v0 = vsub.f32 %v2993_v24, %v2975_v42  ;;  %v2315_v54 = vshrl.u32 %v7289_v35, %v6544_v23  ;;  %vm1873_vm0 = vcmp.lt.s32.totalorder %v6397_v44, 0 }
 0x3d7   : >> { %v3321_v60 = vsub.f32 %v3317_v56, %v3299_v8  ;;  %v1895_v8 = vshrl.u32 %v7289_v35, %v6525_v58  ;;  %v2319_v3 = vor.u32 %v2318_v28, %v2317_v16 }
 0x3d8   : >> { %v3003_v14 = vadd.f32 %v7238_v45, %v2997_v0  ;;  %v6559_v45 = vor.u32 %v1892_v41, %v1891_v17  ;;  %v3940_v0 = vpop.eup %3939  ;;  %v7298_v41 = vld [vmem:[#allocation81_spill] sm:$0xff] }
 0x3d9   : >> { %v3327_v25 = vadd.f32 %v7237_v48, %v3321_v60  ;;  %v6562_v56 = vor.u32 %v1895_v8, %v1894_v19  ;;  %v2312_v8 = vshrl.u32 %v7097_v9, %v6544_v23  ;;  %v2314_v19 = vshll.u32 %v7097_v9, %v2305_v21 }
 0x3da   : >> { %v3007_v4 = vmul.f32 %v3003_v14, %v6091_v26 }
 0x3db   : >> { %v3331_v42 = vmul.f32 %v3327_v25, %v5603_v7  ;;  %v1900_v7 = vshll.u32 %v7285_v47, %v1885_v29  ;;  %v6570_v25 = vshrl.u32 %v2303_v40, 5  ;;  %v2309_v29 = vshrl.u32 %v7288_v13, %v6544_v23 }
 0x3dc   : >> { %v3011_v24 = vsub.f32 %v3007_v4, %v2989_v37  ;;  %v1912_v40 = vsel %vm1906_vm1, %v1899_v55, 920167782  ;;  %v2316_v28 = vor.u32 %v2315_v54, %v2314_v19 }
 0x3dd   : >> { %v3335_v15 = vsub.f32 %v3331_v42, %v3313_v27  ;;  %v1902_v61 = vor.u32 %v1901_v34, %v1900_v7  ;;  %v2321_v27 = vshrl.u32 %v7287_v31, %v6544_v23  ;;  %v2320_v31 = vshll.u32 %v7285_v47, %v2305_v21 }
 0x3de   : >> { %v3017_v22 = vadd.f32 %v7242_v46, %v3011_v24  ;;  %v2308_v42 = vshll.u32 %v7085_v20, %v2305_v21  ;;  %v2311_v46 = vshll.u32 %v7288_v13, %v2305_v21  ;;  %v2298_v47 = vand.u32 8388607, %v2291_v52 }
 0x3df   : >> { %v3341_v60 = vadd.f32 %v7239_v36, %v3335_v15  ;;  %v2322_v32 = vor.u32 %v2321_v27, %v2320_v31  ;;  %v1916_v35 = vsel %vm1906_vm1, %v1902_v61, 1326507024  ;;  %vm2326_vm5 = vcmp.lt.s32.totalorder %v6570_v25, 4 }
 0x3e0   : >> { %v3021_v17 = vmul.f32 %v3017_v22, %v6091_v26  ;;  %v2310_v4 = vor.u32 %v2309_v29, %v2308_v42  ;;  %v2313_v24 = vor.u32 %v2312_v8, %v2311_v46  ;;  %v2332_v9 = vsel %vm2326_vm5, %v2319_v3, 920167782 }
 0x3e1   : >> { %v3345_v37 = vmul.f32 %v3341_v60, %v7298_v41  ;;  %v1911_v21 = vsel %vm1903_vm2, %v6557_v43, %v6559_v45  ;;  %v2336_v60 = vsel %vm2326_vm5, %v2322_v32, 1326507024  ;;  %vm2323_vm3 = vcmp.lt.s32.totalorder %v6570_v25, 1 }
 0x3e2   : >> { %v3025_v15 = vsub.f32 %v3021_v17, %v3003_v14  ;;  %v1915_v14 = vsel %vm1903_vm2, %v6559_v45, %v6562_v56  ;;  %vm2325_vm6 = vcmp.lt.s32.totalorder %v6570_v25, 3  ;;  %v2299_v27 = vor.u32 8388608, %v2298_v47 }
 0x3e3   : >> { %v3349_v34 = vmul.f32 %v3940_v0, %v3345_v37  ;;  %v2331_v0 = vsel %vm2323_vm3, %v2310_v4, %v2313_v24  ;;  %v2333_v29 = vsel %vm2325_vm6, %v2316_v28, %v2332_v9  ;;  %v2337_v41 = vsel %vm2325_vm6, %v2319_v3, %v2336_v60 }
 0x3e4   : >> { %v3031_v13 = vadd.f32 %v7244_v49, %v3025_v15  ;;  %v1917_v49 = vsel %vm1905_vm4, %v1899_v55, %v1916_v35  ;;  %v2335_v55 = vsel %vm2323_vm3, %v2313_v24, %v2316_v28  ;;  %v1512_v8 = vadd.s32 536870912, %v6552_v30 }
 0x3e5   : >> { %v3357_v7 = vadd.f32 %v3353_v6, %v3349_v34  ;;  %v1913_v6 = vsel %vm1905_vm4, %v6562_v56, %v1912_v40  ;;  %v1918_v54 = vsel %vm1904_vm7, %v1915_v14, %v1917_v49  ;;  %v1919_v31 = vshll.u32 %v1879_v51, 8 }
 0x3e6   : >> { %v3035_v61 = vmul.f32 %v3031_v13, %v6091_v26  ;;  %v1914_v16 = vsel %vm1904_vm7, %v1911_v21, %v1913_v6  ;;  %vm2324_vm8 = vcmp.lt.s32.totalorder %v6570_v25, 2  ;;  %v2339_v3 = vshll.u32 %v2299_v27, 8 }
 0x3e7   : >> { %3362 = vst [vmem:[%s5711_s9 + $0x18] sm:$0xff] %v3357_v7  ;;  %v2334_v40 = vsel %vm2324_vm8, %v2331_v0, %v2333_v29  ;;  %v6637_v17 = vmul.u32.u64.low %v1919_v31, %v1914_v16  ;;  %v6638_v34 = vmul.u32.u64.high %v1919_v31, %v1914_v16, %v6637_v17  ;;  %v6647_v51 = vshrl.u32 %v1512_v8, 30 }
 0x3e8   : >> { %v3039_v37 = vsub.f32 %v3035_v61, %v3017_v22  ;;  %v2338_v22 = vsel %vm2324_vm8, %v2335_v55, %v2337_v41  ;;  %v6643_v46 = vmul.u32.u64.low %v1919_v31, %v1918_v54  ;;  %v6644_v19 = vmul.u32.u64.high %v1919_v31, %v1918_v54, %v6643_v46 }
 0x3e9   : >> { %v6649_v32 = vmul.u32.u64.low %v2339_v3, %v2334_v40  ;;  %v6650_v35 = vmul.u32.u64.high %v2339_v3, %v2334_v40, %v6649_v32  ;;  %v1908_v7 = vsel %vm1906_vm1, %v6562_v56, 2102212464  ;;  %v1887_v9 = vshrl.u32 %v7085_v20, %v6525_v58 }
 0x3ea   : >> { %v3045_v42 = vadd.f32 %v7246_v50, %v3039_v37  ;;  %v6653_v50 = vmul.u32.u64.low %v2339_v3, %v2338_v22  ;;  %v6654_v47 = vmul.u32.u64.high %v2339_v3, %v2338_v22, %v6653_v50  ;;  %v1514_v6 = vshll.u32 %v6647_v51, 30 }
 0x3eb   : >> { %v2328_v14 = vsel %vm2326_vm5, %v2316_v28, 2102212464  ;;  %v1907_v60 = vsel %vm1903_vm2, %v1887_v9, %v6557_v43  ;;  %v2307_v56 = vshrl.u32 %v7085_v20, %v6544_v23  ;;  %vm1928_vm10 = vc.u32 %v6644_v19, %v6637_v17 }
 0x3ec   : >> { %v3049_v11 = vmul.f32 %v3045_v42, %v6091_v26  ;;  %v2329_v43 = vsel %vm2325_vm6, %v2313_v24, %v2328_v14  ;;  %v2349_v61 = vadd.s32 1, %v6650_v35  ;;  %v1515_v20 = vsub.s32 %v6552_v30, %v1514_v6  ;;  %v7299_v14 = vld [vmem:[#allocation44_spill] sm:$0xff] }
 0x3ed   : >> { %v2327_v28 = vsel %vm2323_vm3, %v2307_v56, %v2310_v4  ;;  %vm2348_vm11 = vc.u32 %v6654_v47, %v6649_v32  ;;  %vm2293_vm1 = vcmp.lt.s32.totalorder %v6433_v12, 0  ;;  %vm6763_vm5 = vcmp.le.f32.partialorder %v1871_v57, 0.7853982  ;;  %v7316_v57 = vld [vmem:[#allocation85_spill] sm:$0xff] }
 0x3ee   : >> { %v3053_v15 = vsub.f32 %v3049_v11, %v3031_v13  ;;  %v1909_v13 = vsel %vm1905_vm4, %v6559_v45, %v1908_v7  ;;  %v2330_v4 = vsel %vm2324_vm8, %v2327_v28, %v2329_v43  ;;  %v2350_v5 = vsel %vm2348_vm11, %v2349_v61, %v6650_v35 }
 0x3ef   : >> { %v1910_v45 = vsel %vm1904_vm7, %v1907_v60, %v1909_v13  ;;  %v1517_v29 = vsub.s32 0, %v1515_v20  ;;  %v2346_v55 = vmul.u32 %v2339_v3, %v2330_v4  ;;  %v1507_v4 = vadd.s32 %v6493_v10, %v6498_v59 }
 0x3f0   : >> { %v3059_v21 = vadd.f32 %v7248_v33, %v3053_v15  ;;  %v1929_v33 = vadd.s32 1, %v6638_v34  ;;  %v1926_v0 = vmul.u32 %v1919_v31, %v1910_v45  ;;  %vm6774_vm3 = vcmp.le.f32.partialorder %v2291_v52, 0.7853982 }
 0x3f1   : >> { %v2351_v30 = vadd.s32 %v2350_v5, %v2346_v55  ;;  %v3558_v8 = vmin.u32 %v1517_v29, %v1515_v20  ;;  %v7301_v55 = vld [vmem:[#allocation76_spill] sm:$0xff] }
 0x3f2   : >> { %v3063_v58 = vmul.f32 %v3059_v21, %v6091_v26  ;;  %v1930_v27 = vsel %vm1928_vm10, %v1929_v33, %v6638_v34 }
 0x3f3   : >> { %v1931_v16 = vadd.s32 %v1930_v27, %v1926_v0  ;;  %v2352_v40 = vadd.s32 536870912, %v2351_v30  ;;  %v1519_v25 = vclz %v3558_v8 }
 0x3f4   : >> { %v3067_v49 = vsub.f32 %v3063_v58, %v3045_v42 }
 0x3f5   : >> { %v1932_v54 = vadd.s32 536870912, %v1931_v16  ;;  %v6698_v22 = vshrl.u32 %v2352_v40, 30  ;;  %v3559_v3 = vadd.s32 4294967294, %v1519_v25  ;;  %v7302_v25 = vld [vmem:[#allocation77_spill] sm:$0xff] }
 0x3f6   : >> { %v3073_v23 = vadd.f32 %v7250_v63, %v3067_v49  ;;  %v7300_v49 = vld [vmem:[#allocation74_spill] sm:$0xff] }
 0x3f7   : >> { %v6695_v34 = vshrl.u32 %v1932_v54, 30  ;;  %vm3560_vm12 = vcmp.lt.s32.totalorder %v3559_v3, 0  ;;  %v2377_v52 = vsub.s32 4, %v6698_v22 }
 0x3f8   : >> { %v3077_v24 = vmul.f32 %v3073_v23, %v6091_v26 }
 0x3f9   : >> { %v1934_v11 = vshll.u32 %v6695_v34, 30 }
 0x3fa   : >> { %v3081_v41 = vsub.f32 %v3077_v24, %v3059_v21  ;;  %v1522_v21 = vsel %vm3560_vm12, 0, %v3559_v3 }
 0x3fb   : >> { %v6704_v15 = vsub.s32 %v1931_v16, %v1934_v11  ;;  %v1527_v13 = vsub.s32 4294967266, %v1522_v21  ;;  %v1523_v61 = vsub.s32 32, %v1522_v21 }
 0x3fc   : >> { %v3087_v37 = vadd.f32 %v7252_v39, %v3081_v41  ;;  %v2354_v39 = vshll.u32 %v6698_v22, 30 }
 0x3fd   : >> { %v1937_v6 = vsub.s32 0, %v6704_v15  ;;  %v1528_v28 = vadd.s32 127, %v1527_v13  ;;  %v1525_v29 = vshrl.u32 %v1507_v4, %v1523_v61 }
 0x3fe   : >> { %v3091_v63 = vmul.f32 %v3087_v37, %v6091_v26  ;;  %v6707_v9 = vsub.s32 %v2351_v30, %v2354_v39  ;;  %v1524_v30 = vshll.u32 %v1515_v20, %v1522_v21 }
 0x3ff   : >> { %v1529_v0 = vshll.u32 %v1528_v28, 23 }
 0x400   : >> { %v3095_v42 = vsub.f32 %v3091_v63, %v3073_v23  ;;  %v2357_v56 = vsub.s32 0, %v6707_v9  ;;  %v1526_v63 = vor.u32 %v1525_v29, %v1524_v30 }
 0x402   : >> { %v3101_v31 = vadd.f32 %v7254_v2, %v3095_v42  ;;  %v3590_v43 = vmin.u32 %v2357_v56, %v6707_v9  ;;  %v1533_v59 = vcvt.s32.f32 %v1526_v63  ;;  %v7304_v56 = vld [vmem:[#allocation80_spill] sm:$0xff] }
 0x403   : >> { %vm1453_vm15 = vcmp.lt.s32.totalorder %v7304_v56, 0  ;;  %vm1543_vm7 = vweird.f32 %v7304_v56 }
 0x404   : >> { %v3105_v46 = vmul.f32 %v3101_v31, %v6091_v26  ;;  %v2359_v24 = vclz %v3590_v43  ;;  %v7305_v43 = vld [vmem:[#allocation79_spill] sm:$0xff] }
 0x406   : >> { %v3109_v35 = vsub.f32 %v3105_v46, %v3087_v37  ;;  %v1530_v37 = vor.u32 4788187, %v1529_v0  ;;  %v3591_v8 = vadd.s32 4294967294, %v2359_v24 }
 0x408   : >> { %v3115_v50 = vadd.f32 %v7256_v53, %v3109_v35  ;;  %v3574_v53 = vmin.u32 %v1937_v6, %v6704_v15  ;;  %v1531_v42 = vand.u32 2147483647, %v1530_v37  ;;  %vm3592_vm14 = vcmp.lt.s32.totalorder %v3591_v8, 0  ;;  %v7309_v37 = vld [vmem:[#allocation82_spill] sm:$0xff] }
 0x409   : >> { %v2362_v3 = vsel %vm3592_vm14, 0, %v3591_v8 }
 0x40a   : >> { %v3119_v7 = vmul.f32 %v3115_v50, %v6091_v26  ;;  %v1939_v23 = vclz %v3574_v53  ;;  %v1534_v11 = vmul.f32 %v1533_v59, %v1531_v42  ;;  %v2367_v20 = vsub.s32 4294967266, %v2362_v3 }
 0x40b   : >> { %v2363_v28 = vsub.s32 32, %v2362_v3 }
 0x40c   : >> { %v3123_v2 = vsub.f32 %v3119_v7, %v3101_v31  ;;  %v3575_v16 = vadd.s32 4294967294, %v1939_v23 }
 0x40e   : >> { %v3129_v60 = vadd.f32 %v7299_v14, %v3123_v2  ;;  %vm3576_vm13 = vcmp.lt.s32.totalorder %v3575_v16, 0  ;;  %v1535_v2 = vxor.u32 2147483648, %v1534_v11 }
 0x40f   : >> { %v1942_v10 = vsel %vm3576_vm13, 0, %v3575_v16  ;;  %v1537_v16 = vsub.s32 4, %v6647_v51 }
 0x410   : >> { %v3133_v58 = vmul.f32 %v3129_v60, %v6091_v26  ;;  %v1947_v35 = vsub.s32 4294967266, %v1942_v10  ;;  %v1943_v14 = vsub.s32 32, %v1942_v10  ;;  %v1536_v53 = vsel %vm1453_vm15, %v1535_v2, %v1534_v11 }
 0x411   : >> { %v1944_v0 = vshll.u32 %v6704_v15, %v1942_v10  ;;  %v1538_v15 = vsel %vm1453_vm15, %v1537_v16, %v6647_v51  ;;  %v7310_v10 = vld [vmem:[#allocation83_spill] sm:$0xff]  ;;  %v7311_v51 = vld [vmem:[#allocation84_spill] sm:$0xff] }
 0x412   : >> { %v3137_v33 = vsub.f32 %v3133_v58, %v3115_v50  ;;  %v7303_v50 = vld [vmem:[#allocation78_spill] sm:$0xff]  ;;  %v1948_v21 = vadd.s32 127, %v1947_v35  ;;  %v1927_v58 = vadd.s32 %v6637_v17, %v6644_v19 }
 0x414   : >> { %v3143_v45 = vadd.f32 %v7300_v49, %v3137_v33  ;;  %v1949_v33 = vshll.u32 %v1948_v21, 23  ;;  %v1945_v23 = vshrl.u32 %v1927_v58, %v1943_v14 }
 0x416   : >> { %v3147_v27 = vmul.f32 %v3143_v45, %v6091_v26  ;;  %v1950_v24 = vor.u32 4788187, %v1949_v33 }
 0x418   : >> { %v3151_v5 = vsub.f32 %v3147_v27, %v3129_v60  ;;  %v2368_v60 = vadd.s32 127, %v2367_v20  ;;  %v2347_v27 = vadd.s32 %v6649_v32, %v6654_v47  ;;  %v1951_v47 = vand.u32 2147483647, %v1950_v24 }
 0x41a   : >> { %v3157_v41 = vadd.f32 %v7301_v55, %v3151_v5  ;;  %v2369_v4 = vshll.u32 %v2368_v60, 23  ;;  %v2365_v5 = vshrl.u32 %v2347_v27, %v2363_v28  ;;  %v1946_v55 = vor.u32 %v1945_v23, %v1944_v0 }
 0x41b   : >> { %v1957_v27 = vsub.s32 4, %v6695_v34 }
 0x41c   : >> { %v3161_v54 = vmul.f32 %v3157_v41, %v6091_v26  ;;  %v2370_v30 = vor.u32 4788187, %v2369_v4  ;;  %v1953_v63 = vcvt.s32.f32 %v1946_v55 }
 0x41d   : >> { %v1958_v0 = vsel %vm1873_vm0, %v1957_v27, %v6695_v34 }
 0x41e   : >> { %v3165_v40 = vsub.f32 %v3161_v54, %v3143_v45  ;;  %v7306_v45 = vand.u32 2147483647, %v7304_v56  ;;  %v1960_v55 = vsel %vm6763_vm5, 0, %v1958_v0 }
 0x420   : >> { %v3171_v31 = vadd.f32 %v7302_v25, %v3165_v40  ;;  %vm6733_vm9 = vcmp.le.f32.partialorder %v7306_v45, 0.7853982  ;;  %v2371_v40 = vand.u32 2147483647, %v2370_v30  ;;  %v1954_v25 = vmul.f32 %v1953_v63, %v1951_v47 }
 0x421   : >> { %v1539_v19 = vsel %vm6733_vm9, %v7304_v56, %v1536_v53  ;;  %v1540_v59 = vsel %vm6733_vm9, 0, %v1538_v15  ;;  %vm1963_vm9 = vweird.f32 %v6397_v44 }
 0x422   : >> { %v3175_v46 = vmul.f32 %v3171_v31, %v6091_v26  ;;  %3941 = vcosq.f32 %v1539_v19  ;;  %v1544_v11 = vadd.s32 3, %v1540_v59  ;;  %v1955_v35 = vxor.u32 2147483648, %v1954_v25 }
 0x423   : >> { %3943 = vsinq.f32 %v1539_v19 }
 0x424   : >> { %v3179_v39 = vsub.f32 %v3175_v46, %v3157_v41  ;;  %v2364_v41 = vshll.u32 %v6707_v9, %v2362_v3  ;;  %v1545_v21 = vand.u32 3, %v1544_v11 }
 0x426   : >> { %v3185_v7 = vadd.f32 %v7303_v50, %v3179_v39  ;;  %v2366_v8 = vor.u32 %v2365_v5, %v2364_v41  ;;  %vm1547_vm2 = vcmp.eq.s32.totalorder %v1545_v21, 0  ;;  %vm1550_vm4 = vcmp.eq.s32.totalorder %v1545_v21, 2 }
 0x427   : >> { %vm1546_vm6 = vcmp.lt.s32.totalorder %v1545_v21, 2 }
 0x428   : >> { %v3189_v6 = vmul.f32 %v3185_v7, %v6091_v26 }
 0x42a   : >> { %v3193_v13 = vsub.f32 %v3189_v6, %v3171_v31  ;;  %v2373_v31 = vcvt.s32.f32 %v2366_v8  ;;  %v1956_v6 = vsel %vm1873_vm0, %v1955_v35, %v1954_v25  ;;  %vm2383_vm0 = vweird.f32 %v6433_v12 }
 0x42b   : >> { %v1959_v28 = vsel %vm6763_vm5, %v6397_v44, %v1956_v6 }
 0x42c   : >> { %v3199_v49 = vadd.f32 %v7305_v43, %v3193_v13  ;;  %v2374_v46 = vmul.f32 %v2373_v31, %v2371_v40  ;;  %v3942_v20 = vpop.eup %3941  ;;  %3945 = vcosq.f32 %v1959_v28 }
 0x42d   : >> { %v3944_v50 = vpop.eup %3943  ;;  %v1551_v13 = vxor.u32 2147483648, %v3942_v20  ;;  %3947 = vsinq.f32 %v1959_v28 }
 0x42e   : >> { %v3203_v17 = vmul.f32 %v3199_v49, %v6091_v26  ;;  %v1548_v60 = vxor.u32 2147483648, %v3944_v50 }
 0x42f   : >> { %v1552_v61 = vsel %vm1550_vm4, %v1551_v13, %v3944_v50  ;;  %v7319_v50 = vld [vmem:[#allocation31_spill] sm:$0xff] }
 0x430   : >> { %v3207_v29 = vsub.f32 %v3203_v17, %v3185_v7  ;;  %v2375_v7 = vxor.u32 2147483648, %v2374_v46  ;;  %v1549_v45 = vsel %vm1547_vm2, %v3942_v20, %v1548_v60 }
 0x431   : >> { %v1553_v17 = vsel %vm1546_vm6, %v1549_v45, %v1552_v61 }
 0x432   : >> { %v3213_v32 = vadd.f32 %v7309_v37, %v3207_v29  ;;  %v2376_v53 = vsel %vm2293_vm1, %v2375_v7, %v2374_v46  ;;  %v1554_v5 = vsel %vm1543_vm7, nan, %v1553_v17  ;;  %v2378_v29 = vsel %vm2293_vm1, %v2377_v52, %v6698_v22 }
 0x433   : >> { %v2379_v23 = vsel %vm6774_vm3, %v6433_v12, %v2376_v53  ;;  %v2380_v41 = vsel %vm6774_vm3, 0, %v2378_v29  ;;  %v2608_v56 = vand.u32 2147483647, %v1554_v5  ;;  %v2651_v7 = vmul.f32 1.442695, %v7319_v50 }
 0x434   : >> { %v3217_v54 = vmul.f32 %v3213_v32, %v6091_v26  ;;  %3949 = vcosq.f32 %v2379_v23  ;;  %v2384_v47 = vadd.s32 3, %v2380_v41 }
 0x435   : >> { %3951 = vsinq.f32 %v2379_v23  ;;  %vm6799_vm8 = vcmp.lt.f32.partialorder %v2608_v56, 1e-05 }
 0x436   : >> { %v3221_v42 = vsub.f32 %v3217_v54, %v3199_v49  ;;  %v3946_v37 = vpop.eup %3945  ;;  %v2385_v25 = vand.u32 3, %v2384_v47  ;;  %v2616_v31 = vsel %vm6799_vm8, 1.0, %v1554_v5 }
 0x437   : >> { %3953 = vrcp.f32 %v2616_v31 }
 0x438   : >> { %v3227_v9 = vadd.f32 %v7310_v10, %v3221_v42  ;;  %v1971_v42 = vxor.u32 2147483648, %v3946_v37  ;;  %vm2387_vm12 = vcmp.eq.s32.totalorder %v2385_v25, 0  ;;  %vm2390_vm13 = vcmp.eq.s32.totalorder %v2385_v25, 2 }
 0x439   : >> { %vm2386_vm15 = vcmp.lt.s32.totalorder %v2385_v25, 2  ;;  %3955 = vpow2.f32 %v2651_v7 }
 0x43a   : >> { %v3231_v3 = vmul.f32 %v3227_v9, %v6091_v26 }
 0x43c   : >> { %v3235_v39 = vsub.f32 %v3231_v3, %v3213_v32  ;;  %v1964_v32 = vadd.s32 3, %v1960_v55 }
 0x43e   : >> { %v3241_v2 = vadd.f32 %v7311_v51, %v3235_v39  ;;  %v1965_v63 = vand.u32 3, %v1964_v32 }
 0x440   : >> { %v3245_v14 = vmul.f32 %v3241_v2, %v6091_v26  ;;  %vm1970_vm10 = vcmp.eq.s32.totalorder %v1965_v63, 2  ;;  %vm1967_vm11 = vcmp.eq.s32.totalorder %v1965_v63, 0  ;;  %vm1966_vm14 = vcmp.lt.s32.totalorder %v1965_v63, 2 }
 0x442   : >> { %v3249_v33 = vsub.f32 %v3245_v14, %v3227_v9 }
 0x444   : >> { %v3255_v49 = vadd.f32 %v7316_v57, %v3249_v33 }
 0x446   : >> { %v3259_v4 = vmul.f32 %v3255_v49, %v6091_v26 }
 0x448   : >> { %v3263_v19 = vsub.f32 %v3259_v4, %v3241_v2 }
 0x44a   : >> { %v3269_v24 = vadd.f32 %v7290_v62, %v3263_v19  ;;  %v3948_v62 = vpop.eup %3947 }
 0x44b   : >> { %v3950_v8 = vpop.eup %3949  ;;  %v1968_v10 = vxor.u32 2147483648, %v3948_v62  ;;  %v1972_v3 = vsel %vm1970_vm10, %v1971_v42, %v3948_v62 }
 0x44c   : >> { %v3273_v16 = vmul.f32 %v3269_v24, %v6091_v26  ;;  %v3952_v15 = vpop.eup %3951 }
 0x44d   : >> { %v2388_v9 = vxor.u32 2147483648, %v3952_v15  ;;  %v1969_v11 = vsel %vm1967_vm11, %v3946_v37, %v1968_v10  ;;  %v3954_v13 = vpop.eup %3953 }
 0x44e   : >> { %v3277_v30 = vsub.f32 %v3273_v16, %v3255_v49  ;;  %v1973_v2 = vsel %vm1966_vm14, %v1969_v11, %v1972_v3  ;;  %v3956_v57 = vpop.eup %3955  ;;  %v7320_v49 = vld [vmem:[#allocation33_spill] sm:$0xff] }
 0x44f   : >> { %v2389_v35 = vsel %vm2387_vm12, %v3950_v8, %v2388_v9  ;;  %v1974_v6 = vsel %vm1963_vm9, nan, %v1973_v2 }
 0x450   : >> { %v3283_v34 = vadd.f32 %v7292_v1, %v3277_v30  ;;  %v2391_v1 = vxor.u32 2147483648, %v3950_v8 }
 0x452   : >> { %v3287_v22 = vmul.f32 %v3283_v34, %v6091_v26  ;;  %v2392_v39 = vsel %vm2390_vm13, %v2391_v1, %v3952_v15 }
 0x454   : >> { %v3291_v40 = vsub.f32 %v3287_v22, %v3269_v24 }
 0x456   : >> { %v3297_v59 = vadd.f32 %v7294_v18, %v3291_v40  ;;  %v2393_v18 = vsel %vm2386_vm15, %v2389_v35, %v2392_v39 }
 0x457   : >> { %v2394_v14 = vsel %vm2383_vm0, nan, %v2393_v18 }
 0x458   : >> { %v3301_v46 = vmul.f32 %v3297_v59, %v6091_v26  ;;  %v2604_v53 = vmul.f32 %v2394_v14, %v1974_v6 }
 0x45a   : >> { %v3305_v20 = vsub.f32 %v3301_v46, %v3283_v34 }
 0x45c   : >> { %v3311_v51 = vadd.f32 %v7297_v38, %v3305_v20  ;;  %v2624_v38 = vmul.f32 %v3954_v13, %v2604_v53 }
 0x45e   : >> { %v3315_v21 = vmul.f32 %v3311_v51, %v6091_v26  ;;  %v2628_v44 = vsel %vm6799_vm8, 0.0, %v2624_v38 }
 0x45f   : >> { %v3351_v61 = vmul.f32 1e-08, %v2628_v44 }
 0x460   : >> { %v3319_v60 = vsub.f32 %v3315_v21, %v3297_v59 }
 0x462   : >> { %v3325_v58 = vadd.f32 %v7237_v48, %v3319_v60 }
 0x464   : >> { %v3329_v33 = vmul.f32 %v3325_v58, %v6091_v26 }
 0x466   : >> { %v3333_v28 = vsub.f32 %v3329_v33, %v3311_v51 }
 0x468   : >> { %v3339_v43 = vadd.f32 %v7239_v36, %v3333_v28 }
 0x46a   : >> { %v3343_v12 = vmul.f32 %v3339_v43, %v7320_v49  ;;  %308 = sbr.rel (!%p306_p4) target bundleno = 96 (0x60), region = 102 }
 0x46c   : >> { %v3347_v45 = vmul.f32 %v3956_v57, %v3343_v12 }
 0x46e   : >> { %v3355_v23 = vadd.f32 %v3351_v61, %v3347_v45 }
 0x470   : >> { %3360 = vst [vmem:[%s5711_s9 + $0x8] sm:$0xff] %v3355_v23 }
 0x471   : > { %4029 = shalt.err (!%p4026_p0)
}
 0x472   : > { %s4030_s30 = scalar_lea.hbm %s6827_s25, 1024  ;;  %s4034_s16 = scalar_lea.hbm %s6881_s5, 4096 }
 0x473   : > { %p4031_p9 = scmp.ne.s32.totalorder %s6827_s25, %s4030_s30  ;;  %p4035_p12 = scmp.lt.u32.totalorder %s6827_s25, %s6881_s5 }
 0x474   : > { %p4036_p3 = scmp.lt.u32.totalorder %s4034_s16, %s4030_s30  ;;  %p4038_p7 = scmp.lt.u32.totalorder %s4030_s30, %s6827_s25 }
 0x475   : > { %p4032_p10 = pnand %p4031_p9, %p7321_p8 }
 0x476   : > { %p4037_p4 = por %p4036_p3, %p4035_p12 }
 0x477   : > { %p4033_p2 = pneg %p4032_p10 }
 0x478   : > { %p4039_p11 = por %p4038_p7, %p4037_p4 }
 0x47a   : > { %p4040_p13 = pnand %p4039_p11, %p4033_p2 }
 0x47c   : > { %4043 = shalt.err (!%p4040_p13)
}
 0x47d   : > { %s4113_s9 = smov 128   ;;  %s4114_s7 = smov 8  }
 0x47e   : > { %3798 = dma.vmem_to_hbm [thread:$0]  (%p7321_p8), %s6831_s26, 1024, %s6827_s25, %s6835_s17, %s4113_s9, %s4113_s9, %s4114_s7  }
 0x47f PF: > { %p3820_p1 = scmp.ge.s32.totalorder %s4094_s21, 2  ;;  %s3392_s11 = sand.u32 1, %s4082_s18  }
 0x480   : > { %p7322_p6 = scmp.ne.s32.totalorder %s7031_s29, 0  ;;  %s3393_s14 = scalar_lea.sflag [#allocation4], %s3392_s11 }
 0x482   : > { %p3811_p5 = pnand %p3820_p1, %p7322_p6 }
 0x484   : > { %4077 = dma.done.wait (!%p3811_p5), %s3393_s14, 1024  }
 0x485   : > { %4079 = vsyncadd (!%p3811_p5), %s3393_s14, 4294966272  ;;  %p18_p0 = scmp.ge.s32.totalorder %s4170_s24, 6   ;;  %s7323_s18 = smov %s4086_s19 }
 0x486   : > { %s7324_s19 = smov %s4090_s20  ;;  %s7325_s20 = smov %s4181_s27 }
 0x487   : > { %s7326_s21 = smov %s4170_s24  ;;  %20 = sbr.rel (!%p18_p0) target bundleno = 6 (0x6), region = 113 }
 0x48e   :  { %3398 = vsyncpa [#allocation3], 1 }
 0x48f   :  { %3400 = vsyncpa [#allocation3 + $0x1], 1 }
 0x490   :  { %3401 = vsyncpa [#allocation4], 1 }
 0x491   :  { %3403 = vsyncpa [#allocation4 + $0x1], 1 }
 0x492   :  { %3404 = vsyncpa [#allocation5], 1 }
 0x493   :  { %3406 = vsyncpa [#allocation5 + $0x1], 1 }
 0x494   :  { %3407 = vsyncpa [#allocation8], 1 }

</bundles_post_ra>
